<compile_context>
chip_gen: v7x
topology: tpu7x:2x2x1
jax: 0.10.0
libtpu: 0.0.40
codegen_flags: <defaults>
</compile_context>

<pallas_src>
import jax
import jax.numpy as jnp
from jax.experimental import pallas as pl
from jax.experimental.pallas import tpu as pltpu

LANE = 128  # lane width: pad output channel dims to this for lane-dense stores


def _round_up(x, m):
    return ((x + m - 1) // m) * m


# ----------------------------------------------------------------------------
# Pallas kernels
# ----------------------------------------------------------------------------
def _conv_relu_pool_kernel(p_ref, w_ref, b_ref, o_ref):
    """Fused im2col-conv + bias + ReLU + 2x2 max-pool for one M-tile.

    p_ref : (4, TM, K)   four pool-candidate patch rows per pooled output pos
    w_ref : (K, 128)     conv weight, Cout zero-padded to a lane-dense 128
    b_ref : (1, 128)     bias, zero-padded
    o_ref : (TM, 128)    pooled activations (padded channels are zero)

    max_q relu(p_q @ W + b) == relu(max_q(p_q @ W) + b)  (monotone bias/relu).
    """
    w = w_ref[...]
    s = jnp.dot(p_ref[0], w, preferred_element_type=jnp.float32)
    for q in range(1, 4):
        s = jnp.maximum(
            s, jnp.dot(p_ref[q], w, preferred_element_type=jnp.float32))
    o_ref[...] = jnp.maximum(s + b_ref[...], 0.0).astype(o_ref.dtype)


def _mlp_kernel(x_ref, w1_ref, b1_ref, w2_ref, b2_ref, o_ref):
    """Fused fc1 + ReLU + fc2 for one batch-row tile (all VMEM-resident)."""
    h = jnp.dot(x_ref[...], w1_ref[...], preferred_element_type=jnp.float32)
    h = jnp.maximum(h + b1_ref[...], 0.0)
    o = jnp.dot(h, w2_ref[...], preferred_element_type=jnp.float32)
    o_ref[...] = (o + b2_ref[...]).astype(o_ref.dtype)


# ----------------------------------------------------------------------------
# Pallas wrappers (M-tiled, parallel grid, lane-dense outputs)
# ----------------------------------------------------------------------------
def conv_relu_pool_pallas(p4, w, b, *, tm=256):
    """p4: (4, M, K) pooled im2col patches, w: (K, 128), b: (1, 128) -> (M, 128)."""
    _, M, K = p4.shape
    Np = w.shape[1]
    tm = min(tm, _round_up(M, 8))          # keep tiles VMEM-small for tiny M
    Mp = _round_up(M, tm)
    if Mp != M:
        p4 = jnp.pad(p4, ((0, 0), (0, Mp - M), (0, 0)))
    out = pl.pallas_call(
        _conv_relu_pool_kernel,
        out_shape=jax.ShapeDtypeStruct((Mp, Np), jnp.float32),
        grid=(Mp // tm,),
        in_specs=[pl.BlockSpec((4, tm, K), lambda m: (0, m, 0)),
                  pl.BlockSpec((K, Np), lambda m: (0, 0)),
                  pl.BlockSpec((1, Np), lambda m: (0, 0))],
        out_specs=pl.BlockSpec((tm, Np), lambda m: (m, 0)),
        compiler_params=pltpu.CompilerParams(
            dimension_semantics=("parallel",)),
    )(p4, w, b)
    return out[:M]


def mlp_pallas(x, w1, b1, w2, b2, *, tb=256):
    """Fused y = (relu(x @ w1 + b1)) @ w2 + b2, tiled over batch rows."""
    B, K = x.shape
    H = w1.shape[1]
    Np = w2.shape[1]
    tb = min(tb, _round_up(B, 8))
    Bp = _round_up(B, tb)
    if Bp != B:
        x = jnp.pad(x, ((0, Bp - B), (0, 0)))
    out = pl.pallas_call(
        _mlp_kernel,
        out_shape=jax.ShapeDtypeStruct((Bp, Np), jnp.float32),
        grid=(Bp // tb,),
        in_specs=[pl.BlockSpec((tb, K), lambda m: (m, 0)),
                  pl.BlockSpec((K, H), lambda m: (0, 0)),
                  pl.BlockSpec((1, H), lambda m: (0, 0)),
                  pl.BlockSpec((H, Np), lambda m: (0, 0)),
                  pl.BlockSpec((1, Np), lambda m: (0, 0))],
        out_specs=pl.BlockSpec((tb, Np), lambda m: (m, 0)),
        compiler_params=pltpu.CompilerParams(
            dimension_semantics=("parallel",)),
    )(x, w1, b1, w2, b2)
    return out[:B]


# ----------------------------------------------------------------------------
# Host-side glue: pooled im2col (patch extraction stays in XLA)
# ----------------------------------------------------------------------------
def pooled_im2col(x, kh=3, kw=3):
    """x: (B,H,W,C) NHWC -> (4, B*Hp*Wp, C*kh*kw).

    Row m = b*Hp*Wp + hp*Wp + wp holds, for pool-candidate q = 2*i + j, the
    im2col patch of conv output position (2*hp+i, 2*wp+j).  Floor-mode pooling
    (torch MaxPool2d default) falls out of Hp = Ho//2, Wp = Wo//2.
    Patch vector ordered (C, kh, kw) to match torch Conv2d weight flattening.
    """
    # TODO(synk): for large inputs, move this gather into the kernel (manual DMA
    # of NHWC tiles + shifted matmuls) to avoid the 9x im2col HBM expansion.
    B, H, W, C = x.shape
    Ho, Wo = H - kh + 1, W - kw + 1
    Hp, Wp = Ho // 2, Wo // 2
    cols = [x[:, ky:ky + Ho, kx:kx + Wo, :]
            for ky in range(kh) for kx in range(kw)]
    p = jnp.stack(cols, axis=-1).reshape(B, Ho, Wo, C * kh * kw)
    quads = []
    for i in range(2):
        for j in range(2):
            q = p[:, i:i + 2 * Hp:2, j:j + 2 * Wp:2, :]
            quads.append(q.reshape(B * Hp * Wp, C * kh * kw))
    return jnp.stack(quads, axis=0)


# ----------------------------------------------------------------------------
# Parameters (torch-style init) + one-time kernel-friendly preparation
# ----------------------------------------------------------------------------
def init_params(key):
    ks = jax.random.split(key, 8)

    def init(k, shape, fan_in):
        bound = 1.0 / float(fan_in) ** 0.5
        return jax.random.uniform(k, shape, jnp.float32, -bound, bound)

    return {
        "w_conv1": init(ks[0], (32, 1, 3, 3), 1 * 3 * 3),
        "b_conv1": init(ks[1], (32,), 1 * 3 * 3),
        "w_conv2": init(ks[2], (64, 32, 3, 3), 32 * 3 * 3),
        "b_conv2": init(ks[3], (64,), 32 * 3 * 3),
        "w_fc1": init(ks[4], (128, 64 * 5 * 5), 64 * 5 * 5),   # torch (out, in)
        "b_fc1": init(ks[5], (128,), 64 * 5 * 5),
        "w_fc2": init(ks[6], (10, 128), 128),
        "b_fc2": init(ks[7], (10,), 128),
    }


def _pad_cols(a, n):
    return jnp.pad(a, ((0, 0), (0, n - a.shape[1])))


def prepare_params(p):
    """One-time (hoisted out of the forward) conversion to kernel layout:
    pre-transposed weights, Cout / logits zero-padded to lane-dense 128, and
    fc1 rows permuted from torch's (C,H,W) flatten order to the kernel's
    (H,W,C) order so no activation transpose is needed per call."""
    w1 = _pad_cols(p["w_conv1"].reshape(32, 1 * 3 * 3).T, LANE)     # (9, 128)
    b1 = _pad_cols(p["b_conv1"].reshape(1, 32), LANE)               # (1, 128)
    w2 = _pad_cols(p["w_conv2"].reshape(64, 32 * 3 * 3).T, LANE)    # (288, 128)
    b2 = _pad_cols(p["b_conv2"].reshape(1, 64), LANE)               # (1, 128)
    wf1 = (p["w_fc1"].T                                             # (1600,128), rows (c,h,w)
           .reshape(64, 5, 5, 128).transpose(1, 2, 0, 3)            # -> (h,w,c,out)
           .reshape(64 * 5 * 5, 128))
    bf1 = p["b_fc1"].reshape(1, 128)
    wf2 = _pad_cols(p["w_fc2"].T, LANE)                             # (128, 128)
    bf2 = _pad_cols(p["b_fc2"].reshape(1, 10), LANE)                # (1, 128)
    return {"w1": w1, "b1": b1, "w2": w2, "b2": b2,
            "wf1": wf1, "bf1": bf1, "wf2": wf2, "bf2": bf2}


# ----------------------------------------------------------------------------
# Forward pass (matches CNN.forward semantics)
# ----------------------------------------------------------------------------
def cnn_forward(prep, x_nchw):
    B, _, H, W = x_nchw.shape
    x = x_nchw.reshape(B, H, W, 1).astype(jnp.float32)  # C==1: NCHW->NHWC is a pure reshape

    # conv1(1->32, 3x3) + ReLU + maxpool2  (one fused Pallas call)
    h1, w1 = (H - 2) // 2, (W - 2) // 2
    y = conv_relu_pool_pallas(pooled_im2col(x), prep["w1"], prep["b1"])
    y = y[:, :32].reshape(B, h1, w1, 32)                             # (B,13,13,32)

    # conv2(32->64, 3x3) + ReLU + maxpool2  (one fused Pallas call)
    h2, w2 = (h1 - 2) // 2, (w1 - 2) // 2
    y = conv_relu_pool_pallas(pooled_im2col(y), prep["w2"], prep["b2"])
    # (H,W,C)-ordered flatten; fc1 weight rows were permuted to match at prep time.
    y = y[:, :64].reshape(B, h2 * w2 * 64)                           # (B, 1600)

    # fc1(1600->128) + ReLU + fc2(128->10)  (one fused Pallas call)
    out = mlp_pallas(y, prep["wf1"], prep["bf1"], prep["wf2"], prep["bf2"])
    return out[:, :10]


if __name__ == "__main__":
    key = jax.random.PRNGKey(0)
    k_param, k_x = jax.random.split(key)
    params = init_params(k_param)
    prep = prepare_params(params)          # hoisted: runs once, not per forward
    # Input shape implied by the module: 1-channel 28x28 images (MNIST-like).
    x = jax.random.normal(k_x, (2, 1, 28, 28), dtype=jnp.float32)

    fwd = jax.jit(cnn_forward)
    out = fwd(prep, x)
    jax.block_until_ready(out)
    assert out.shape == (2, 10) and out.dtype == jnp.float32
    print("KERNEL_OK")
</pallas_src>

<mosaic_0001>
module attributes {stable_mosaic.version = 11 : i64} {
  func.func @_conv_relu_pool_kernel(%arg0: i32, %arg1: memref<4x256x9xf32, #tpu.memory_space<vmem>>, %arg2: memref<9x128xf32, #tpu.memory_space<vmem>>, %arg3: memref<1x128xf32, #tpu.memory_space<vmem>>, %arg4: memref<256x128xf32, #tpu.memory_space<vmem>>) attributes {dimension_semantics = [#tpu.dimension_semantics<parallel>], iteration_bounds = array<i64: 2>, scalar_prefetch = 0 : i64, scratch_operands = 0 : i64, tpu.core_type = #tpu.core_type<tc>, window_params = [{transform_indices = @transform_0, window_bounds = array<i64: 4, 256, 9>}, {pipeline_mode = #tpu.pipeline_mode<synchronous>, transform_indices = @transform_1, window_bounds = array<i64: 9, 128>}, {pipeline_mode = #tpu.pipeline_mode<synchronous>, transform_indices = @transform_2, window_bounds = array<i64: 1, 128>}, {transform_indices = @transform_3, window_bounds = array<i64: 256, 128>}]} {
    %c0 = arith.constant 0 : index
    %c0_0 = arith.constant 0 : index
    %0 = vector.load %arg2[%c0, %c0_0] : memref<9x128xf32, #tpu.memory_space<vmem>>, vector<9x128xf32>
    %c0_1 = arith.constant 0 : index
    %c0_2 = arith.constant 0 : index
    %c0_3 = arith.constant 0 : index
    %1 = vector.load %arg1[%c0_1, %c0_2, %c0_3] : memref<4x256x9xf32, #tpu.memory_space<vmem>>, vector<1x256x9xf32>
    %2 = vector.shape_cast %1 : vector<1x256x9xf32> to vector<256x9xf32>
    %cst = arith.constant dense<0.000000e+00> : vector<256x128xf32>
    %3 = tpu.matmul %2, %0, %cst {dimension_numbers = #tpu.dot_dimension_numbers<[1], [0], [0], [1], [0, 0, 1, 1], [], []>} : vector<256x9xf32>, vector<9x128xf32>, vector<256x128xf32> -> vector<256x128xf32>
    %c1 = arith.constant 1 : index
    %c0_4 = arith.constant 0 : index
    %c0_5 = arith.constant 0 : index
    %4 = vector.load %arg1[%c1, %c0_4, %c0_5] : memref<4x256x9xf32, #tpu.memory_space<vmem>>, vector<1x256x9xf32>
    %5 = vector.shape_cast %4 : vector<1x256x9xf32> to vector<256x9xf32>
    %cst_6 = arith.constant dense<0.000000e+00> : vector<256x128xf32>
    %6 = tpu.matmul %5, %0, %cst_6 {dimension_numbers = #tpu.dot_dimension_numbers<[1], [0], [0], [1], [0, 0, 1, 1], [], []>} : vector<256x9xf32>, vector<9x128xf32>, vector<256x128xf32> -> vector<256x128xf32>
    %7 = arith.maximumf %3, %6 : vector<256x128xf32>
    %c2 = arith.constant 2 : index
    %c0_7 = arith.constant 0 : index
    %c0_8 = arith.constant 0 : index
    %8 = vector.load %arg1[%c2, %c0_7, %c0_8] : memref<4x256x9xf32, #tpu.memory_space<vmem>>, vector<1x256x9xf32>
    %9 = vector.shape_cast %8 : vector<1x256x9xf32> to vector<256x9xf32>
    %cst_9 = arith.constant dense<0.000000e+00> : vector<256x128xf32>
    %10 = tpu.matmul %9, %0, %cst_9 {dimension_numbers = #tpu.dot_dimension_numbers<[1], [0], [0], [1], [0, 0, 1, 1], [], []>} : vector<256x9xf32>, vector<9x128xf32>, vector<256x128xf32> -> vector<256x128xf32>
    %11 = arith.maximumf %7, %10 : vector<256x128xf32>
    %c3 = arith.constant 3 : index
    %c0_10 = arith.constant 0 : index
    %c0_11 = arith.constant 0 : index
    %12 = vector.load %arg1[%c3, %c0_10, %c0_11] : memref<4x256x9xf32, #tpu.memory_space<vmem>>, vector<1x256x9xf32>
    %13 = vector.shape_cast %12 : vector<1x256x9xf32> to vector<256x9xf32>
    %cst_12 = arith.constant dense<0.000000e+00> : vector<256x128xf32>
    %14 = tpu.matmul %13, %0, %cst_12 {dimension_numbers = #tpu.dot_dimension_numbers<[1], [0], [0], [1], [0, 0, 1, 1], [], []>} : vector<256x9xf32>, vector<9x128xf32>, vector<256x128xf32> -> vector<256x128xf32>
    %15 = arith.maximumf %11, %14 : vector<256x128xf32>
    %c0_13 = arith.constant 0 : index
    %c0_14 = arith.constant 0 : index
    %16 = vector.load %arg3[%c0_13, %c0_14] : memref<1x128xf32, #tpu.memory_space<vmem>>, vector<1x128xf32>
    %17 = vector.broadcast %16 : vector<1x128xf32> to vector<256x128xf32>
    %18 = arith.addf %15, %17 : vector<256x128xf32>
    %cst_15 = arith.constant 0.000000e+00 : f32
    %19 = vector.broadcast %cst_15 : f32 to vector<256x128xf32>
    %20 = arith.maximumf %18, %19 : vector<256x128xf32>
    %c0_16 = arith.constant 0 : index
    %c0_17 = arith.constant 0 : index
    %21 = vector.load %arg4[%c0_16, %c0_17] : memref<256x128xf32, #tpu.memory_space<vmem>>, vector<256x128xf32>
    tpu.vector_store %arg4[%c0_16, %c0_17], %20 {strides = array<i32>} : memref<256x128xf32, #tpu.memory_space<vmem>>, vector<256x128xf32>,
    return
  }
  func.func @transform_0(%arg0: i32) -> (i32, i32, i32) {
    %c0_i32 = arith.constant 0 : i32
    %c0_i32_0 = arith.constant 0 : i32
    %c0_i32_1 = arith.constant 0 : i32
    return %c0_i32, %arg0, %c0_i32_0 : i32, i32, i32
  }
  func.func @transform_1(%arg0: i32) -> (i32, i32) {
    %c0_i32 = arith.constant 0 : i32
    %c0_i32_0 = arith.constant 0 : i32
    %c0_i32_1 = arith.constant 0 : i32
    return %c0_i32, %c0_i32_0 : i32, i32
  }
  func.func @transform_2(%arg0: i32) -> (i32, i32) {
    %c0_i32 = arith.constant 0 : i32
    %c0_i32_0 = arith.constant 0 : i32
    %c0_i32_1 = arith.constant 0 : i32
    return %c0_i32, %c0_i32_0 : i32, i32
  }
  func.func @transform_3(%arg0: i32) -> (i32, i32) {
    %c0_i32 = arith.constant 0 : i32
    %c0_i32_0 = arith.constant 0 : i32
    return %arg0, %c0_i32 : i32, i32
  }
}

module attributes {stable_mosaic.version = 11 : i64} {
  func.func @_conv_relu_pool_kernel(%arg0: i32, %arg1: memref<4x56x288xf32, #tpu.memory_space<vmem>>, %arg2: memref<288x128xf32, #tpu.memory_space<vmem>>, %arg3: memref<1x128xf32, #tpu.memory_space<vmem>>, %arg4: memref<56x128xf32, #tpu.memory_space<vmem>>) attributes {dimension_semantics = [#tpu.dimension_semantics<parallel>], iteration_bounds = array<i64: 1>, scalar_prefetch = 0 : i64, scratch_operands = 0 : i64, tpu.core_type = #tpu.core_type<tc>, window_params = [{transform_indices = @transform_0, window_bounds = array<i64: 4, 56, 288>}, {pipeline_mode = #tpu.pipeline_mode<synchronous>, transform_indices = @transform_1, window_bounds = array<i64: 288, 128>}, {pipeline_mode = #tpu.pipeline_mode<synchronous>, transform_indices = @transform_2, window_bounds = array<i64: 1, 128>}, {transform_indices = @transform_3, window_bounds = array<i64: 56, 128>}]} {
    %c0 = arith.constant 0 : index
    %c0_0 = arith.constant 0 : index
    %0 = vector.load %arg2[%c0, %c0_0] : memref<288x128xf32, #tpu.memory_space<vmem>>, vector<288x128xf32>
    %c0_1 = arith.constant 0 : index
    %c0_2 = arith.constant 0 : index
    %c0_3 = arith.constant 0 : index
    %1 = vector.load %arg1[%c0_1, %c0_2, %c0_3] : memref<4x56x288xf32, #tpu.memory_space<vmem>>, vector<1x56x288xf32>
    %2 = vector.shape_cast %1 : vector<1x56x288xf32> to vector<56x288xf32>
    %cst = arith.constant dense<0.000000e+00> : vector<56x128xf32>
    %3 = tpu.matmul %2, %0, %cst {dimension_numbers = #tpu.dot_dimension_numbers<[1], [0], [0], [1], [0, 0, 1, 1], [], []>} : vector<56x288xf32>, vector<288x128xf32>, vector<56x128xf32> -> vector<56x128xf32>
    %c1 = arith.constant 1 : index
    %c0_4 = arith.constant 0 : index
    %c0_5 = arith.constant 0 : index
    %4 = vector.load %arg1[%c1, %c0_4, %c0_5] : memref<4x56x288xf32, #tpu.memory_space<vmem>>, vector<1x56x288xf32>
    %5 = vector.shape_cast %4 : vector<1x56x288xf32> to vector<56x288xf32>
    %cst_6 = arith.constant dense<0.000000e+00> : vector<56x128xf32>
    %6 = tpu.matmul %5, %0, %cst_6 {dimension_numbers = #tpu.dot_dimension_numbers<[1], [0], [0], [1], [0, 0, 1, 1], [], []>} : vector<56x288xf32>, vector<288x128xf32>, vector<56x128xf32> -> vector<56x128xf32>
    %7 = arith.maximumf %3, %6 : vector<56x128xf32>
    %c2 = arith.constant 2 : index
    %c0_7 = arith.constant 0 : index
    %c0_8 = arith.constant 0 : index
    %8 = vector.load %arg1[%c2, %c0_7, %c0_8] : memref<4x56x288xf32, #tpu.memory_space<vmem>>, vector<1x56x288xf32>
    %9 = vector.shape_cast %8 : vector<1x56x288xf32> to vector<56x288xf32>
    %cst_9 = arith.constant dense<0.000000e+00> : vector<56x128xf32>
    %10 = tpu.matmul %9, %0, %cst_9 {dimension_numbers = #tpu.dot_dimension_numbers<[1], [0], [0], [1], [0, 0, 1, 1], [], []>} : vector<56x288xf32>, vector<288x128xf32>, vector<56x128xf32> -> vector<56x128xf32>
    %11 = arith.maximumf %7, %10 : vector<56x128xf32>
    %c3 = arith.constant 3 : index
    %c0_10 = arith.constant 0 : index
    %c0_11 = arith.constant 0 : index
    %12 = vector.load %arg1[%c3, %c0_10, %c0_11] : memref<4x56x288xf32, #tpu.memory_space<vmem>>, vector<1x56x288xf32>
    %13 = vector.shape_cast %12 : vector<1x56x288xf32> to vector<56x288xf32>
    %cst_12 = arith.constant dense<0.000000e+00> : vector<56x128xf32>
    %14 = tpu.matmul %13, %0, %cst_12 {dimension_numbers = #tpu.dot_dimension_numbers<[1], [0], [0], [1], [0, 0, 1, 1], [], []>} : vector<56x288xf32>, vector<288x128xf32>, vector<56x128xf32> -> vector<56x128xf32>
    %15 = arith.maximumf %11, %14 : vector<56x128xf32>
    %c0_13 = arith.constant 0 : index
    %c0_14 = arith.constant 0 : index
    %16 = vector.load %arg3[%c0_13, %c0_14] : memref<1x128xf32, #tpu.memory_space<vmem>>, vector<1x128xf32>
    %17 = vector.broadcast %16 : vector<1x128xf32> to vector<56x128xf32>
    %18 = arith.addf %15, %17 : vector<56x128xf32>
    %cst_15 = arith.constant 0.000000e+00 : f32
    %19 = vector.broadcast %cst_15 : f32 to vector<56x128xf32>
    %20 = arith.maximumf %18, %19 : vector<56x128xf32>
    %c0_16 = arith.constant 0 : index
    %c0_17 = arith.constant 0 : index
    %21 = vector.load %arg4[%c0_16, %c0_17] : memref<56x128xf32, #tpu.memory_space<vmem>>, vector<56x128xf32>
    tpu.vector_store %arg4[%c0_16, %c0_17], %20 {strides = array<i32>} : memref<56x128xf32, #tpu.memory_space<vmem>>, vector<56x128xf32>,
    return
  }
  func.func @transform_0(%arg0: i32) -> (i32, i32, i32) {
    %c0_i32 = arith.constant 0 : i32
    %c0_i32_0 = arith.constant 0 : i32
    %c0_i32_1 = arith.constant 0 : i32
    return %c0_i32, %arg0, %c0_i32_0 : i32, i32, i32
  }
  func.func @transform_1(%arg0: i32) -> (i32, i32) {
    %c0_i32 = arith.constant 0 : i32
    %c0_i32_0 = arith.constant 0 : i32
    %c0_i32_1 = arith.constant 0 : i32
    return %c0_i32, %c0_i32_0 : i32, i32
  }
  func.func @transform_2(%arg0: i32) -> (i32, i32) {
    %c0_i32 = arith.constant 0 : i32
    %c0_i32_0 = arith.constant 0 : i32
    %c0_i32_1 = arith.constant 0 : i32
    return %c0_i32, %c0_i32_0 : i32, i32
  }
  func.func @transform_3(%arg0: i32) -> (i32, i32) {
    %c0_i32 = arith.constant 0 : i32
    %c0_i32_0 = arith.constant 0 : i32
    return %arg0, %c0_i32 : i32, i32
  }
}

module attributes {stable_mosaic.version = 11 : i64} {
  func.func @_mlp_kernel(%arg0: i32, %arg1: memref<8x1600xf32, #tpu.memory_space<vmem>>, %arg2: memref<1600x128xf32, #tpu.memory_space<vmem>>, %arg3: memref<1x128xf32, #tpu.memory_space<vmem>>, %arg4: memref<128x128xf32, #tpu.memory_space<vmem>>, %arg5: memref<1x128xf32, #tpu.memory_space<vmem>>, %arg6: memref<8x128xf32, #tpu.memory_space<vmem>>) attributes {dimension_semantics = [#tpu.dimension_semantics<parallel>], iteration_bounds = array<i64: 1>, scalar_prefetch = 0 : i64, scratch_operands = 0 : i64, tpu.core_type = #tpu.core_type<tc>, window_params = [{transform_indices = @transform_0, window_bounds = array<i64: 8, 1600>}, {pipeline_mode = #tpu.pipeline_mode<synchronous>, transform_indices = @transform_1, window_bounds = array<i64: 1600, 128>}, {pipeline_mode = #tpu.pipeline_mode<synchronous>, transform_indices = @transform_2, window_bounds = array<i64: 1, 128>}, {pipeline_mode = #tpu.pipeline_mode<synchronous>, transform_indices = @transform_3, window_bounds = array<i64: 128, 128>}, {pipeline_mode = #tpu.pipeline_mode<synchronous>, transform_indices = @transform_4, window_bounds = array<i64: 1, 128>}, {transform_indices = @transform_5, window_bounds = array<i64: 8, 128>}]} {
    %c0 = arith.constant 0 : index
    %c0_0 = arith.constant 0 : index
    %0 = vector.load %arg1[%c0, %c0_0] : memref<8x1600xf32, #tpu.memory_space<vmem>>, vector<8x1600xf32>
    %c0_1 = arith.constant 0 : index
    %c0_2 = arith.constant 0 : index
    %1 = vector.load %arg2[%c0_1, %c0_2] : memref<1600x128xf32, #tpu.memory_space<vmem>>, vector<1600x128xf32>
    %cst = arith.constant dense<0.000000e+00> : vector<8x128xf32>
    %2 = tpu.matmul %0, %1, %cst {dimension_numbers = #tpu.dot_dimension_numbers<[1], [0], [0], [1], [0, 0, 1, 1], [], []>} : vector<8x1600xf32>, vector<1600x128xf32>, vector<8x128xf32> -> vector<8x128xf32>
    %c0_3 = arith.constant 0 : index
    %c0_4 = arith.constant 0 : index
    %3 = vector.load %arg3[%c0_3, %c0_4] : memref<1x128xf32, #tpu.memory_space<vmem>>, vector<1x128xf32>
    %4 = vector.broadcast %3 : vector<1x128xf32> to vector<8x128xf32>
    %5 = arith.addf %2, %4 : vector<8x128xf32>
    %cst_5 = arith.constant 0.000000e+00 : f32
    %6 = vector.broadcast %cst_5 : f32 to vector<8x128xf32>
    %7 = arith.maximumf %5, %6 : vector<8x128xf32>
    %c0_6 = arith.constant 0 : index
    %c0_7 = arith.constant 0 : index
    %8 = vector.load %arg4[%c0_6, %c0_7] : memref<128x128xf32, #tpu.memory_space<vmem>>, vector<128x128xf32>
    %cst_8 = arith.constant dense<0.000000e+00> : vector<8x128xf32>
    %9 = tpu.matmul %7, %8, %cst_8 {dimension_numbers = #tpu.dot_dimension_numbers<[1], [0], [0], [1], [0, 0, 1, 1], [], []>} : vector<8x128xf32>, vector<128x128xf32>, vector<8x128xf32> -> vector<8x128xf32>
    %c0_9 = arith.constant 0 : index
    %c0_10 = arith.constant 0 : index
    %10 = vector.load %arg5[%c0_9, %c0_10] : memref<1x128xf32, #tpu.memory_space<vmem>>, vector<1x128xf32>
    %11 = vector.broadcast %10 : vector<1x128xf32> to vector<8x128xf32>
    %12 = arith.addf %9, %11 : vector<8x128xf32>
    %c0_11 = arith.constant 0 : index
    %c0_12 = arith.constant 0 : index
    %13 = vector.load %arg6[%c0_11, %c0_12] : memref<8x128xf32, #tpu.memory_space<vmem>>, vector<8x128xf32>
    tpu.vector_store %arg6[%c0_11, %c0_12], %12 {strides = array<i32>} : memref<8x128xf32, #tpu.memory_space<vmem>>, vector<8x128xf32>,
    return
  }
  func.func @transform_0(%arg0: i32) -> (i32, i32) {
    %c0_i32 = arith.constant 0 : i32
    %c0_i32_0 = arith.constant 0 : i32
    return %arg0, %c0_i32 : i32, i32
  }
  func.func @transform_1(%arg0: i32) -> (i32, i32) {
    %c0_i32 = arith.constant 0 : i32
    %c0_i32_0 = arith.constant 0 : i32
    %c0_i32_1 = arith.constant 0 : i32
    return %c0_i32, %c0_i32_0 : i32, i32
  }
  func.func @transform_2(%arg0: i32) -> (i32, i32) {
    %c0_i32 = arith.constant 0 : i32
    %c0_i32_0 = arith.constant 0 : i32
    %c0_i32_1 = arith.constant 0 : i32
    return %c0_i32, %c0_i32_0 : i32, i32
  }
  func.func @transform_3(%arg0: i32) -> (i32, i32) {
    %c0_i32 = arith.constant 0 : i32
    %c0_i32_0 = arith.constant 0 : i32
    %c0_i32_1 = arith.constant 0 : i32
    return %c0_i32, %c0_i32_0 : i32, i32
  }
  func.func @transform_4(%arg0: i32) -> (i32, i32) {
    %c0_i32 = arith.constant 0 : i32
    %c0_i32_0 = arith.constant 0 : i32
    %c0_i32_1 = arith.constant 0 : i32
    return %c0_i32, %c0_i32_0 : i32, i32
  }
  func.func @transform_5(%arg0: i32) -> (i32, i32) {
    %c0_i32 = arith.constant 0 : i32
    %c0_i32_0 = arith.constant 0 : i32
    return %arg0, %c0_i32 : i32, i32
  }
}

</mosaic_0001>

<bundles_post_ra>
// kernel: cnn_forward.3
= control target key start
LH: loop header
LB: loop body
LE: loop exit
PB: predicated region body
PF: predicated region fallthrough
CT: control target
= control target key end

     0   :  { %s3080_s12 = smov 0   ;;  %s3082_s13 = smov 0   ;;  %s4035_s0 = inlined_call_operand.vmem [shape: f32[4,512,9], index: 0, kind: input, shape index: {}]   ;;  %s4036_s1 = inlined_call_operand.vmem [shape: f32[9,128], index: 1, kind: input, shape index: {}]   ;;  %s4037_s2 = inlined_call_operand.vmem [shape: f32[1,128], index: 2, kind: input, shape index: {}]   ;;  %s4038_s3 = inlined_call_operand.vmem [shape: f32[512,128], index: 3, kind: output, shape index: {}]  }
   0x1   :  { %s3084_s14 = smov 0  }
   0x2 LB: > { %s2399_s15 = sadd.s32 4294967295, %s3057_s14   ;;  %s3097_s16 = sadd.s32 1, %s3057_s14   ;;  %s3057_s14 = sphi %s3084_s14, %s4117_s14   ;;  %s3053_s13 = sphi %s3082_s13, %s4116_s13   ;;  %s3049_s12 = sphi %s3080_s12, %s4115_s12  }
   0x3   : > { %s17_s17 = ssub.s32 %s3057_s14, %s3097_s16  ;;  %s20_s18 = sadd.s32 1, %s3053_s13 }
   0x4   : > { %p18_p0 = scmp.eq.s32.totalorder %s17_s17, 0  ;;  %p27_p1 = scmp.ne.s32.totalorder %s3053_s13, %s3049_s12 }
   0x5   : > { %p28_p2 = scmp.eq.s32.totalorder %s3057_s14, 0  ;;  %p2402_p4 = scmp.ge.s32.totalorder %s3057_s14, 2 }
   0x6   : > { %s3106_s19 = scalar_select %p18_p0, %s3053_s13, %s20_s18  }
   0x7   : > { %p29_p3 = por %p28_p2, %p27_p1  ;;  %127 = sbr.rel (%p2402_p4) target bundleno = 82 (0x52), region = 24 }
   0xe   : > { %130 = sbr.rel (!%p29_p3) target bundleno = 82 (0x52), region = 28  ;;  %s132_s20 = sand.u32 (%p29_p3), 1, %s3053_s13  }
   0xf   : > { %s2641_s21 = sshll.u32 (%p29_p3), %s3057_s14, 8  ;;  %s2403_s22 = sshll.u32 (%p29_p3), %s132_s20, 10 }
  0x10   : > { %s3114_s25 = scalar_lea.vmem (%p29_p3), %s4035_s0, %s2641_s21  ;;  %s3119_s26 = scalar_lea.vmem (%p29_p3), [#allocation2], %s2403_s22 }
  0x11   : > { %v419_v0 = vld [vmem:[%s3114_s25] sm:$0xff] (%p29_p3)  ;;  %v421_v1 = vld [vmem:[%s3114_s25 + $0x8] sm:$0xff] (%p29_p3)  ;;  %v423_v2 = vld [vmem:[%s3114_s25 + $0x10] sm:$0xff] (%p29_p3) }
  0x12   : > { %420 = vst [vmem:[%s3119_s26] sm:$0xff] (%p29_p3), %v419_v0  ;;  %422 = vst [vmem:[%s3119_s26 + $0x8] sm:$0xff] (%p29_p3), %v421_v1  ;;  %v425_v3 = vld [vmem:[%s3114_s25 + $0x18] sm:$0xff] (%p29_p3)  ;;  %v427_v4 = vld [vmem:[%s3114_s25 + $0x20] sm:$0xff] (%p29_p3) }
  0x13   : > { %424 = vst [vmem:[%s3119_s26 + $0x10] sm:$0xff] (%p29_p3), %v423_v2  ;;  %v429_v5 = vld [vmem:[%s3114_s25 + $0x28] sm:$0xff] (%p29_p3)  ;;  %426 = vst [vmem:[%s3119_s26 + $0x18] sm:$0xff] (%p29_p3), %v425_v3  ;;  %v431_v6 = vld [vmem:[%s3114_s25 + $0x30] sm:$0xff] (%p29_p3) }
  0x14   : > { %428 = vst [vmem:[%s3119_s26 + $0x20] sm:$0xff] (%p29_p3), %v427_v4  ;;  %430 = vst [vmem:[%s3119_s26 + $0x28] sm:$0xff] (%p29_p3), %v429_v5  ;;  %v433_v7 = vld [vmem:[%s3114_s25 + $0x38] sm:$0xff] (%p29_p3)  ;;  %v435_v8 = vld [vmem:[%s3114_s25 + $0x40] sm:$0xff] (%p29_p3) }
  0x15   : > { %432 = vst [vmem:[%s3119_s26 + $0x30] sm:$0xff] %v431_v6  ;;  %434 = vst [vmem:[%s3119_s26 + $0x38] sm:$0xff] %v433_v7  ;;  %v437_v9 = vld [vmem:[%s3114_s25 + $0x48] sm:$0xff]  ;;  %v439_v10 = vld [vmem:[%s3114_s25 + $0x50] sm:$0xff] }
  0x16   : > { %436 = vst [vmem:[%s3119_s26 + $0x40] sm:$0xff] %v435_v8  ;;  %v441_v11 = vld [vmem:[%s3114_s25 + $0x58] sm:$0xff]  ;;  %438 = vst [vmem:[%s3119_s26 + $0x48] sm:$0xff] %v437_v9  ;;  %v443_v12 = vld [vmem:[%s3114_s25 + $0x60] sm:$0xff] }
  0x17   : > { %440 = vst [vmem:[%s3119_s26 + $0x50] sm:$0xff] %v439_v10  ;;  %442 = vst [vmem:[%s3119_s26 + $0x58] sm:$0xff] %v441_v11  ;;  %v445_v13 = vld [vmem:[%s3114_s25 + $0x68] sm:$0xff]  ;;  %v447_v14 = vld [vmem:[%s3114_s25 + $0x70] sm:$0xff] }
  0x18   : > { %444 = vst [vmem:[%s3119_s26 + $0x60] sm:$0xff] %v443_v12  ;;  %446 = vst [vmem:[%s3119_s26 + $0x68] sm:$0xff] %v445_v13  ;;  %v449_v15 = vld [vmem:[%s3114_s25 + $0x78] sm:$0xff]  ;;  %v451_v16 = vld [vmem:[%s3114_s25 + $0x80] sm:$0xff] }
  0x19   : > { %448 = vst [vmem:[%s3119_s26 + $0x70] sm:$0xff] %v447_v14  ;;  %v453_v17 = vld [vmem:[%s3114_s25 + $0x88] sm:$0xff]  ;;  %450 = vst [vmem:[%s3119_s26 + $0x78] sm:$0xff] %v449_v15  ;;  %v455_v18 = vld [vmem:[%s3114_s25 + $0x90] sm:$0xff] }
  0x1a   : > { %452 = vst [vmem:[%s3119_s26 + $0x80] sm:$0xff] %v451_v16  ;;  %454 = vst [vmem:[%s3119_s26 + $0x88] sm:$0xff] %v453_v17  ;;  %v457_v19 = vld [vmem:[%s3114_s25 + $0x98] sm:$0xff]  ;;  %v459_v20 = vld [vmem:[%s3114_s25 + $0xa0] sm:$0xff] }
  0x1b   : > { %456 = vst [vmem:[%s3119_s26 + $0x90] sm:$0xff] %v455_v18  ;;  %458 = vst [vmem:[%s3119_s26 + $0x98] sm:$0xff] %v457_v19  ;;  %v461_v21 = vld [vmem:[%s3114_s25 + $0xa8] sm:$0xff]  ;;  %v463_v22 = vld [vmem:[%s3114_s25 + $0xb0] sm:$0xff] }
  0x1c   : > { %460 = vst [vmem:[%s3119_s26 + $0xa0] sm:$0xff] %v459_v20  ;;  %v465_v23 = vld [vmem:[%s3114_s25 + $0xb8] sm:$0xff]  ;;  %462 = vst [vmem:[%s3119_s26 + $0xa8] sm:$0xff] %v461_v21  ;;  %v467_v24 = vld [vmem:[%s3114_s25 + $0xc0] sm:$0xff] }
  0x1d   : > { %464 = vst [vmem:[%s3119_s26 + $0xb0] sm:$0xff] %v463_v22  ;;  %466 = vst [vmem:[%s3119_s26 + $0xb8] sm:$0xff] %v465_v23  ;;  %v469_v25 = vld [vmem:[%s3114_s25 + $0xc8] sm:$0xff]  ;;  %v471_v26 = vld [vmem:[%s3114_s25 + $0xd0] sm:$0xff] }
  0x1e   : > { %468 = vst [vmem:[%s3119_s26 + $0xc0] sm:$0xff] %v467_v24  ;;  %470 = vst [vmem:[%s3119_s26 + $0xc8] sm:$0xff] %v469_v25  ;;  %v473_v27 = vld [vmem:[%s3114_s25 + $0xd8] sm:$0xff]  ;;  %v475_v28 = vld [vmem:[%s3114_s25 + $0xe0] sm:$0xff] }
  0x1f   : > { %472 = vst [vmem:[%s3119_s26 + $0xd0] sm:$0xff] %v471_v26  ;;  %v477_v29 = vld [vmem:[%s3114_s25 + $0xe8] sm:$0xff]  ;;  %474 = vst [vmem:[%s3119_s26 + $0xd8] sm:$0xff] %v473_v27  ;;  %v479_v30 = vld [vmem:[%s3114_s25 + $0xf0] sm:$0xff] }
  0x20   : > { %476 = vst [vmem:[%s3119_s26 + $0xe0] sm:$0xff] %v475_v28  ;;  %478 = vst [vmem:[%s3119_s26 + $0xe8] sm:$0xff] %v477_v29  ;;  %v481_v31 = vld [vmem:[%s3114_s25 + $0xf8] sm:$0xff]  ;;  %v483_v32 = vld [vmem:[%s3114_s25 + $0x200] sm:$0xff] }
  0x21   : > { %480 = vst [vmem:[%s3119_s26 + $0xf0] sm:$0xff] %v479_v30  ;;  %482 = vst [vmem:[%s3119_s26 + $0xf8] sm:$0xff] %v481_v31  ;;  %v485_v33 = vld [vmem:[%s3114_s25 + $0x208] sm:$0xff]  ;;  %v487_v34 = vld [vmem:[%s3114_s25 + $0x210] sm:$0xff] }
  0x22   : > { %484 = vst [vmem:[%s3119_s26 + $0x100] sm:$0xff] %v483_v32  ;;  %v489_v35 = vld [vmem:[%s3114_s25 + $0x218] sm:$0xff]  ;;  %486 = vst [vmem:[%s3119_s26 + $0x108] sm:$0xff] %v485_v33  ;;  %v491_v36 = vld [vmem:[%s3114_s25 + $0x220] sm:$0xff] }
  0x23   : > { %488 = vst [vmem:[%s3119_s26 + $0x110] sm:$0xff] %v487_v34  ;;  %490 = vst [vmem:[%s3119_s26 + $0x118] sm:$0xff] %v489_v35  ;;  %v493_v37 = vld [vmem:[%s3114_s25 + $0x228] sm:$0xff]  ;;  %v495_v38 = vld [vmem:[%s3114_s25 + $0x230] sm:$0xff] }
  0x24   : > { %492 = vst [vmem:[%s3119_s26 + $0x120] sm:$0xff] %v491_v36  ;;  %494 = vst [vmem:[%s3119_s26 + $0x128] sm:$0xff] %v493_v37  ;;  %v497_v39 = vld [vmem:[%s3114_s25 + $0x238] sm:$0xff]  ;;  %v499_v40 = vld [vmem:[%s3114_s25 + $0x240] sm:$0xff] }
  0x25   : > { %496 = vst [vmem:[%s3119_s26 + $0x130] sm:$0xff] %v495_v38  ;;  %v501_v41 = vld [vmem:[%s3114_s25 + $0x248] sm:$0xff]  ;;  %498 = vst [vmem:[%s3119_s26 + $0x138] sm:$0xff] %v497_v39  ;;  %v503_v42 = vld [vmem:[%s3114_s25 + $0x250] sm:$0xff] }
  0x26   : > { %500 = vst [vmem:[%s3119_s26 + $0x140] sm:$0xff] %v499_v40  ;;  %502 = vst [vmem:[%s3119_s26 + $0x148] sm:$0xff] %v501_v41  ;;  %v505_v43 = vld [vmem:[%s3114_s25 + $0x258] sm:$0xff]  ;;  %v507_v44 = vld [vmem:[%s3114_s25 + $0x260] sm:$0xff] }
  0x27   : > { %504 = vst [vmem:[%s3119_s26 + $0x150] sm:$0xff] %v503_v42  ;;  %506 = vst [vmem:[%s3119_s26 + $0x158] sm:$0xff] %v505_v43  ;;  %v509_v45 = vld [vmem:[%s3114_s25 + $0x268] sm:$0xff]  ;;  %v511_v46 = vld [vmem:[%s3114_s25 + $0x270] sm:$0xff] }
  0x28   : > { %508 = vst [vmem:[%s3119_s26 + $0x160] sm:$0xff] %v507_v44  ;;  %v513_v47 = vld [vmem:[%s3114_s25 + $0x278] sm:$0xff]  ;;  %510 = vst [vmem:[%s3119_s26 + $0x168] sm:$0xff] %v509_v45  ;;  %v515_v48 = vld [vmem:[%s3114_s25 + $0x280] sm:$0xff] }
  0x29   : > { %512 = vst [vmem:[%s3119_s26 + $0x170] sm:$0xff] %v511_v46  ;;  %514 = vst [vmem:[%s3119_s26 + $0x178] sm:$0xff] %v513_v47  ;;  %v517_v49 = vld [vmem:[%s3114_s25 + $0x288] sm:$0xff]  ;;  %v519_v50 = vld [vmem:[%s3114_s25 + $0x290] sm:$0xff] }
  0x2a   : > { %516 = vst [vmem:[%s3119_s26 + $0x180] sm:$0xff] %v515_v48  ;;  %518 = vst [vmem:[%s3119_s26 + $0x188] sm:$0xff] %v517_v49  ;;  %v521_v51 = vld [vmem:[%s3114_s25 + $0x298] sm:$0xff]  ;;  %v523_v52 = vld [vmem:[%s3114_s25 + $0x2a0] sm:$0xff] }
  0x2b   : > { %520 = vst [vmem:[%s3119_s26 + $0x190] sm:$0xff] %v519_v50  ;;  %v525_v53 = vld [vmem:[%s3114_s25 + $0x2a8] sm:$0xff]  ;;  %522 = vst [vmem:[%s3119_s26 + $0x198] sm:$0xff] %v521_v51  ;;  %v527_v54 = vld [vmem:[%s3114_s25 + $0x2b0] sm:$0xff] }
  0x2c   : > { %524 = vst [vmem:[%s3119_s26 + $0x1a0] sm:$0xff] %v523_v52  ;;  %526 = vst [vmem:[%s3119_s26 + $0x1a8] sm:$0xff] %v525_v53  ;;  %v529_v55 = vld [vmem:[%s3114_s25 + $0x2b8] sm:$0xff]  ;;  %v531_v56 = vld [vmem:[%s3114_s25 + $0x2c0] sm:$0xff] }
  0x2d   : > { %528 = vst [vmem:[%s3119_s26 + $0x1b0] sm:$0xff] %v527_v54  ;;  %530 = vst [vmem:[%s3119_s26 + $0x1b8] sm:$0xff] %v529_v55  ;;  %v533_v57 = vld [vmem:[%s3114_s25 + $0x2c8] sm:$0xff]  ;;  %v535_v58 = vld [vmem:[%s3114_s25 + $0x2d0] sm:$0xff] }
  0x2e   : > { %532 = vst [vmem:[%s3119_s26 + $0x1c0] sm:$0xff] %v531_v56  ;;  %v537_v59 = vld [vmem:[%s3114_s25 + $0x2d8] sm:$0xff]  ;;  %534 = vst [vmem:[%s3119_s26 + $0x1c8] sm:$0xff] %v533_v57  ;;  %v539_v60 = vld [vmem:[%s3114_s25 + $0x2e0] sm:$0xff] }
  0x2f   : > { %536 = vst [vmem:[%s3119_s26 + $0x1d0] sm:$0xff] %v535_v58  ;;  %538 = vst [vmem:[%s3119_s26 + $0x1d8] sm:$0xff] %v537_v59  ;;  %v541_v61 = vld [vmem:[%s3114_s25 + $0x2e8] sm:$0xff]  ;;  %v543_v62 = vld [vmem:[%s3114_s25 + $0x2f0] sm:$0xff] }
  0x30   : > { %540 = vst [vmem:[%s3119_s26 + $0x1e0] sm:$0xff] %v539_v60  ;;  %542 = vst [vmem:[%s3119_s26 + $0x1e8] sm:$0xff] %v541_v61  ;;  %v545_v63 = vld [vmem:[%s3114_s25 + $0x2f8] sm:$0xff]  ;;  %v547_v0 = vld [vmem:[%s3114_s25 + $0x400] sm:$0xff] }
  0x31   : > { %544 = vst [vmem:[%s3119_s26 + $0x1f0] sm:$0xff] %v543_v62  ;;  %v549_v1 = vld [vmem:[%s3114_s25 + $0x408] sm:$0xff]  ;;  %546 = vst [vmem:[%s3119_s26 + $0x1f8] sm:$0xff] %v545_v63  ;;  %v551_v2 = vld [vmem:[%s3114_s25 + $0x410] sm:$0xff] }
  0x32   : > { %548 = vst [vmem:[%s3119_s26 + $0x200] sm:$0xff] %v547_v0  ;;  %550 = vst [vmem:[%s3119_s26 + $0x208] sm:$0xff] %v549_v1  ;;  %v553_v3 = vld [vmem:[%s3114_s25 + $0x418] sm:$0xff]  ;;  %v555_v4 = vld [vmem:[%s3114_s25 + $0x420] sm:$0xff] }
  0x33   : > { %552 = vst [vmem:[%s3119_s26 + $0x210] sm:$0xff] %v551_v2  ;;  %554 = vst [vmem:[%s3119_s26 + $0x218] sm:$0xff] %v553_v3  ;;  %v557_v5 = vld [vmem:[%s3114_s25 + $0x428] sm:$0xff]  ;;  %v559_v6 = vld [vmem:[%s3114_s25 + $0x430] sm:$0xff] }
  0x34   : > { %556 = vst [vmem:[%s3119_s26 + $0x220] sm:$0xff] %v555_v4  ;;  %v561_v7 = vld [vmem:[%s3114_s25 + $0x438] sm:$0xff]  ;;  %558 = vst [vmem:[%s3119_s26 + $0x228] sm:$0xff] %v557_v5  ;;  %v563_v8 = vld [vmem:[%s3114_s25 + $0x440] sm:$0xff] }
  0x35   : > { %560 = vst [vmem:[%s3119_s26 + $0x230] sm:$0xff] %v559_v6  ;;  %562 = vst [vmem:[%s3119_s26 + $0x238] sm:$0xff] %v561_v7  ;;  %v565_v9 = vld [vmem:[%s3114_s25 + $0x448] sm:$0xff]  ;;  %v567_v10 = vld [vmem:[%s3114_s25 + $0x450] sm:$0xff] }
  0x36   : > { %564 = vst [vmem:[%s3119_s26 + $0x240] sm:$0xff] %v563_v8  ;;  %566 = vst [vmem:[%s3119_s26 + $0x248] sm:$0xff] %v565_v9  ;;  %v569_v11 = vld [vmem:[%s3114_s25 + $0x458] sm:$0xff]  ;;  %v571_v12 = vld [vmem:[%s3114_s25 + $0x460] sm:$0xff] }
  0x37   : > { %568 = vst [vmem:[%s3119_s26 + $0x250] sm:$0xff] %v567_v10  ;;  %v573_v13 = vld [vmem:[%s3114_s25 + $0x468] sm:$0xff]  ;;  %570 = vst [vmem:[%s3119_s26 + $0x258] sm:$0xff] %v569_v11  ;;  %v575_v14 = vld [vmem:[%s3114_s25 + $0x470] sm:$0xff] }
  0x38   : > { %572 = vst [vmem:[%s3119_s26 + $0x260] sm:$0xff] %v571_v12  ;;  %574 = vst [vmem:[%s3119_s26 + $0x268] sm:$0xff] %v573_v13  ;;  %v577_v15 = vld [vmem:[%s3114_s25 + $0x478] sm:$0xff]  ;;  %v579_v16 = vld [vmem:[%s3114_s25 + $0x480] sm:$0xff] }
  0x39   : > { %576 = vst [vmem:[%s3119_s26 + $0x270] sm:$0xff] %v575_v14  ;;  %578 = vst [vmem:[%s3119_s26 + $0x278] sm:$0xff] %v577_v15  ;;  %v581_v17 = vld [vmem:[%s3114_s25 + $0x488] sm:$0xff]  ;;  %v583_v18 = vld [vmem:[%s3114_s25 + $0x490] sm:$0xff] }
  0x3a   : > { %580 = vst [vmem:[%s3119_s26 + $0x280] sm:$0xff] %v579_v16  ;;  %v585_v19 = vld [vmem:[%s3114_s25 + $0x498] sm:$0xff]  ;;  %582 = vst [vmem:[%s3119_s26 + $0x288] sm:$0xff] %v581_v17  ;;  %v587_v20 = vld [vmem:[%s3114_s25 + $0x4a0] sm:$0xff] }
  0x3b   : > { %584 = vst [vmem:[%s3119_s26 + $0x290] sm:$0xff] %v583_v18  ;;  %586 = vst [vmem:[%s3119_s26 + $0x298] sm:$0xff] %v585_v19  ;;  %v589_v21 = vld [vmem:[%s3114_s25 + $0x4a8] sm:$0xff]  ;;  %v591_v22 = vld [vmem:[%s3114_s25 + $0x4b0] sm:$0xff] }
  0x3c   : > { %588 = vst [vmem:[%s3119_s26 + $0x2a0] sm:$0xff] %v587_v20  ;;  %590 = vst [vmem:[%s3119_s26 + $0x2a8] sm:$0xff] %v589_v21  ;;  %v593_v23 = vld [vmem:[%s3114_s25 + $0x4b8] sm:$0xff]  ;;  %v595_v24 = vld [vmem:[%s3114_s25 + $0x4c0] sm:$0xff] }
  0x3d   : > { %592 = vst [vmem:[%s3119_s26 + $0x2b0] sm:$0xff] %v591_v22  ;;  %v597_v25 = vld [vmem:[%s3114_s25 + $0x4c8] sm:$0xff]  ;;  %594 = vst [vmem:[%s3119_s26 + $0x2b8] sm:$0xff] %v593_v23  ;;  %v599_v26 = vld [vmem:[%s3114_s25 + $0x4d0] sm:$0xff] }
  0x3e   : > { %596 = vst [vmem:[%s3119_s26 + $0x2c0] sm:$0xff] %v595_v24  ;;  %598 = vst [vmem:[%s3119_s26 + $0x2c8] sm:$0xff] %v597_v25  ;;  %v601_v27 = vld [vmem:[%s3114_s25 + $0x4d8] sm:$0xff]  ;;  %v603_v28 = vld [vmem:[%s3114_s25 + $0x4e0] sm:$0xff] }
  0x3f   : > { %600 = vst [vmem:[%s3119_s26 + $0x2d0] sm:$0xff] %v599_v26  ;;  %602 = vst [vmem:[%s3119_s26 + $0x2d8] sm:$0xff] %v601_v27  ;;  %v605_v29 = vld [vmem:[%s3114_s25 + $0x4e8] sm:$0xff]  ;;  %v607_v30 = vld [vmem:[%s3114_s25 + $0x4f0] sm:$0xff] }
  0x40   : > { %604 = vst [vmem:[%s3119_s26 + $0x2e0] sm:$0xff] %v603_v28  ;;  %v609_v31 = vld [vmem:[%s3114_s25 + $0x4f8] sm:$0xff]  ;;  %606 = vst [vmem:[%s3119_s26 + $0x2e8] sm:$0xff] %v605_v29  ;;  %v611_v32 = vld [vmem:[%s3114_s25 + $0x600] sm:$0xff] }
  0x41   : > { %608 = vst [vmem:[%s3119_s26 + $0x2f0] sm:$0xff] %v607_v30  ;;  %610 = vst [vmem:[%s3119_s26 + $0x2f8] sm:$0xff] %v609_v31  ;;  %v613_v33 = vld [vmem:[%s3114_s25 + $0x608] sm:$0xff]  ;;  %v615_v34 = vld [vmem:[%s3114_s25 + $0x610] sm:$0xff] }
  0x42   : > { %612 = vst [vmem:[%s3119_s26 + $0x300] sm:$0xff] %v611_v32  ;;  %614 = vst [vmem:[%s3119_s26 + $0x308] sm:$0xff] %v613_v33  ;;  %v617_v35 = vld [vmem:[%s3114_s25 + $0x618] sm:$0xff]  ;;  %v619_v36 = vld [vmem:[%s3114_s25 + $0x620] sm:$0xff] }
  0x43   : > { %616 = vst [vmem:[%s3119_s26 + $0x310] sm:$0xff] %v615_v34  ;;  %v621_v37 = vld [vmem:[%s3114_s25 + $0x628] sm:$0xff]  ;;  %618 = vst [vmem:[%s3119_s26 + $0x318] sm:$0xff] %v617_v35  ;;  %v623_v38 = vld [vmem:[%s3114_s25 + $0x630] sm:$0xff] }
  0x44   : > { %620 = vst [vmem:[%s3119_s26 + $0x320] sm:$0xff] %v619_v36  ;;  %622 = vst [vmem:[%s3119_s26 + $0x328] sm:$0xff] %v621_v37  ;;  %v625_v39 = vld [vmem:[%s3114_s25 + $0x638] sm:$0xff]  ;;  %v627_v40 = vld [vmem:[%s3114_s25 + $0x640] sm:$0xff] }
  0x45   : > { %624 = vst [vmem:[%s3119_s26 + $0x330] sm:$0xff] %v623_v38  ;;  %626 = vst [vmem:[%s3119_s26 + $0x338] sm:$0xff] %v625_v39  ;;  %v629_v41 = vld [vmem:[%s3114_s25 + $0x648] sm:$0xff]  ;;  %v631_v42 = vld [vmem:[%s3114_s25 + $0x650] sm:$0xff] }
  0x46   : > { %628 = vst [vmem:[%s3119_s26 + $0x340] sm:$0xff] %v627_v40  ;;  %v633_v43 = vld [vmem:[%s3114_s25 + $0x658] sm:$0xff]  ;;  %630 = vst [vmem:[%s3119_s26 + $0x348] sm:$0xff] %v629_v41  ;;  %v635_v44 = vld [vmem:[%s3114_s25 + $0x660] sm:$0xff] }
  0x47   : > { %632 = vst [vmem:[%s3119_s26 + $0x350] sm:$0xff] %v631_v42  ;;  %634 = vst [vmem:[%s3119_s26 + $0x358] sm:$0xff] %v633_v43  ;;  %v637_v45 = vld [vmem:[%s3114_s25 + $0x668] sm:$0xff]  ;;  %v639_v46 = vld [vmem:[%s3114_s25 + $0x670] sm:$0xff] }
  0x48   : > { %636 = vst [vmem:[%s3119_s26 + $0x360] sm:$0xff] %v635_v44  ;;  %638 = vst [vmem:[%s3119_s26 + $0x368] sm:$0xff] %v637_v45  ;;  %v641_v47 = vld [vmem:[%s3114_s25 + $0x678] sm:$0xff]  ;;  %v643_v48 = vld [vmem:[%s3114_s25 + $0x680] sm:$0xff] }
  0x49   : > { %640 = vst [vmem:[%s3119_s26 + $0x370] sm:$0xff] %v639_v46  ;;  %v645_v49 = vld [vmem:[%s3114_s25 + $0x688] sm:$0xff]  ;;  %642 = vst [vmem:[%s3119_s26 + $0x378] sm:$0xff] %v641_v47  ;;  %v647_v50 = vld [vmem:[%s3114_s25 + $0x690] sm:$0xff] }
  0x4a   : > { %644 = vst [vmem:[%s3119_s26 + $0x380] sm:$0xff] %v643_v48  ;;  %646 = vst [vmem:[%s3119_s26 + $0x388] sm:$0xff] %v645_v49  ;;  %v649_v51 = vld [vmem:[%s3114_s25 + $0x698] sm:$0xff]  ;;  %v651_v52 = vld [vmem:[%s3114_s25 + $0x6a0] sm:$0xff] }
  0x4b   : > { %648 = vst [vmem:[%s3119_s26 + $0x390] sm:$0xff] %v647_v50  ;;  %650 = vst [vmem:[%s3119_s26 + $0x398] sm:$0xff] %v649_v51  ;;  %v653_v53 = vld [vmem:[%s3114_s25 + $0x6a8] sm:$0xff]  ;;  %v655_v54 = vld [vmem:[%s3114_s25 + $0x6b0] sm:$0xff] }
  0x4c   : > { %652 = vst [vmem:[%s3119_s26 + $0x3a0] sm:$0xff] %v651_v52  ;;  %v657_v55 = vld [vmem:[%s3114_s25 + $0x6b8] sm:$0xff]  ;;  %654 = vst [vmem:[%s3119_s26 + $0x3a8] sm:$0xff] %v653_v53  ;;  %v659_v56 = vld [vmem:[%s3114_s25 + $0x6c0] sm:$0xff] }
  0x4d   : > { %656 = vst [vmem:[%s3119_s26 + $0x3b0] sm:$0xff] %v655_v54  ;;  %658 = vst [vmem:[%s3119_s26 + $0x3b8] sm:$0xff] %v657_v55  ;;  %v661_v57 = vld [vmem:[%s3114_s25 + $0x6c8] sm:$0xff]  ;;  %v663_v58 = vld [vmem:[%s3114_s25 + $0x6d0] sm:$0xff] }
  0x4e   : > { %660 = vst [vmem:[%s3119_s26 + $0x3c0] sm:$0xff] %v659_v56  ;;  %662 = vst [vmem:[%s3119_s26 + $0x3c8] sm:$0xff] %v661_v57  ;;  %v665_v59 = vld [vmem:[%s3114_s25 + $0x6d8] sm:$0xff]  ;;  %v667_v60 = vld [vmem:[%s3114_s25 + $0x6e0] sm:$0xff] }
  0x4f   : > { %664 = vst [vmem:[%s3119_s26 + $0x3d0] sm:$0xff] %v663_v58  ;;  %v669_v61 = vld [vmem:[%s3114_s25 + $0x6e8] sm:$0xff]  ;;  %666 = vst [vmem:[%s3119_s26 + $0x3d8] sm:$0xff] %v665_v59  ;;  %v671_v62 = vld [vmem:[%s3114_s25 + $0x6f0] sm:$0xff] }
  0x50   : > { %668 = vst [vmem:[%s3119_s26 + $0x3e0] sm:$0xff] %v667_v60  ;;  %670 = vst [vmem:[%s3119_s26 + $0x3e8] sm:$0xff] %v669_v61  ;;  %v673_v63 = vld [vmem:[%s3114_s25 + $0x6f8] sm:$0xff] }
  0x51   : > { %672 = vst [vmem:[%s3119_s26 + $0x3f0] sm:$0xff] %v671_v62  ;;  %674 = vst [vmem:[%s3119_s26 + $0x3f8] sm:$0xff] %v673_v63 }
  0x52 PF: > { %p2406_p5 = scmp.ge.s32.totalorder %s3057_s14, 1  ;;  %p679_p6 = scmp.lt.s32.totalorder %s3057_s14, 3 }
  0x54   : > { %p680_p7 = pnand %p2406_p5, %p679_p6 }
  0x56   : > { %683 = sbr.rel (%p680_p7) target bundleno = 446 (0x1be), region = 66 }
  0x5d   : > { %v716_v0 = vld [vmem:[%s4036_s1] sm:$0xff]  ;;  %v717_v1 = vld [vmem:[%s4036_s1 + $0x8] sm:$0x1]  ;;  %vm847_vm0 = vcmask 1040384   ;;  %s686_s4 = sand.u32 1, %s3049_s12   ;;  %vm3059_vm1 = vmmov 1  }
  0x5e   : > { %v2986_v2 = vpack.c.bf16 %v717_v1, %v716_v0  ;;  %vm3383_vm2 = vmpackc.low %vm847_vm0, %vm3059_vm1  ;;  %s2407_s5 = sshll.u32 %s686_s4, 10  ;;  %vm750_vm3 = vcmask 72704   ;;  %s2408_s7 = sshll.u32 %s2399_s15, 5 }
  0x5f   : > { %s3391_s6 = scalar_lea.vmem [#allocation2], %s2407_s5  ;;  %p711_p8 = scmp.lt.s32.totalorder %s2408_s7, 63 }
  0x60   : > { %2988 = vmatprep.subr.msk.bf16.mxu0 %vm3383_vm2, %v2986_v2  ;;  %2994 = vmatprep.subr.msk.bf16.mxu1 %vm3383_vm2, %v2986_v2  ;;  %v718_v4 = vld [vmem:[%s3391_s6] sm:$0xff]  ;;  %v719_v6 = vld [vmem:[%s3391_s6 + $0x8] sm:$0xff]  ;;  %v720_v8 = vld [vmem:[%s3391_s6 + $0x10] sm:$0xff] }
  0x61   : > { %v2443_v5 = vld [vmem:[%s3391_s6 + $0x100] sm:$0xff]  ;;  %2991 = vmatpush3.bf16.msk.msra.mxu0 %vm3383_vm2, %v2986_v2  ;;  %2997 = vmatpush3.bf16.msk.msra.mxu1 %vm3383_vm2, %v2986_v2  ;;  %v2444_v7 = vld [vmem:[%s3391_s6 + $0x108] sm:$0xff]  ;;  %v2445_v9 = vld [vmem:[%s3391_s6 + $0x110] sm:$0xff]  ;;  %s4119_s7 = smov (!%p711_p8, %s2408_s7), 63 }
  0x62   : > { %2782 = vmatprep.mubr.msk.f32.mxu0 %vm750_vm3, %v718_v4  ;;  %2834 = vmatprep.mubr.msk.f32.mxu1 %vm750_vm3, %v2443_v5  ;;  %v721_v10 = vld [vmem:[%s3391_s6 + $0x18] sm:$0xff]  ;;  %v722_v12 = vld [vmem:[%s3391_s6 + $0x20] sm:$0xff]  ;;  %v723_v14 = vld [vmem:[%s3391_s6 + $0x28] sm:$0xff]  ;;  %s2409_s10 = sshll.u32 %s4119_s7, 3 }
  0x63   : > { %3000 = vmatprep.subr.msk.bf16.mxu0 %vm3383_vm2, %v2986_v2  ;;  %3006 = vmatprep.subr.msk.bf16.mxu1 %vm3383_vm2, %v2986_v2  ;;  %v2446_v11 = vld [vmem:[%s3391_s6 + $0x118] sm:$0xff]  ;;  %v2447_v13 = vld [vmem:[%s3391_s6 + $0x120] sm:$0xff]  ;;  %v2448_v15 = vld [vmem:[%s3391_s6 + $0x128] sm:$0xff]  ;;  %s3873_s14 = scalar_lea.vmem %s4038_s3, %s2409_s10 }
  0x64   : > { %2783 = vmatmul.mubr.msk.f32.vlgmr.msra.gmra.mrb[0].mxu0 %vm750_vm3, %v719_v6  ;;  %2835 = vmatmul.mubr.msk.f32.vlgmr.msra.gmra.mrb[0].mxu1 %vm750_vm3, %v2444_v7  ;;  %v724_v16 = vld [vmem:[%s3391_s6 + $0x30] sm:$0xff]  ;;  %v725_v18 = vld [vmem:[%s3391_s6 + $0x38] sm:$0xff]  ;;  %v726_v20 = vld [vmem:[%s3391_s6 + $0x40] sm:$0xff] }
  0x65   : > { %3003 = vmatpush3.bf16.msk.msra.mxu0 %vm3383_vm2, %v2986_v2  ;;  %2785 = vmatprep.mubr.msk.f32.mxu0 %vm750_vm3, %v720_v8  ;;  %v2449_v17 = vld [vmem:[%s3391_s6 + $0x130] sm:$0xff]  ;;  %v2450_v19 = vld [vmem:[%s3391_s6 + $0x138] sm:$0xff]  ;;  %v2451_v21 = vld [vmem:[%s3391_s6 + $0x140] sm:$0xff] }
  0x66   : > { %2837 = vmatprep.mubr.msk.f32.mxu1 %vm750_vm3, %v2445_v9  ;;  %3009 = vmatpush3.bf16.msk.msra.mxu1 %vm3383_vm2, %v2986_v2  ;;  %v727_v22 = vld [vmem:[%s3391_s6 + $0x48] sm:$0xff]  ;;  %v728_v24 = vld [vmem:[%s3391_s6 + $0x50] sm:$0xff]  ;;  %v729_v26 = vld [vmem:[%s3391_s6 + $0x58] sm:$0xff] }
  0x67   : > { %v2452_v23 = vld [vmem:[%s3391_s6 + $0x148] sm:$0xff]  ;;  %v2453_v25 = vld [vmem:[%s3391_s6 + $0x150] sm:$0xff]  ;;  %v2454_v27 = vld [vmem:[%s3391_s6 + $0x158] sm:$0xff] }
  0x68   : > { %2786 = vmatmul.mubr.msk.f32.gmra.mrb[2].mxu0 %vm750_vm3, %v721_v10  ;;  %2838 = vmatmul.mubr.msk.f32.gmra.mrb[2].mxu1 %vm750_vm3, %v2446_v11  ;;  %v730_v28 = vld [vmem:[%s3391_s6 + $0x60] sm:$0xff]  ;;  %v731_v30 = vld [vmem:[%s3391_s6 + $0x68] sm:$0xff]  ;;  %v732_v32 = vld [vmem:[%s3391_s6 + $0x70] sm:$0xff] }
  0x69   : > { %2788 = vmatprep.mubr.msk.f32.mxu0 %vm750_vm3, %v722_v12  ;;  %2840 = vmatprep.mubr.msk.f32.mxu1 %vm750_vm3, %v2447_v13  ;;  %v2455_v29 = vld [vmem:[%s3391_s6 + $0x160] sm:$0xff]  ;;  %v2456_v31 = vld [vmem:[%s3391_s6 + $0x168] sm:$0xff]  ;;  %v2457_v33 = vld [vmem:[%s3391_s6 + $0x170] sm:$0xff] }
  0x6a   : > { %v733_v34 = vld [vmem:[%s3391_s6 + $0x78] sm:$0xff]  ;;  %v734_v36 = vld [vmem:[%s3391_s6 + $0x80] sm:$0xff]  ;;  %v735_v38 = vld [vmem:[%s3391_s6 + $0x88] sm:$0xff] }
  0x6b   : > { %v2458_v35 = vld [vmem:[%s3391_s6 + $0x178] sm:$0xff]  ;;  %v2459_v37 = vld [vmem:[%s3391_s6 + $0x180] sm:$0xff]  ;;  %v2460_v39 = vld [vmem:[%s3391_s6 + $0x188] sm:$0xff] }
  0x6c   : > { %2789 = vmatmul.mubr.msk.f32.gmra.mrb[4].mxu0 %vm750_vm3, %v723_v14  ;;  %2841 = vmatmul.mubr.msk.f32.gmra.mrb[4].mxu1 %vm750_vm3, %v2448_v15  ;;  %v736_v40 = vld [vmem:[%s3391_s6 + $0x90] sm:$0xff]  ;;  %v737_v42 = vld [vmem:[%s3391_s6 + $0x98] sm:$0xff]  ;;  %v738_v44 = vld [vmem:[%s3391_s6 + $0xa0] sm:$0xff] }
  0x6d   : > { %2791 = vmatprep.mubr.msk.f32.mxu0 %vm750_vm3, %v724_v16  ;;  %2843 = vmatprep.mubr.msk.f32.mxu1 %vm750_vm3, %v2449_v17  ;;  %v2461_v41 = vld [vmem:[%s3391_s6 + $0x190] sm:$0xff]  ;;  %v2462_v43 = vld [vmem:[%s3391_s6 + $0x198] sm:$0xff]  ;;  %v2463_v45 = vld [vmem:[%s3391_s6 + $0x1a0] sm:$0xff] }
  0x6e   : > { %v739_v46 = vld [vmem:[%s3391_s6 + $0xa8] sm:$0xff]  ;;  %v740_v48 = vld [vmem:[%s3391_s6 + $0xb0] sm:$0xff]  ;;  %v741_v50 = vld [vmem:[%s3391_s6 + $0xb8] sm:$0xff] }
  0x6f   : > { %v2464_v47 = vld [vmem:[%s3391_s6 + $0x1a8] sm:$0xff]  ;;  %v2465_v49 = vld [vmem:[%s3391_s6 + $0x1b0] sm:$0xff]  ;;  %v2466_v51 = vld [vmem:[%s3391_s6 + $0x1b8] sm:$0xff] }
  0x70   : > { %2792 = vmatmul.mubr.msk.f32.gmra.mrb[6].mxu0 %vm750_vm3, %v725_v18  ;;  %2844 = vmatmul.mubr.msk.f32.gmra.mrb[6].mxu1 %vm750_vm3, %v2450_v19  ;;  %v742_v52 = vld [vmem:[%s3391_s6 + $0xc0] sm:$0xff]  ;;  %v743_v54 = vld [vmem:[%s3391_s6 + $0xc8] sm:$0xff]  ;;  %v744_v56 = vld [vmem:[%s3391_s6 + $0xd0] sm:$0xff] }
  0x71   : > { %2794 = vmatprep.mubr.msk.f32.mxu0 %vm750_vm3, %v726_v20  ;;  %2846 = vmatprep.mubr.msk.f32.mxu1 %vm750_vm3, %v2451_v21  ;;  %v2467_v53 = vld [vmem:[%s3391_s6 + $0x1c0] sm:$0xff]  ;;  %v2468_v55 = vld [vmem:[%s3391_s6 + $0x1c8] sm:$0xff]  ;;  %v2469_v57 = vld [vmem:[%s3391_s6 + $0x1d0] sm:$0xff] }
  0x72   : > { %v745_v58 = vld [vmem:[%s3391_s6 + $0xd8] sm:$0xff]  ;;  %v746_v60 = vld [vmem:[%s3391_s6 + $0xe0] sm:$0xff]  ;;  %v747_v62 = vld [vmem:[%s3391_s6 + $0xe8] sm:$0xff] }
  0x73   : > { %v2470_v59 = vld [vmem:[%s3391_s6 + $0x1d8] sm:$0xff]  ;;  %v2471_v61 = vld [vmem:[%s3391_s6 + $0x1e0] sm:$0xff]  ;;  %v2472_v63 = vld [vmem:[%s3391_s6 + $0x1e8] sm:$0xff] }
  0x74   : > { %2795 = vmatmul.mubr.msk.f32.gmra.mrb[8].mxu0 %vm750_vm3, %v727_v22  ;;  %2847 = vmatmul.mubr.msk.f32.gmra.mrb[8].mxu1 %vm750_vm3, %v2452_v23  ;;  %v748_v0 = vld [vmem:[%s3391_s6 + $0xf0] sm:$0xff]  ;;  %v749_v2 = vld [vmem:[%s3391_s6 + $0xf8] sm:$0xff]  ;;  %v2508_v4 = vld [vmem:[%s3391_s6 + $0x200] sm:$0xff] }
  0x75   : > { %2797 = vmatprep.mubr.msk.f32.mxu0 %vm750_vm3, %v728_v24  ;;  %2849 = vmatprep.mubr.msk.f32.mxu1 %vm750_vm3, %v2453_v25  ;;  %v2473_v1 = vld [vmem:[%s3391_s6 + $0x1f0] sm:$0xff]  ;;  %v2474_v3 = vld [vmem:[%s3391_s6 + $0x1f8] sm:$0xff]  ;;  %v2573_v5 = vld [vmem:[%s3391_s6 + $0x300] sm:$0xff] }
  0x76   : > { %v2509_v6 = vld [vmem:[%s3391_s6 + $0x208] sm:$0xff]  ;;  %v2510_v8 = vld [vmem:[%s3391_s6 + $0x210] sm:$0xff]  ;;  %v2511_v10 = vld [vmem:[%s3391_s6 + $0x218] sm:$0xff] }
  0x77   : > { %v2574_v7 = vld [vmem:[%s3391_s6 + $0x308] sm:$0xff]  ;;  %v2575_v9 = vld [vmem:[%s3391_s6 + $0x310] sm:$0xff]  ;;  %v2576_v11 = vld [vmem:[%s3391_s6 + $0x318] sm:$0xff] }
  0x78   : > { %2798 = vmatmul.mubr.msk.f32.gmra.mrb[10].mxu0 %vm750_vm3, %v729_v26  ;;  %2850 = vmatmul.mubr.msk.f32.gmra.mrb[10].mxu1 %vm750_vm3, %v2454_v27  ;;  %v2512_v12 = vld [vmem:[%s3391_s6 + $0x220] sm:$0xff]  ;;  %v2513_v14 = vld [vmem:[%s3391_s6 + $0x228] sm:$0xff]  ;;  %v2514_v16 = vld [vmem:[%s3391_s6 + $0x230] sm:$0xff] }
  0x79   : > { %2800 = vmatprep.mubr.msk.f32.mxu0 %vm750_vm3, %v730_v28  ;;  %2852 = vmatprep.mubr.msk.f32.mxu1 %vm750_vm3, %v2455_v29  ;;  %v2577_v13 = vld [vmem:[%s3391_s6 + $0x320] sm:$0xff]  ;;  %v2578_v15 = vld [vmem:[%s3391_s6 + $0x328] sm:$0xff]  ;;  %v2579_v17 = vld [vmem:[%s3391_s6 + $0x330] sm:$0xff] }
  0x7a   : > { %v2515_v18 = vld [vmem:[%s3391_s6 + $0x238] sm:$0xff]  ;;  %v2516_v20 = vld [vmem:[%s3391_s6 + $0x240] sm:$0xff]  ;;  %v2517_v22 = vld [vmem:[%s3391_s6 + $0x248] sm:$0xff] }
  0x7b   : > { %v2580_v19 = vld [vmem:[%s3391_s6 + $0x338] sm:$0xff]  ;;  %v2581_v21 = vld [vmem:[%s3391_s6 + $0x340] sm:$0xff]  ;;  %v2582_v23 = vld [vmem:[%s3391_s6 + $0x348] sm:$0xff] }
  0x7c   : > { %2801 = vmatmul.mubr.msk.f32.gmra.mrb[12].mxu0 %vm750_vm3, %v731_v30  ;;  %2853 = vmatmul.mubr.msk.f32.gmra.mrb[12].mxu1 %vm750_vm3, %v2456_v31  ;;  %v2518_v24 = vld [vmem:[%s3391_s6 + $0x250] sm:$0xff]  ;;  %v2519_v26 = vld [vmem:[%s3391_s6 + $0x258] sm:$0xff]  ;;  %v2520_v28 = vld [vmem:[%s3391_s6 + $0x260] sm:$0xff] }
  0x7d   : > { %2803 = vmatprep.mubr.msk.f32.mxu0 %vm750_vm3, %v732_v32  ;;  %2855 = vmatprep.mubr.msk.f32.mxu1 %vm750_vm3, %v2457_v33  ;;  %v2583_v25 = vld [vmem:[%s3391_s6 + $0x350] sm:$0xff]  ;;  %v2584_v27 = vld [vmem:[%s3391_s6 + $0x358] sm:$0xff]  ;;  %v2585_v29 = vld [vmem:[%s3391_s6 + $0x360] sm:$0xff] }
  0x7e   : > { %v2521_v30 = vld [vmem:[%s3391_s6 + $0x268] sm:$0xff]  ;;  %v2522_v32 = vld [vmem:[%s3391_s6 + $0x270] sm:$0xff] }
  0x7f   : > { %v2586_v31 = vld [vmem:[%s3391_s6 + $0x368] sm:$0xff]  ;;  %v2587_v33 = vld [vmem:[%s3391_s6 + $0x370] sm:$0xff] }
  0x80   : > { %2804 = vmatmul.mubr.msk.f32.gmra.mrb[14].mxu0 %vm750_vm3, %v733_v34  ;;  %2856 = vmatmul.mubr.msk.f32.gmra.mrb[14].mxu1 %vm750_vm3, %v2458_v35  ;;  %v2523_v34 = vld [vmem:[%s3391_s6 + $0x278] sm:$0xff] }
  0x81   : > { %2806 = vmatprep.mubr.msk.f32.mxu0 %vm750_vm3, %v734_v36  ;;  %2858 = vmatprep.mubr.msk.f32.mxu1 %vm750_vm3, %v2459_v37  ;;  %v2588_v35 = vld [vmem:[%s3391_s6 + $0x378] sm:$0xff]  ;;  %v2524_v36 = vld [vmem:[%s3391_s6 + $0x280] sm:$0xff] }
  0x82   : > { %v2589_v37 = vld [vmem:[%s3391_s6 + $0x380] sm:$0xff] }
  0x84   : > { %2807 = vmatmul.mubr.msk.f32.gmra.mrb[16].mxu0 %vm750_vm3, %v735_v38  ;;  %2859 = vmatmul.mubr.msk.f32.gmra.mrb[16].mxu1 %vm750_vm3, %v2460_v39  ;;  %v2525_v38 = vld [vmem:[%s3391_s6 + $0x288] sm:$0xff] }
  0x85   : > { %2809 = vmatprep.mubr.msk.f32.mxu0 %vm750_vm3, %v736_v40  ;;  %2861 = vmatprep.mubr.msk.f32.mxu1 %vm750_vm3, %v2461_v41  ;;  %v2590_v39 = vld [vmem:[%s3391_s6 + $0x388] sm:$0xff]  ;;  %v2526_v40 = vld [vmem:[%s3391_s6 + $0x290] sm:$0xff] }
  0x86   : > { %v2591_v41 = vld [vmem:[%s3391_s6 + $0x390] sm:$0xff] }
  0x88   : > { %2810 = vmatmul.mubr.msk.f32.gmra.mrb[18].mxu0 %vm750_vm3, %v737_v42  ;;  %2862 = vmatmul.mubr.msk.f32.gmra.mrb[18].mxu1 %vm750_vm3, %v2462_v43  ;;  %v2527_v42 = vld [vmem:[%s3391_s6 + $0x298] sm:$0xff] }
  0x89   : > { %2812 = vmatprep.mubr.msk.f32.mxu0 %vm750_vm3, %v738_v44  ;;  %2864 = vmatprep.mubr.msk.f32.mxu1 %vm750_vm3, %v2463_v45  ;;  %v2592_v43 = vld [vmem:[%s3391_s6 + $0x398] sm:$0xff]  ;;  %v2528_v44 = vld [vmem:[%s3391_s6 + $0x2a0] sm:$0xff] }
  0x8a   : > { %v2593_v45 = vld [vmem:[%s3391_s6 + $0x3a0] sm:$0xff] }
  0x8c   : > { %2813 = vmatmul.mubr.msk.f32.gmra.mrb[20].mxu0 %vm750_vm3, %v739_v46  ;;  %2865 = vmatmul.mubr.msk.f32.gmra.mrb[20].mxu1 %vm750_vm3, %v2464_v47  ;;  %v2529_v46 = vld [vmem:[%s3391_s6 + $0x2a8] sm:$0xff] }
  0x8d   : > { %2815 = vmatprep.mubr.msk.f32.mxu0 %vm750_vm3, %v740_v48  ;;  %2867 = vmatprep.mubr.msk.f32.mxu1 %vm750_vm3, %v2465_v49  ;;  %v2594_v47 = vld [vmem:[%s3391_s6 + $0x3a8] sm:$0xff]  ;;  %v2530_v48 = vld [vmem:[%s3391_s6 + $0x2b0] sm:$0xff] }
  0x8e   : > { %v2595_v49 = vld [vmem:[%s3391_s6 + $0x3b0] sm:$0xff] }
  0x90   : > { %2816 = vmatmul.mubr.msk.f32.gmra.mrb[22].mxu0 %vm750_vm3, %v741_v50  ;;  %2868 = vmatmul.mubr.msk.f32.gmra.mrb[22].mxu1 %vm750_vm3, %v2466_v51  ;;  %v2531_v50 = vld [vmem:[%s3391_s6 + $0x2b8] sm:$0xff] }
  0x91   : > { %2818 = vmatprep.mubr.msk.f32.mxu0 %vm750_vm3, %v742_v52  ;;  %2870 = vmatprep.mubr.msk.f32.mxu1 %vm750_vm3, %v2467_v53  ;;  %v2596_v51 = vld [vmem:[%s3391_s6 + $0x3b8] sm:$0xff]  ;;  %v2532_v52 = vld [vmem:[%s3391_s6 + $0x2c0] sm:$0xff] }
  0x92   : > { %v2597_v53 = vld [vmem:[%s3391_s6 + $0x3c0] sm:$0xff] }
  0x94   : > { %2819 = vmatmul.mubr.msk.f32.gmra.mrb[24].mxu0 %vm750_vm3, %v743_v54  ;;  %2871 = vmatmul.mubr.msk.f32.gmra.mrb[24].mxu1 %vm750_vm3, %v2468_v55  ;;  %v2533_v54 = vld [vmem:[%s3391_s6 + $0x2c8] sm:$0xff] }
  0x95   : > { %2821 = vmatprep.mubr.msk.f32.mxu0 %vm750_vm3, %v744_v56  ;;  %2873 = vmatprep.mubr.msk.f32.mxu1 %vm750_vm3, %v2469_v57  ;;  %v2598_v55 = vld [vmem:[%s3391_s6 + $0x3c8] sm:$0xff]  ;;  %v2534_v56 = vld [vmem:[%s3391_s6 + $0x2d0] sm:$0xff] }
  0x96   : > { %v2599_v57 = vld [vmem:[%s3391_s6 + $0x3d0] sm:$0xff] }
  0x98   : > { %2822 = vmatmul.mubr.msk.f32.gmra.mrb[26].mxu0 %vm750_vm3, %v745_v58  ;;  %2874 = vmatmul.mubr.msk.f32.gmra.mrb[26].mxu1 %vm750_vm3, %v2470_v59  ;;  %v2535_v58 = vld [vmem:[%s3391_s6 + $0x2d8] sm:$0xff] }
  0x99   : > { %2824 = vmatprep.mubr.msk.f32.mxu0 %vm750_vm3, %v746_v60  ;;  %2876 = vmatprep.mubr.msk.f32.mxu1 %vm750_vm3, %v2471_v61  ;;  %v2600_v59 = vld [vmem:[%s3391_s6 + $0x3d8] sm:$0xff]  ;;  %v2536_v60 = vld [vmem:[%s3391_s6 + $0x2e0] sm:$0xff] }
  0x9a   : > { %v2601_v61 = vld [vmem:[%s3391_s6 + $0x3e0] sm:$0xff] }
  0x9c   : > { %2825 = vmatmul.mubr.msk.f32.gmra.mrb[28].mxu0 %vm750_vm3, %v747_v62  ;;  %2877 = vmatmul.mubr.msk.f32.gmra.mrb[28].mxu1 %vm750_vm3, %v2472_v63  ;;  %v2537_v62 = vld [vmem:[%s3391_s6 + $0x2e8] sm:$0xff] }
  0x9d   : > { %2827 = vmatprep.mubr.msk.f32.mxu0 %vm750_vm3, %v748_v0  ;;  %2879 = vmatprep.mubr.msk.f32.mxu1 %vm750_vm3, %v2473_v1  ;;  %v2602_v63 = vld [vmem:[%s3391_s6 + $0x3e8] sm:$0xff]  ;;  %v2538_v0 = vld [vmem:[%s3391_s6 + $0x2f0] sm:$0xff] }
  0x9e   : > { %v2603_v1 = vld [vmem:[%s3391_s6 + $0x3f0] sm:$0xff] }
  0xa0   : > { %2828 = vmatmul.mubr.msk.f32.gmra.mrb[30].mxu0 %vm750_vm3, %v749_v2  ;;  %2880 = vmatmul.mubr.msk.f32.gmra.mrb[30].mxu1 %vm750_vm3, %v2474_v3  ;;  %v2539_v2 = vld [vmem:[%s3391_s6 + $0x2f8] sm:$0xff] }
  0xa1   : > { %2886 = vmatprep.mubr.msk.f32.mxu0 %vm750_vm3, %v2508_v4  ;;  %2938 = vmatprep.mubr.msk.f32.mxu1 %vm750_vm3, %v2573_v5  ;;  %v2604_v3 = vld [vmem:[%s3391_s6 + $0x3f8] sm:$0xff] }
  0xa4   : > { %2887 = vmatmul.mubr.msk.f32.vlgmr.msra.gmra.mrb[32].mxu0 %vm750_vm3, %v2509_v6  ;;  %2939 = vmatmul.mubr.msk.f32.vlgmr.msra.gmra.mrb[32].mxu1 %vm750_vm3, %v2574_v7 }
  0xa5   : > { %2889 = vmatprep.mubr.msk.f32.mxu0 %vm750_vm3, %v2510_v8  ;;  %2941 = vmatprep.mubr.msk.f32.mxu1 %vm750_vm3, %v2575_v9 }
  0xa8   : > { %2890 = vmatmul.mubr.msk.f32.gmra.mrb[34].mxu0 %vm750_vm3, %v2511_v10  ;;  %2942 = vmatmul.mubr.msk.f32.gmra.mrb[34].mxu1 %vm750_vm3, %v2576_v11 }
  0xa9   : > { %2892 = vmatprep.mubr.msk.f32.mxu0 %vm750_vm3, %v2512_v12  ;;  %2944 = vmatprep.mubr.msk.f32.mxu1 %vm750_vm3, %v2577_v13 }
  0xac   : > { %2893 = vmatmul.mubr.msk.f32.gmra.mrb[36].mxu0 %vm750_vm3, %v2513_v14  ;;  %2945 = vmatmul.mubr.msk.f32.gmra.mrb[36].mxu1 %vm750_vm3, %v2578_v15 }
  0xad   : > { %2895 = vmatprep.mubr.msk.f32.mxu0 %vm750_vm3, %v2514_v16  ;;  %2947 = vmatprep.mubr.msk.f32.mxu1 %vm750_vm3, %v2579_v17 }
  0xb0   : > { %2896 = vmatmul.mubr.msk.f32.gmra.mrb[38].mxu0 %vm750_vm3, %v2515_v18  ;;  %2948 = vmatmul.mubr.msk.f32.gmra.mrb[38].mxu1 %vm750_vm3, %v2580_v19 }
  0xb1   : > { %2898 = vmatprep.mubr.msk.f32.mxu0 %vm750_vm3, %v2516_v20  ;;  %2950 = vmatprep.mubr.msk.f32.mxu1 %vm750_vm3, %v2581_v21 }
  0xb4   : > { %2899 = vmatmul.mubr.msk.f32.gmra.mrb[40].mxu0 %vm750_vm3, %v2517_v22  ;;  %2951 = vmatmul.mubr.msk.f32.gmra.mrb[40].mxu1 %vm750_vm3, %v2582_v23 }
  0xb5   : > { %2901 = vmatprep.mubr.msk.f32.mxu0 %vm750_vm3, %v2518_v24  ;;  %2953 = vmatprep.mubr.msk.f32.mxu1 %vm750_vm3, %v2583_v25 }
  0xb8   : > { %2902 = vmatmul.mubr.msk.f32.gmra.mrb[42].mxu0 %vm750_vm3, %v2519_v26  ;;  %2954 = vmatmul.mubr.msk.f32.gmra.mrb[42].mxu1 %vm750_vm3, %v2584_v27 }
  0xb9   : > { %2904 = vmatprep.mubr.msk.f32.mxu0 %vm750_vm3, %v2520_v28  ;;  %2956 = vmatprep.mubr.msk.f32.mxu1 %vm750_vm3, %v2585_v29 }
  0xbc   : > { %2905 = vmatmul.mubr.msk.f32.gmra.mrb[44].mxu0 %vm750_vm3, %v2521_v30  ;;  %2957 = vmatmul.mubr.msk.f32.gmra.mrb[44].mxu1 %vm750_vm3, %v2586_v31 }
  0xbd   : > { %2907 = vmatprep.mubr.msk.f32.mxu0 %vm750_vm3, %v2522_v32  ;;  %2959 = vmatprep.mubr.msk.f32.mxu1 %vm750_vm3, %v2587_v33 }
  0xc0   : > { %2908 = vmatmul.mubr.msk.f32.gmra.mrb[46].mxu0 %vm750_vm3, %v2523_v34  ;;  %2960 = vmatmul.mubr.msk.f32.gmra.mrb[46].mxu1 %vm750_vm3, %v2588_v35 }
  0xc1   : > { %2910 = vmatprep.mubr.msk.f32.mxu0 %vm750_vm3, %v2524_v36  ;;  %2962 = vmatprep.mubr.msk.f32.mxu1 %vm750_vm3, %v2589_v37 }
  0xc4   : > { %2911 = vmatmul.mubr.msk.f32.gmra.mrb[48].mxu0 %vm750_vm3, %v2525_v38  ;;  %2963 = vmatmul.mubr.msk.f32.gmra.mrb[48].mxu1 %vm750_vm3, %v2590_v39 }
  0xc5   : > { %2913 = vmatprep.mubr.msk.f32.mxu0 %vm750_vm3, %v2526_v40  ;;  %2965 = vmatprep.mubr.msk.f32.mxu1 %vm750_vm3, %v2591_v41 }
  0xc8   : > { %2914 = vmatmul.mubr.msk.f32.gmra.mrb[50].mxu0 %vm750_vm3, %v2527_v42  ;;  %2966 = vmatmul.mubr.msk.f32.gmra.mrb[50].mxu1 %vm750_vm3, %v2592_v43 }
  0xc9   : > { %2916 = vmatprep.mubr.msk.f32.mxu0 %vm750_vm3, %v2528_v44  ;;  %2968 = vmatprep.mubr.msk.f32.mxu1 %vm750_vm3, %v2593_v45 }
  0xcc   : > { %2917 = vmatmul.mubr.msk.f32.gmra.mrb[52].mxu0 %vm750_vm3, %v2529_v46  ;;  %2969 = vmatmul.mubr.msk.f32.gmra.mrb[52].mxu1 %vm750_vm3, %v2594_v47 }
  0xcd   : > { %2919 = vmatprep.mubr.msk.f32.mxu0 %vm750_vm3, %v2530_v48  ;;  %2971 = vmatprep.mubr.msk.f32.mxu1 %vm750_vm3, %v2595_v49 }
  0xd0   : > { %2920 = vmatmul.mubr.msk.f32.gmra.mrb[54].mxu0 %vm750_vm3, %v2531_v50  ;;  %2972 = vmatmul.mubr.msk.f32.gmra.mrb[54].mxu1 %vm750_vm3, %v2596_v51 }
  0xd1   : > { %2922 = vmatprep.mubr.msk.f32.mxu0 %vm750_vm3, %v2532_v52  ;;  %2974 = vmatprep.mubr.msk.f32.mxu1 %vm750_vm3, %v2597_v53 }
  0xd4   : > { %2923 = vmatmul.mubr.msk.f32.gmra.mrb[56].mxu0 %vm750_vm3, %v2533_v54  ;;  %2975 = vmatmul.mubr.msk.f32.gmra.mrb[56].mxu1 %vm750_vm3, %v2598_v55 }
  0xd5   : > { %2925 = vmatprep.mubr.msk.f32.mxu0 %vm750_vm3, %v2534_v56  ;;  %2977 = vmatprep.mubr.msk.f32.mxu1 %vm750_vm3, %v2599_v57 }
  0xd8   : > { %2926 = vmatmul.mubr.msk.f32.gmra.mrb[58].mxu0 %vm750_vm3, %v2535_v58  ;;  %2978 = vmatmul.mubr.msk.f32.gmra.mrb[58].mxu1 %vm750_vm3, %v2600_v59 }
  0xd9   : > { %2928 = vmatprep.mubr.msk.f32.mxu0 %vm750_vm3, %v2536_v60  ;;  %2980 = vmatprep.mubr.msk.f32.mxu1 %vm750_vm3, %v2601_v61 }
  0xdc   : > { %2929 = vmatmul.mubr.msk.f32.gmra.mrb[60].mxu0 %vm750_vm3, %v2537_v62  ;;  %2981 = vmatmul.mubr.msk.f32.gmra.mrb[60].mxu1 %vm750_vm3, %v2602_v63 }
  0xdd   : > { %2931 = vmatprep.mubr.msk.f32.mxu0 %vm750_vm3, %v2538_v0  ;;  %2983 = vmatprep.mubr.msk.f32.mxu1 %vm750_vm3, %v2603_v1 }
  0xe0   : > { %2932 = vmatmul.mubr.msk.f32.gmra.mrb[62].mxu0 %vm750_vm3, %v2539_v2  ;;  %2984 = vmatmul.mubr.msk.f32.gmra.mrb[62].mxu1 %vm750_vm3, %v2604_v3 }
 0x137   : > { %v3661_v4 = vpop.f32.mrb[0].mxu0  ;;  %v3663_v5 = vpop.f32.mrb[0].mxu1 }
 0x138   : > { %v3667_v7 = vpop.f32.mrb[1].mxu0  ;;  %v3669_v8 = vpop.f32.mrb[1].mxu1  ;;  %v4069_v2 = vmax.f32 %v3661_v4, %v3663_v5 }
 0x13b   : > { %v3673_v10 = vpop.f32.mrb[2].mxu0  ;;  %v3675_v11 = vpop.f32.mrb[2].mxu1 }
 0x13c   : > { %v3679_v13 = vpop.f32.mrb[3].mxu0  ;;  %v3681_v14 = vpop.f32.mrb[3].mxu1  ;;  %v4071_v4 = vmax.f32 %v3673_v10, %v3675_v11 }
 0x13f   : > { %v3685_v16 = vpop.f32.mrb[4].mxu0  ;;  %v3687_v17 = vpop.f32.mrb[4].mxu1 }
 0x140   : > { %v3691_v19 = vpop.f32.mrb[5].mxu0  ;;  %v3693_v20 = vpop.f32.mrb[5].mxu1 }
 0x143   : > { %v3697_v22 = vpop.f32.mrb[6].mxu0  ;;  %v3699_v23 = vpop.f32.mrb[6].mxu1 }
 0x144   : > { %v3703_v25 = vpop.f32.mrb[7].mxu0  ;;  %v3705_v26 = vpop.f32.mrb[7].mxu1 }
 0x147   : > { %v3709_v28 = vpop.f32.mrb[8].mxu0  ;;  %v3711_v29 = vpop.f32.mrb[8].mxu1 }
 0x148   : > { %v3715_v31 = vpop.f32.mrb[9].mxu0  ;;  %v3717_v32 = vpop.f32.mrb[9].mxu1 }
 0x14b   : > { %v3721_v34 = vpop.f32.mrb[10].mxu0  ;;  %v3723_v35 = vpop.f32.mrb[10].mxu1 }
 0x14c   : > { %v3727_v37 = vpop.f32.mrb[11].mxu0  ;;  %v3729_v38 = vpop.f32.mrb[11].mxu1 }
 0x14f   : > { %v3733_v40 = vpop.f32.mrb[12].mxu0  ;;  %v3735_v41 = vpop.f32.mrb[12].mxu1 }
 0x150   : > { %v3739_v43 = vpop.f32.mrb[13].mxu0  ;;  %v3741_v44 = vpop.f32.mrb[13].mxu1 }
 0x153   : > { %v3745_v46 = vpop.f32.mrb[14].mxu0  ;;  %v3747_v47 = vpop.f32.mrb[14].mxu1 }
 0x154   : > { %v3751_v49 = vpop.f32.mrb[15].mxu0  ;;  %v3753_v50 = vpop.f32.mrb[15].mxu1 }
 0x157   : > { %v3757_v52 = vpop.f32.mrb[16].mxu0  ;;  %v3759_v53 = vpop.f32.mrb[16].mxu1 }
 0x158   : > { %v3763_v55 = vpop.f32.mrb[17].mxu0  ;;  %v3765_v56 = vpop.f32.mrb[17].mxu1 }
 0x15b   : > { %v3769_v58 = vpop.f32.mrb[18].mxu0  ;;  %v3771_v59 = vpop.f32.mrb[18].mxu1 }
 0x15c   : > { %v3775_v61 = vpop.f32.mrb[19].mxu0  ;;  %v3777_v62 = vpop.f32.mrb[19].mxu1 }
 0x15f   : > { %v3781_v0 = vpop.f32.mrb[20].mxu0  ;;  %v3783_v1 = vpop.f32.mrb[20].mxu1 }
 0x160   : > { %v3787_v3 = vpop.f32.mrb[21].mxu0  ;;  %v3789_v57 = vpop.f32.mrb[21].mxu1 }
 0x163   : > { %v3793_v54 = vpop.f32.mrb[22].mxu0  ;;  %v3795_v51 = vpop.f32.mrb[22].mxu1 }
 0x164   : > { %v3799_v48 = vpop.f32.mrb[23].mxu0  ;;  %v3801_v45 = vpop.f32.mrb[23].mxu1 }
 0x167   : > { %v3805_v42 = vpop.f32.mrb[24].mxu0  ;;  %v3807_v39 = vpop.f32.mrb[24].mxu1 }
 0x168   : > { %v3811_v36 = vpop.f32.mrb[25].mxu0  ;;  %v3813_v33 = vpop.f32.mrb[25].mxu1 }
 0x169   : > { %4055 = vst [vmem:[#allocation3_spill] sm:$0xff] %v3811_v36  ;;  %4056 = vst [vmem:[#allocation4_spill] sm:$0xff] %v3813_v33  ;;  %v4070_v33 = vmax.f32 %v3667_v7, %v3669_v8  ;;  %v4072_v8 = vmax.f32 %v3679_v13, %v3681_v14 }
 0x16b   : > { %v3817_v30 = vpop.f32.mrb[26].mxu0  ;;  %v3819_v27 = vpop.f32.mrb[26].mxu1 }
 0x16c   : > { %4057 = vst [vmem:[#allocation5_spill] sm:$0xff] %v3817_v30  ;;  %4058 = vst [vmem:[#allocation6_spill] sm:$0xff] %v3819_v27  ;;  %v3823_v24 = vpop.f32.mrb[27].mxu0  ;;  %v3825_v21 = vpop.f32.mrb[27].mxu1 }
 0x16d   : > { %4059 = vst [vmem:[#allocation7_spill] sm:$0xff] %v3823_v24  ;;  %4060 = vst [vmem:[#allocation8_spill] sm:$0xff] %v3825_v21 }
 0x16f   : > { %v3829_v18 = vpop.f32.mrb[28].mxu0  ;;  %v3831_v15 = vpop.f32.mrb[28].mxu1 }
 0x170   : > { %4061 = vst [vmem:[#allocation9_spill] sm:$0xff] %v3829_v18  ;;  %4062 = vst [vmem:[#allocation10_spill] sm:$0xff] %v3831_v15  ;;  %v3837_v12 = vpop.f32.mrb[29].mxu0  ;;  %v3839_v9 = vpop.f32.mrb[29].mxu1 }
 0x171   : > { %4063 = vst [vmem:[#allocation11_spill] sm:$0xff] %v3837_v12  ;;  %4064 = vst [vmem:[#allocation12_spill] sm:$0xff] %v3839_v9 }
 0x173   : > { %v3843_v6 = vpop.f32.mrb[30].mxu0  ;;  %v3845_v60 = vpop.f32.mrb[30].mxu1 }
 0x174   : > { %4065 = vst [vmem:[#allocation13_spill] sm:$0xff] %v3843_v6  ;;  %4066 = vst [vmem:[#allocation14_spill] sm:$0xff] %v3845_v60  ;;  %v3849_v24 = vpop.f32.mrb[31].mxu0  ;;  %v3851_v27 = vpop.f32.mrb[31].mxu1  ;;  %v3864_v60 = vld [vmem:[%s4037_s2] ss:$0 sm:$0xff] }
 0x175   : > { %4067 = vst [vmem:[#allocation15_spill] sm:$0xff] %v3849_v24  ;;  %4068 = vst [vmem:[#allocation16_spill] sm:$0xff] %v3851_v27 }
 0x177   : > { %v2888_v15 = vpop.f32.mrb[32].mxu0  ;;  %v2940_v18 = vpop.f32.mrb[32].mxu1 }
 0x178   : > { %v1817_v9 = vmax.f32 %v4069_v2, %v2888_v15  ;;  %v1657_v12 = vpop.f32.mrb[33].mxu0  ;;  %v2043_v30 = vpop.f32.mrb[33].mxu1 }
 0x179   : > { %v1816_v21 = vmax.f32 %v4070_v33, %v1657_v12  ;;  %v4073_v33 = vmax.f32 %v3685_v16, %v3687_v17  ;;  %v4075_v17 = vmax.f32 %v3697_v22, %v3699_v23  ;;  %v4077_v23 = vmax.f32 %v3709_v28, %v3711_v29 }
 0x17a   : > { %v2203_v63 = vmax.f32 %v1817_v9, %v2940_v18  ;;  %v4079_v29 = vmax.f32 %v3721_v34, %v3723_v35  ;;  %v4081_v35 = vmax.f32 %v3733_v40, %v3735_v41  ;;  %v4083_v41 = vmax.f32 %v3745_v46, %v3747_v47 }
 0x17b   : > { %v2202_v27 = vmax.f32 %v1816_v21, %v2043_v30  ;;  %v2891_v24 = vpop.f32.mrb[34].mxu0  ;;  %v2943_v6 = vpop.f32.mrb[34].mxu1  ;;  %v4085_v47 = vmax.f32 %v3757_v52, %v3759_v53  ;;  %v4087_v53 = vmax.f32 %v3769_v58, %v3771_v59  ;;  %v4089_v59 = vmax.f32 %v3781_v0, %v3783_v1 }
 0x17c   : > { %v2242_v36 = vadd.f32 %v3864_v60, %v2203_v63  ;;  %v1819_v5 = vmax.f32 %v4071_v4, %v2891_v24  ;;  %v1667_v15 = vpop.f32.mrb[35].mxu0  ;;  %v2053_v2 = vpop.f32.mrb[35].mxu1  ;;  %v4091_v1 = vmax.f32 %v3793_v54, %v3795_v51  ;;  %v4093_v54 = vmax.f32 %v3805_v42, %v3807_v39  ;;  %v4097_v42 = vld [vmem:[#allocation5_spill] sm:$0xff] }
 0x17d   : > { %v2241_v7 = vadd.f32 %v3864_v60, %v2202_v27  ;;  %v1818_v9 = vmax.f32 %v4072_v8, %v1667_v15 }
 0x17e   : > { %v2274_v12 = vmax.f32 %v2242_v36, 0.0  ;;  %v2205_v18 = vmax.f32 %v1819_v5, %v2943_v6  ;;  %v4074_v6 = vmax.f32 %v3691_v19, %v3693_v20  ;;  %v4076_v20 = vmax.f32 %v3703_v25, %v3705_v26 }
 0x17f   : > { %v2273_v21 = vmax.f32 %v2241_v7, 0.0  ;;  %v2204_v10 = vmax.f32 %v1818_v9, %v2053_v2  ;;  %v2894_v11 = vpop.f32.mrb[36].mxu0  ;;  %v2946_v24 = vpop.f32.mrb[36].mxu1  ;;  %v4078_v26 = vmax.f32 %v3715_v31, %v3717_v32  ;;  %v4080_v32 = vmax.f32 %v3727_v37, %v3729_v38 }
 0x180   : > { %2306 = vst [vmem:[%s3873_s14 + $0x8] sm:$0xff] %v2274_v12  ;;  %v2244_v30 = vadd.f32 %v3864_v60, %v2205_v18  ;;  %v1821_v63 = vmax.f32 %v4073_v33, %v2894_v11  ;;  %v1677_v4 = vpop.f32.mrb[37].mxu0  ;;  %v2063_v27 = vpop.f32.mrb[37].mxu1  ;;  %v4082_v38 = vmax.f32 %v3739_v43, %v3741_v44  ;;  %v4084_v44 = vmax.f32 %v3751_v49, %v3753_v50 }
 0x181   : > { %2305 = vst [vmem:[%s3873_s14] sm:$0xff] %v2273_v21  ;;  %v2243_v13 = vadd.f32 %v3864_v60, %v2204_v10  ;;  %v1820_v14 = vmax.f32 %v4074_v6, %v1677_v4  ;;  %v4086_v50 = vmax.f32 %v3763_v55, %v3765_v56  ;;  %v4088_v56 = vmax.f32 %v3775_v61, %v3777_v62 }
 0x182   : > { %v2276_v36 = vmax.f32 %v2244_v30, 0.0  ;;  %v2207_v5 = vmax.f32 %v1821_v63, %v2946_v24  ;;  %v4090_v62 = vmax.f32 %v3787_v3, %v3789_v57  ;;  %v4092_v3 = vmax.f32 %v3799_v48, %v3801_v45  ;;  %v4094_v48 = vld [vmem:[#allocation3_spill] sm:$0xff] }
 0x183   : > { %v2275_v15 = vmax.f32 %v2243_v13, 0.0  ;;  %v2206_v2 = vmax.f32 %v1820_v14, %v2063_v27  ;;  %v2897_v7 = vpop.f32.mrb[38].mxu0  ;;  %v2949_v8 = vpop.f32.mrb[38].mxu1 }
 0x184   : > { %2308 = vst [vmem:[%s3873_s14 + $0x18] sm:$0xff] %v2276_v36  ;;  %v2246_v16 = vadd.f32 %v3864_v60, %v2207_v5  ;;  %v1823_v9 = vmax.f32 %v4075_v17, %v2897_v7  ;;  %v1687_v12 = vpop.f32.mrb[39].mxu0  ;;  %v2073_v18 = vpop.f32.mrb[39].mxu1 }
 0x185   : > { %2307 = vst [vmem:[%s3873_s14 + $0x10] sm:$0xff] %v2275_v15  ;;  %v2245_v19 = vadd.f32 %v3864_v60, %v2206_v2  ;;  %v1822_v21 = vmax.f32 %v4076_v20, %v1687_v12 }
 0x186   : > { %v2278_v10 = vmax.f32 %v2246_v16, 0.0  ;;  %v2209_v11 = vmax.f32 %v1823_v9, %v2949_v8 }
 0x187   : > { %v2277_v24 = vmax.f32 %v2245_v19, 0.0  ;;  %v2208_v30 = vmax.f32 %v1822_v21, %v2073_v18  ;;  %v2900_v33 = vpop.f32.mrb[40].mxu0  ;;  %v2952_v63 = vpop.f32.mrb[40].mxu1 }
 0x188   : > { %2310 = vst [vmem:[%s3873_s14 + $0x28] sm:$0xff] %v2278_v10  ;;  %v2248_v22 = vadd.f32 %v3864_v60, %v2209_v11  ;;  %v1825_v4 = vmax.f32 %v4077_v23, %v2900_v33  ;;  %v1697_v27 = vpop.f32.mrb[41].mxu0  ;;  %v2083_v13 = vpop.f32.mrb[41].mxu1 }
 0x189   : > { %2309 = vst [vmem:[%s3873_s14 + $0x20] sm:$0xff] %v2277_v24  ;;  %v2247_v25 = vadd.f32 %v3864_v60, %v2208_v30  ;;  %v1824_v6 = vmax.f32 %v4078_v26, %v1697_v27 }
 0x18a   : > { %v2280_v14 = vmax.f32 %v2248_v22, 0.0  ;;  %v2211_v36 = vmax.f32 %v1825_v4, %v2952_v63 }
 0x18b   : > { %v2279_v5 = vmax.f32 %v2247_v25, 0.0  ;;  %v2210_v15 = vmax.f32 %v1824_v6, %v2083_v13  ;;  %v2903_v2 = vpop.f32.mrb[42].mxu0  ;;  %v2955_v7 = vpop.f32.mrb[42].mxu1 }
 0x18c   : > { %2312 = vst [vmem:[%s3873_s14 + $0x38] sm:$0xff] %v2280_v14  ;;  %v2250_v28 = vadd.f32 %v3864_v60, %v2211_v36  ;;  %v1827_v8 = vmax.f32 %v4079_v29, %v2903_v2  ;;  %v1707_v16 = vpop.f32.mrb[43].mxu0  ;;  %v2093_v17 = vpop.f32.mrb[43].mxu1 }
 0x18d   : > { %2311 = vst [vmem:[%s3873_s14 + $0x30] sm:$0xff] %v2279_v5  ;;  %v2249_v31 = vadd.f32 %v3864_v60, %v2210_v15  ;;  %v1826_v9 = vmax.f32 %v4080_v32, %v1707_v16 }
 0x18e   : > { %v2282_v12 = vmax.f32 %v2250_v28, 0.0  ;;  %v2213_v18 = vmax.f32 %v1827_v8, %v2955_v7 }
 0x18f   : > { %v2281_v19 = vmax.f32 %v2249_v31, 0.0  ;;  %v2212_v20 = vmax.f32 %v1826_v9, %v2093_v17  ;;  %v2906_v21 = vpop.f32.mrb[44].mxu0  ;;  %v2958_v10 = vpop.f32.mrb[44].mxu1 }
 0x190   : > { %2314 = vst [vmem:[%s3873_s14 + $0x48] sm:$0xff] %v2282_v12  ;;  %v2252_v34 = vadd.f32 %v3864_v60, %v2213_v18  ;;  %v1829_v11 = vmax.f32 %v4081_v35, %v2906_v21  ;;  %v1717_v24 = vpop.f32.mrb[45].mxu0  ;;  %v2103_v30 = vpop.f32.mrb[45].mxu1 }
 0x191   : > { %2313 = vst [vmem:[%s3873_s14 + $0x40] sm:$0xff] %v2281_v19  ;;  %v2251_v37 = vadd.f32 %v3864_v60, %v2212_v20  ;;  %v1828_v33 = vmax.f32 %v4082_v38, %v1717_v24 }
 0x192   : > { %v2284_v63 = vmax.f32 %v2252_v34, 0.0  ;;  %v2215_v22 = vmax.f32 %v1829_v11, %v2958_v10 }
 0x193   : > { %v2283_v23 = vmax.f32 %v2251_v37, 0.0  ;;  %v2214_v4 = vmax.f32 %v1828_v33, %v2103_v30  ;;  %v2909_v27 = vpop.f32.mrb[46].mxu0  ;;  %v2961_v13 = vpop.f32.mrb[46].mxu1 }
 0x194   : > { %2316 = vst [vmem:[%s3873_s14 + $0x58] sm:$0xff] %v2284_v63  ;;  %v2254_v40 = vadd.f32 %v3864_v60, %v2215_v22  ;;  %v1831_v25 = vmax.f32 %v4083_v41, %v2909_v27  ;;  %v1727_v26 = vpop.f32.mrb[47].mxu0  ;;  %v2113_v6 = vpop.f32.mrb[47].mxu1 }
 0x195   : > { %2315 = vst [vmem:[%s3873_s14 + $0x50] sm:$0xff] %v2283_v23  ;;  %v2253_v43 = vadd.f32 %v3864_v60, %v2214_v4  ;;  %v1830_v14 = vmax.f32 %v4084_v44, %v1727_v26 }
 0x196   : > { %v2286_v36 = vmax.f32 %v2254_v40, 0.0  ;;  %v2217_v5 = vmax.f32 %v1831_v25, %v2961_v13 }
 0x197   : > { %v2285_v15 = vmax.f32 %v2253_v43, 0.0  ;;  %v2216_v2 = vmax.f32 %v1830_v14, %v2113_v6  ;;  %v2912_v7 = vpop.f32.mrb[48].mxu0  ;;  %v2964_v28 = vpop.f32.mrb[48].mxu1 }
 0x198   : > { %2318 = vst [vmem:[%s3873_s14 + $0x68] sm:$0xff] %v2286_v36  ;;  %v2256_v46 = vadd.f32 %v3864_v60, %v2217_v5  ;;  %v1833_v29 = vmax.f32 %v4085_v47, %v2912_v7  ;;  %v1737_v8 = vpop.f32.mrb[49].mxu0  ;;  %v2123_v16 = vpop.f32.mrb[49].mxu1 }
 0x199   : > { %2317 = vst [vmem:[%s3873_s14 + $0x60] sm:$0xff] %v2285_v15  ;;  %v2255_v49 = vadd.f32 %v3864_v60, %v2216_v2  ;;  %v1832_v17 = vmax.f32 %v4086_v50, %v1737_v8 }
 0x19a   : > { %v2288_v31 = vmax.f32 %v2256_v46, 0.0  ;;  %v2219_v32 = vmax.f32 %v1833_v29, %v2964_v28  ;;  %v4095_v29 = vld [vmem:[#allocation4_spill] sm:$0xff] }
 0x19b   : > { %v2287_v9 = vmax.f32 %v2255_v49, 0.0  ;;  %v2218_v12 = vmax.f32 %v1832_v17, %v2123_v16  ;;  %v2915_v18 = vpop.f32.mrb[50].mxu0  ;;  %v2967_v19 = vpop.f32.mrb[50].mxu1  ;;  %v4096_v8 = vmax.f32 %v4094_v48, %v4095_v29 }
 0x19c   : > { %2320 = vst [vmem:[%s3873_s14 + $0x78] sm:$0xff] %v2288_v31  ;;  %v2258_v52 = vadd.f32 %v3864_v60, %v2219_v32  ;;  %v1835_v20 = vmax.f32 %v4087_v53, %v2915_v18  ;;  %v1747_v21 = vpop.f32.mrb[51].mxu0  ;;  %v2133_v10 = vpop.f32.mrb[51].mxu1 }
 0x19d   : > { %2319 = vst [vmem:[%s3873_s14 + $0x70] sm:$0xff] %v2287_v9  ;;  %v2257_v55 = vadd.f32 %v3864_v60, %v2218_v12  ;;  %v1834_v34 = vmax.f32 %v4088_v56, %v1747_v21  ;;  %v4098_v12 = vld [vmem:[#allocation6_spill] sm:$0xff]  ;;  %v4100_v21 = vld [vmem:[#allocation7_spill] sm:$0xff] }
 0x19e   : > { %v2290_v35 = vmax.f32 %v2258_v52, 0.0  ;;  %v2221_v11 = vmax.f32 %v1835_v20, %v2967_v19  ;;  %v4099_v18 = vmax.f32 %v4097_v42, %v4098_v12 }
 0x19f   : > { %v2289_v24 = vmax.f32 %v2257_v55, 0.0  ;;  %v2220_v30 = vmax.f32 %v1834_v34, %v2133_v10  ;;  %v2918_v37 = vpop.f32.mrb[52].mxu0  ;;  %v2970_v38 = vpop.f32.mrb[52].mxu1  ;;  %v4101_v10 = vld [vmem:[#allocation8_spill] sm:$0xff] }
 0x1a0   : > { %2322 = vst [vmem:[%s3873_s14 + $0x88] sm:$0xff] %v2290_v35  ;;  %v2260_v58 = vadd.f32 %v3864_v60, %v2221_v11  ;;  %v1837_v33 = vmax.f32 %v4089_v59, %v2918_v37  ;;  %v1757_v63 = vpop.f32.mrb[53].mxu0  ;;  %v2143_v22 = vpop.f32.mrb[53].mxu1  ;;  %v4102_v55 = vmax.f32 %v4100_v21, %v4101_v10  ;;  %v4104_v59 = vld [vmem:[#allocation10_spill] sm:$0xff] }
 0x1a1   : > { %2321 = vst [vmem:[%s3873_s14 + $0x80] sm:$0xff] %v2289_v24  ;;  %v2259_v61 = vadd.f32 %v3864_v60, %v2220_v30  ;;  %v1836_v23 = vmax.f32 %v4090_v62, %v1757_v63 }
 0x1a2   : > { %v2292_v4 = vmax.f32 %v2260_v58, 0.0  ;;  %v2223_v27 = vmax.f32 %v1837_v33, %v2970_v38  ;;  %v4103_v58 = vld [vmem:[#allocation9_spill] sm:$0xff] }
 0x1a3   : > { %v2291_v13 = vmax.f32 %v2259_v61, 0.0  ;;  %v2222_v40 = vmax.f32 %v1836_v23, %v2143_v22  ;;  %v2921_v41 = vpop.f32.mrb[54].mxu0  ;;  %v2973_v25 = vpop.f32.mrb[54].mxu1  ;;  %v4105_v33 = vmax.f32 %v4103_v58, %v4104_v59  ;;  %v4106_v23 = vld [vmem:[#allocation11_spill] sm:$0xff] }
 0x1a4   : > { %2324 = vst [vmem:[%s3873_s14 + $0x98] sm:$0xff] %v2292_v4  ;;  %v2262_v0 = vadd.f32 %v3864_v60, %v2223_v27  ;;  %v1839_v26 = vmax.f32 %v4091_v1, %v2921_v41  ;;  %v1767_v6 = vpop.f32.mrb[55].mxu0  ;;  %v2153_v43 = vpop.f32.mrb[55].mxu1  ;;  %v4107_v4 = vld [vmem:[#allocation12_spill] sm:$0xff] }
 0x1a5   : > { %2323 = vst [vmem:[%s3873_s14 + $0x90] sm:$0xff] %v2291_v13  ;;  %v2261_v57 = vadd.f32 %v3864_v60, %v2222_v40  ;;  %v1838_v44 = vmax.f32 %v4092_v3, %v1767_v6  ;;  %v4108_v27 = vmax.f32 %v4106_v23, %v4107_v4 }
 0x1a6   : > { %v2294_v14 = vmax.f32 %v2262_v0, 0.0  ;;  %v2225_v36 = vmax.f32 %v1839_v26, %v2973_v25 }
 0x1a7   : > { %v2293_v5 = vmax.f32 %v2261_v57, 0.0  ;;  %v2224_v15 = vmax.f32 %v1838_v44, %v2153_v43  ;;  %v2924_v2 = vpop.f32.mrb[56].mxu0  ;;  %v2976_v7 = vpop.f32.mrb[56].mxu1  ;;  %v4109_v43 = vld [vmem:[#allocation13_spill] sm:$0xff]  ;;  %v4110_v57 = vld [vmem:[#allocation14_spill] sm:$0xff] }
 0x1a8   : > { %2326 = vst [vmem:[%s3873_s14 + $0xa8] sm:$0xff] %v2294_v14  ;;  %v2264_v51 = vadd.f32 %v3864_v60, %v2225_v36  ;;  %v1841_v28 = vmax.f32 %v4093_v54, %v2924_v2  ;;  %v1777_v46 = vpop.f32.mrb[57].mxu0  ;;  %v2163_v47 = vpop.f32.mrb[57].mxu1  ;;  %v4111_v3 = vmax.f32 %v4109_v43, %v4110_v57  ;;  %v4113_v2 = vld [vmem:[#allocation16_spill] sm:$0xff] }
 0x1a9   : > { %2325 = vst [vmem:[%s3873_s14 + $0xa0] sm:$0xff] %v2293_v5  ;;  %v2263_v45 = vadd.f32 %v3864_v60, %v2224_v15  ;;  %v1840_v16 = vmax.f32 %v4096_v8, %v1777_v46  ;;  %v4112_v15 = vld [vmem:[#allocation15_spill] sm:$0xff] }
 0x1aa   : > { %v2296_v49 = vmax.f32 %v2264_v51, 0.0  ;;  %v2227_v50 = vmax.f32 %v1841_v28, %v2976_v7  ;;  %v4114_v7 = vmax.f32 %v4112_v15, %v4113_v2 }
 0x1ab   : > { %v2295_v17 = vmax.f32 %v2263_v45, 0.0  ;;  %v2226_v31 = vmax.f32 %v1840_v16, %v2163_v47  ;;  %v2927_v32 = vpop.f32.mrb[58].mxu0  ;;  %v2979_v9 = vpop.f32.mrb[58].mxu1 }
 0x1ac   : > { %2328 = vst [vmem:[%s3873_s14 + $0xb8] sm:$0xff] %v2296_v49  ;;  %v2266_v39 = vadd.f32 %v3864_v60, %v2227_v50  ;;  %v1843_v19 = vmax.f32 %v4099_v18, %v2927_v32  ;;  %v1787_v52 = vpop.f32.mrb[59].mxu0  ;;  %v2173_v53 = vpop.f32.mrb[59].mxu1 }
 0x1ad   : > { %2327 = vst [vmem:[%s3873_s14 + $0xb0] sm:$0xff] %v2295_v17  ;;  %v2265_v20 = vadd.f32 %v3864_v60, %v2226_v31  ;;  %v1842_v56 = vmax.f32 %v4102_v55, %v1787_v52 }
 0x1ae   : > { %v2298_v34 = vmax.f32 %v2266_v39, 0.0  ;;  %v2229_v35 = vmax.f32 %v1843_v19, %v2979_v9 }
 0x1af   : > { %v2297_v11 = vmax.f32 %v2265_v20, 0.0  ;;  %v2228_v24 = vmax.f32 %v1842_v56, %v2173_v53  ;;  %v2930_v30 = vpop.f32.mrb[60].mxu0  ;;  %v2982_v37 = vpop.f32.mrb[60].mxu1 }
 0x1b0   : > { %2330 = vst [vmem:[%s3873_s14 + $0xc8] sm:$0xff] %v2298_v34  ;;  %v2268_v38 = vadd.f32 %v3864_v60, %v2229_v35  ;;  %v1845_v63 = vmax.f32 %v4105_v33, %v2930_v30  ;;  %v1797_v22 = vpop.f32.mrb[61].mxu0  ;;  %v2183_v61 = vpop.f32.mrb[61].mxu1 }
 0x1b1   : > { %2329 = vst [vmem:[%s3873_s14 + $0xc0] sm:$0xff] %v2297_v11  ;;  %v2267_v62 = vadd.f32 %v3864_v60, %v2228_v24  ;;  %v1844_v13 = vmax.f32 %v4108_v27, %v1797_v22 }
 0x1b2   : > { %v2300_v40 = vmax.f32 %v2268_v38, 0.0  ;;  %v2231_v41 = vmax.f32 %v1845_v63, %v2982_v37 }
 0x1b3   : > { %v2299_v25 = vmax.f32 %v2267_v62, 0.0  ;;  %v2230_v0 = vmax.f32 %v1844_v13, %v2183_v61  ;;  %v2933_v1 = vpop.f32.mrb[62].mxu0  ;;  %v2985_v26 = vpop.f32.mrb[62].mxu1 }
 0x1b4   : > { %2332 = vst [vmem:[%s3873_s14 + $0xd8] sm:$0xff] %v2300_v40  ;;  %v2270_v6 = vadd.f32 %v3864_v60, %v2231_v41  ;;  %v1847_v44 = vmax.f32 %v4111_v3, %v2933_v1  ;;  %v1807_v14 = vpop.f32.mrb[63].mxu0  ;;  %v2193_v36 = vpop.f32.mrb[63].mxu1 }
 0x1b5   : > { %2331 = vst [vmem:[%s3873_s14 + $0xd0] sm:$0xff] %v2299_v25  ;;  %v2269_v5 = vadd.f32 %v3864_v60, %v2230_v0  ;;  %v1846_v51 = vmax.f32 %v4114_v7, %v1807_v14 }
 0x1b6   : > { %v2302_v54 = vmax.f32 %v2270_v6, 0.0  ;;  %v2233_v28 = vmax.f32 %v1847_v44, %v2985_v26 }
 0x1b7   : > { %v2301_v46 = vmax.f32 %v2269_v5, 0.0  ;;  %v2232_v47 = vmax.f32 %v1846_v51, %v2193_v36 }
 0x1b8   : > { %2334 = vst [vmem:[%s3873_s14 + $0xe8] sm:$0xff] %v2302_v54  ;;  %v2272_v45 = vadd.f32 %v3864_v60, %v2233_v28 }
 0x1b9   : > { %2333 = vst [vmem:[%s3873_s14 + $0xe0] sm:$0xff] %v2301_v46  ;;  %v2271_v48 = vadd.f32 %v3864_v60, %v2232_v47 }
 0x1ba   : > { %v2304_v29 = vmax.f32 %v2272_v45, 0.0 }
 0x1bb   : > { %v2303_v8 = vmax.f32 %v2271_v48, 0.0 }
 0x1bc   : > { %2336 = vst [vmem:[%s3873_s14 + $0xf8] sm:$0xff] %v2304_v29 }
 0x1bd   : > { %2335 = vst [vmem:[%s3873_s14 + $0xf0] sm:$0xff] %v2303_v8 }
 0x1be PF: > { %p10_p9 = scmp.ge.s32.totalorder %s3097_s16, 4   ;;  %s4115_s12 = smov %s3053_s13 }
 0x1bf   : > { %s4116_s13 = smov %s3106_s19  ;;  %s4117_s14 = smov %s3097_s16 }
 0x1c0   :  { %12 = sbr.rel (!%p10_p9) target bundleno = 2 (0x2), region = 108 }

// kernel: cnn_forward.4
= control target key start
LH: loop header
LB: loop body
LE: loop exit
PB: predicated region body
PF: predicated region fallthrough
CT: control target
= control target key end

     0   :  { %v1698_v0 = vmov 0.0|0.0   ;;  %vm1699_vm0 = vmmov 0   ;;  %v1700_v4 = vmov 0.0   ;;  %vm71_vm1 = vcmask 261120   ;;  %s2339_s1 = inlined_call_operand.vmem [shape: f32[288,128], index: 1, kind: input, shape index: {}]   ;;  %s2340_s0 = inlined_call_operand.vmem [shape: f32[4,56,288], index: 0, kind: input, shape index: {}]   ;;  %s2341_s2 = inlined_call_operand.vmem [shape: f32[1,128], index: 2, kind: input, shape index: {}]   ;;  %s2342_s3 = inlined_call_operand.vmem [shape: f32[56,128], index: 3, kind: output, shape index: {}]  }
   0x1   :  { %1571 = vmatprep.subr.bf16.mxu1 %v1698_v0  ;;  %v30_v1 = vld [vmem:[%s2339_s1 + $0x80] sm:$0xff]  ;;  %v31_v2 = vld [vmem:[%s2339_s1 + $0x88] sm:$0xff]  ;;  %1431 = vmatprep.mubr.msk.f32.mxu1 %vm1699_vm0, %v1700_v4  ;;  %v32_v11 = vld [vmem:[%s2339_s1 + $0x90] sm:$0xff] }
   0x2   :  { %v46_v3 = vld [vmem:[%s2339_s1 + $0x100] sm:$0xff]  ;;  %v1733_v5 = vpack.c.bf16 %v31_v2, %v30_v1  ;;  %v47_v6 = vld [vmem:[%s2339_s1 + $0x108] sm:$0xff]  ;;  %v33_v12 = vld [vmem:[%s2339_s1 + $0x98] sm:$0xff] }
   0x3   :  { %v14_v7 = vld [vmem:[%s2339_s1] sm:$0xff]  ;;  %v15_v8 = vld [vmem:[%s2339_s1 + $0x8] sm:$0xff]  ;;  %v1744_v9 = vpack.c.bf16 %v47_v6, %v46_v3  ;;  %v48_v13 = vld [vmem:[%s2339_s1 + $0x110] sm:$0xff]  ;;  %v1758_v14 = vpack.c.bf16 %v33_v12, %v32_v11 }
   0x4   :  { %v1746_v10 = vpack.c.bf16 %v15_v8, %v14_v7  ;;  %1540 = vmatprep.subr.bf16.mxu0 %v1733_v5  ;;  %v49_v15 = vld [vmem:[%s2339_s1 + $0x118] sm:$0xff]  ;;  %v16_v16 = vld [vmem:[%s2339_s1 + $0x10] sm:$0xff]  ;;  %v34_v20 = vld [vmem:[%s2339_s1 + $0xa0] sm:$0xff] }
   0x5   :  { %v17_v17 = vld [vmem:[%s2339_s1 + $0x18] sm:$0xff]  ;;  %1573 = vmatpush3.bf16.msra.mxu1 %v1744_v9  ;;  %v1771_v18 = vpack.c.bf16 %v49_v15, %v48_v13  ;;  %v35_v21 = vld [vmem:[%s2339_s1 + $0xa8] sm:$0xff]  ;;  %v18_v23 = vld [vmem:[%s2339_s1 + $0x20] sm:$0xff] }
   0x6   :  { %1542 = vmatpush3.bf16.msra.mxu0 %v1746_v10  ;;  %v1773_v19 = vpack.c.bf16 %v17_v17, %v16_v16  ;;  %1574 = vmatprep.subr.bf16.mxu1 %v1698_v0  ;;  %v1783_v22 = vpack.c.bf16 %v35_v21, %v34_v20  ;;  %v19_v24 = vld [vmem:[%s2339_s1 + $0x28] sm:$0xff]  ;;  %v36_v25 = vld [vmem:[%s2339_s1 + $0xb0] sm:$0xff]  ;;  %v37_v26 = vld [vmem:[%s2339_s1 + $0xb8] sm:$0xff] }
   0x7   :  { %1544 = vmatprep.subr.bf16.mxu0 %v1758_v14  ;;  %v52_v27 = vld [vmem:[%s2340_s0 + $0x10] sm:$0xff]  ;;  %v1802_v28 = vpack.c.bf16 %v19_v24, %v18_v23  ;;  %v1806_v29 = vpack.c.bf16 %v37_v26, %v36_v25  ;;  %v21_v31 = vld [vmem:[%s2339_s1 + $0x38] sm:$0xff]  ;;  %v38_v32 = vld [vmem:[%s2339_s1 + $0xc0] sm:$0xff] }
   0x8   :  { %v20_v30 = vld [vmem:[%s2339_s1 + $0x30] sm:$0xff]  ;;  %v39_v33 = vld [vmem:[%s2339_s1 + $0xc8] sm:$0xff]  ;;  %v22_v37 = vld [vmem:[%s2339_s1 + $0x40] sm:$0xff] }
   0x9   :  { %1576 = vmatpush3.bf16.msra.mxu1 %v1771_v18  ;;  %v1823_v34 = vpack.c.bf16 %v21_v31, %v20_v30  ;;  %v55_v35 = vld [vmem:[%s2340_s0 + $0x28] sm:$0xff]  ;;  %v1830_v36 = vpack.c.bf16 %v39_v33, %v38_v32  ;;  %v40_v40 = vld [vmem:[%s2339_s1 + $0xd0] sm:$0xff]  ;;  %v41_v41 = vld [vmem:[%s2339_s1 + $0xd8] sm:$0xff] }
   0xa   :  { %1546 = vmatpush3.bf16.msra.mxu0 %v1773_v19  ;;  %1578 = vmatprep.subr.bf16.mxu1 %v1733_v5  ;;  %v23_v38 = vld [vmem:[%s2339_s1 + $0x48] sm:$0xff]  ;;  %v58_v43 = vld [vmem:[%s2340_s0 + $0x40] sm:$0xff]  ;;  %v1859_v44 = vpack.c.bf16 %v41_v41, %v40_v40  ;;  %v24_v45 = vld [vmem:[%s2339_s1 + $0x50] sm:$0xff] }
   0xb   :  { %1548 = vmatprep.subr.bf16.mxu0 %v1783_v22  ;;  %v51_v39 = vld [vmem:[%s2340_s0 + $0x8] sm:$0xff]  ;;  %v1852_v42 = vpack.c.bf16 %v23_v38, %v22_v37  ;;  %v25_v46 = vld [vmem:[%s2339_s1 + $0x58] sm:$0xff]  ;;  %v42_v47 = vld [vmem:[%s2339_s1 + $0xe0] sm:$0xff] }
   0xc   :  { %1432 = vmatmul.mubr.msk.f32.vlgmr.msra.gmra.mrb[0].mxu1 %vm71_vm1, %v52_v27  ;;  %157 = vmatprep.mubr.f32.mxu0 %v51_v39  ;;  %v43_v48 = vld [vmem:[%s2339_s1 + $0xe8] sm:$0xff]  ;;  %v1878_v49 = vpack.c.bf16 %v25_v46, %v24_v45  ;;  %v61_v50 = vld [vmem:[%s2340_s0 + $0x58] sm:$0xff]  ;;  %v26_v52 = vld [vmem:[%s2339_s1 + $0x60] sm:$0xff] }
   0xd   :  { %1580 = vmatpush3.bf16.msra.mxu1 %v1746_v10  ;;  %1434 = vmatprep.mubr.msk.f32.mxu1 %vm1699_vm0, %v1700_v4  ;;  %v1885_v51 = vpack.c.bf16 %v43_v48, %v42_v47  ;;  %v27_v53 = vld [vmem:[%s2339_s1 + $0x68] sm:$0xff]  ;;  %v44_v54 = vld [vmem:[%s2339_s1 + $0xf0] sm:$0xff]  ;;  %v45_v55 = vld [vmem:[%s2339_s1 + $0xf8] sm:$0xff] }
   0xe   :  { %1550 = vmatpush3.bf16.msra.mxu0 %v1802_v28  ;;  %1582 = vmatprep.subr.bf16.mxu1 %v1758_v14  ;;  %v1904_v56 = vpack.c.bf16 %v27_v53, %v26_v52  ;;  %v64_v57 = vld [vmem:[%s2340_s0 + $0x70] sm:$0xff]  ;;  %v1911_v58 = vpack.c.bf16 %v45_v55, %v44_v54  ;;  %v29_v60 = vld [vmem:[%s2339_s1 + $0x78] sm:$0xff]  ;;  %v67_v62 = vld [vmem:[%s2340_s0 + $0x88] sm:$0xff] }
   0xf   :  { %1552 = vmatprep.subr.bf16.mxu0 %v1806_v29  ;;  %v28_v59 = vld [vmem:[%s2339_s1 + $0x70] sm:$0xff]  ;;  %v50_v63 = vld [vmem:[%s2340_s0] sm:$0xff]  ;;  %v53_v6 = vld [vmem:[%s2340_s0 + $0x18] sm:$0xff] }
  0x10   :  { %1435 = vmatmul.mubr.msk.f32.gmra.mrb[2].mxu1 %vm71_vm1, %v55_v35  ;;  %v1924_v61 = vpack.c.bf16 %v29_v60, %v28_v59  ;;  %v70_v1 = vld [vmem:[%s2340_s0 + $0xa0] sm:$0xff]  ;;  %v1083_v3 = vld [vmem:[%s2340_s0 + $0xb0] sm:$0xff]  ;;  %v57_v7 = vld [vmem:[%s2340_s0 + $0x38] sm:$0xff] }
  0x11   :  { %1584 = vmatpush3.bf16.msra.mxu1 %v1773_v19  ;;  %1437 = vmatprep.mubr.msk.f32.mxu1 %vm1699_vm0, %v1700_v4  ;;  %v54_v2 = vld [vmem:[%s2340_s0 + $0x20] sm:$0xff]  ;;  %v56_v8 = vld [vmem:[%s2340_s0 + $0x30] sm:$0xff]  ;;  %v1082_v11 = vld [vmem:[%s2340_s0 + $0xa8] sm:$0xff] }
  0x12   :  { %1554 = vmatpush3.bf16.msra.mxu0 %v1823_v34  ;;  %1586 = vmatprep.subr.bf16.mxu1 %v1783_v22  ;;  %v60_v12 = vld [vmem:[%s2340_s0 + $0x50] sm:$0xff]  ;;  %v1086_v13 = vld [vmem:[%s2340_s0 + $0xc8] sm:$0xff]  ;;  %v1085_v16 = vld [vmem:[%s2340_s0 + $0xc0] sm:$0xff] }
  0x13   :  { %1556 = vmatprep.subr.bf16.mxu0 %v1830_v36  ;;  %v59_v15 = vld [vmem:[%s2340_s0 + $0x48] sm:$0xff]  ;;  %v1089_v20 = vld [vmem:[%s2340_s0 + $0xe0] sm:$0xff]  ;;  %v1088_v23 = vld [vmem:[%s2340_s0 + $0xd8] sm:$0xff] }
  0x14   :  { %1438 = vmatmul.mubr.msk.f32.gmra.mrb[4].mxu1 %vm71_vm1, %v58_v43  ;;  %v63_v17 = vld [vmem:[%s2340_s0 + $0x68] sm:$0xff]  ;;  %v62_v21 = vld [vmem:[%s2340_s0 + $0x60] sm:$0xff]  ;;  %v1092_v25 = vld [vmem:[%s2340_s0 + $0xf8] sm:$0xff] }
  0x15   :  { %1588 = vmatpush3.bf16.msra.mxu1 %v1802_v28  ;;  %1440 = vmatprep.mubr.msk.f32.mxu1 %vm1699_vm0, %v1700_v4  ;;  %v66_v24 = vld [vmem:[%s2340_s0 + $0x80] sm:$0xff]  ;;  %v65_v26 = vld [vmem:[%s2340_s0 + $0x78] sm:$0xff]  ;;  %v1091_v27 = vld [vmem:[%s2340_s0 + $0xf0] sm:$0xff] }
  0x16   :  { %1558 = vmatpush3.bf16.msra.mxu0 %v1852_v42  ;;  %1590 = vmatprep.subr.bf16.mxu1 %v1806_v29  ;;  %v69_v30 = vld [vmem:[%s2340_s0 + $0x98] sm:$0xff]  ;;  %v1095_v31 = vld [vmem:[%s2340_s0 + $0x110] sm:$0xff]  ;;  %v1094_v33 = vld [vmem:[%s2340_s0 + $0x108] sm:$0xff] }
  0x17   :  { %1560 = vmatprep.subr.bf16.mxu0 %v1859_v44  ;;  %v68_v32 = vld [vmem:[%s2340_s0 + $0x90] sm:$0xff]  ;;  %v1098_v35 = vld [vmem:[%s2340_s0 + $0x128] sm:$0xff]  ;;  %v1084_v37 = vld [vmem:[%s2340_s0 + $0xb8] sm:$0xff] }
  0x18   :  { %1441 = vmatmul.mubr.msk.f32.gmra.mrb[6].mxu1 %vm71_vm1, %v61_v50  ;;  %v1097_v38 = vld [vmem:[%s2340_s0 + $0x120] sm:$0xff]  ;;  %v1087_v40 = vld [vmem:[%s2340_s0 + $0xd0] sm:$0xff]  ;;  %v1100_v41 = vld [vmem:[%s2340_s0 + $0x138] sm:$0xff] }
  0x19   :  { %1592 = vmatpush3.bf16.msra.mxu1 %v1823_v34  ;;  %1443 = vmatprep.mubr.msk.f32.mxu1 %vm1699_vm0, %v1700_v4  ;;  %v1101_v39 = vld [vmem:[%s2340_s0 + $0x140] sm:$0xff]  ;;  %v1111_v43 = vld [vmem:[%s2340_s0 + $0x158] sm:$0xff]  ;;  %v1090_v45 = vld [vmem:[%s2340_s0 + $0xe8] sm:$0xff] }
  0x1a   :  { %1562 = vmatpush3.bf16.msra.mxu0 %v1878_v49  ;;  %1594 = vmatprep.subr.bf16.mxu1 %v1830_v36  ;;  %v1093_v46 = vld [vmem:[%s2340_s0 + $0x100] sm:$0xff]  ;;  %v1110_v47 = vld [vmem:[%s2340_s0 + $0x150] sm:$0xff]  ;;  %v1096_v50 = vld [vmem:[%s2340_s0 + $0x118] sm:$0xff] }
  0x1b   :  { %1564 = vmatprep.subr.bf16.mxu0 %v1885_v51  ;;  %v1114_v48 = vld [vmem:[%s2340_s0 + $0x170] sm:$0xff]  ;;  %v1117_v52 = vld [vmem:[%s2340_s0 + $0x188] sm:$0xff]  ;;  %v1120_v53 = vld [vmem:[%s2340_s0 + $0x1a0] sm:$0xff] }
  0x1c   :  { %1444 = vmatmul.mubr.msk.f32.gmra.mrb[8].mxu1 %vm71_vm1, %v64_v57  ;;  %v1123_v54 = vld [vmem:[%s2340_s0 + $0x1b8] sm:$0xff]  ;;  %v1118_v57 = vld [vmem:[%s2340_s0 + $0x190] sm:$0xff]  ;;  %v1139_v59 = vld [vmem:[%s2340_s0 + $0x200] sm:$0xff] }
  0x1d   :  { %1596 = vmatpush3.bf16.msra.mxu1 %v1852_v42  ;;  %1446 = vmatprep.mubr.msk.f32.mxu1 %vm1699_vm0, %v1700_v4  ;;  %v1115_v55 = vld [vmem:[%s2340_s0 + $0x178] sm:$0xff]  ;;  %v1141_v60 = vld [vmem:[%s2340_s0 + $0x210] sm:$0xff] }
  0x1e   :  { %1566 = vmatpush3.bf16.msra.mxu0 %v1904_v56  ;;  %1598 = vmatprep.subr.bf16.mxu1 %v1859_v44 }
  0x1f   :  { %1568 = vmatprep.subr.bf16.mxu0 %v1911_v58 }
  0x20   :  { %1447 = vmatmul.mubr.msk.f32.gmra.mrb[10].mxu1 %vm71_vm1, %v67_v62  ;;  %v1145_v62 = vld [vmem:[%s2340_s0 + $0x230] sm:$0xff] }
  0x21   :  { %1600 = vmatpush3.bf16.msra.mxu1 %v1878_v49  ;;  %1449 = vmatprep.mubr.msk.f32.mxu1 %vm1699_vm0, %v1700_v4 }
  0x22   :  { %1570 = vmatpush3.bf16.msra.mxu0 %v1924_v61  ;;  %1602 = vmatprep.subr.bf16.mxu1 %v1885_v51 }
  0x23   :  { %1609 = vmatprep.subr.bf16.mxu0 %v1698_v0 }
  0x24   :  { %1450 = vmatmul.mubr.msk.f32.gmra.mrb[12].mxu1 %vm71_vm1, %v70_v1  ;;  %v1148_v1 = vld [vmem:[%s2340_s0 + $0x248] sm:$0xff] }
  0x25   :  { %158 = vmatmul.mubr.f32.vlgmr.msra.gmra.mrb[0].mxu0 %v50_v63  ;;  %1604 = vmatpush3.bf16.msra.mxu1 %v1904_v56  ;;  %v1144_v63 = vld [vmem:[%s2340_s0 + $0x228] sm:$0xff] }
  0x26   :  { %1611 = vmatpush3.bf16.msra.mxu0 %v1744_v9  ;;  %162 = vmatprep.mubr.f32.mxu0 %v54_v2  ;;  %v1140_v2 = vld [vmem:[%s2340_s0 + $0x208] sm:$0xff] }
  0x27   :  { %1606 = vmatprep.subr.bf16.mxu1 %v1911_v58  ;;  %400 = vmatprep.mubr.f32.mxu1 %v1083_v3  ;;  %v1151_v3 = vld [vmem:[%s2340_s0 + $0x260] sm:$0xff] }
  0x28   :  { %1612 = vmatprep.subr.bf16.mxu0 %v1698_v0 }
  0x29   :  { %163 = vmatmul.mubr.f32.gmra.mrb[2].mxu0 %v53_v6  ;;  %1608 = vmatpush3.bf16.msra.mxu1 %v1924_v61  ;;  %v1143_v6 = vld [vmem:[%s2340_s0 + $0x220] sm:$0xff] }
  0x2a   :  { %167 = vmatprep.mubr.f32.mxu0 %v57_v7  ;;  %1616 = vmatprep.subr.bf16.mxu1 %v1733_v5  ;;  %v1154_v7 = vld [vmem:[%s2340_s0 + $0x278] sm:$0xff] }
  0x2b   :  { %1614 = vmatpush3.bf16.msra.mxu0 %v1771_v18 }
  0x2c   :  { %1647 = vmatprep.subr.bf16.mxu0 %v1698_v0  ;;  %401 = vmatmul.mubr.f32.vlgmr.msra.gmra.mrb[14].mxu1 %v1082_v11  ;;  %v1146_v11 = vld [vmem:[%s2340_s0 + $0x238] sm:$0xff] }
  0x2d   :  { %168 = vmatmul.mubr.f32.gmra.mrb[4].mxu0 %v56_v8  ;;  %1618 = vmatpush3.bf16.msra.mxu1 %v1746_v10  ;;  %v1153_v8 = vld [vmem:[%s2340_s0 + $0x270] sm:$0xff] }
  0x2e   :  { %172 = vmatprep.mubr.f32.mxu0 %v60_v12  ;;  %1620 = vmatprep.subr.bf16.mxu1 %v1758_v14  ;;  %v1157_v12 = vld [vmem:[%s2340_s0 + $0x290] sm:$0xff] }
  0x2f   :  { %405 = vmatprep.mubr.f32.mxu1 %v1086_v13  ;;  %v1156_v13 = vld [vmem:[%s2340_s0 + $0x288] sm:$0xff] }
  0x30   :  { %406 = vmatmul.mubr.f32.gmra.mrb[16].mxu1 %v1085_v16  ;;  %v1158_v16 = vld [vmem:[%s2340_s0 + $0x298] sm:$0xff] }
  0x31   :  { %173 = vmatmul.mubr.f32.gmra.mrb[6].mxu0 %v59_v15  ;;  %1622 = vmatpush3.bf16.msra.mxu1 %v1773_v19  ;;  %v1149_v15 = vld [vmem:[%s2340_s0 + $0x250] sm:$0xff] }
  0x32   :  { %177 = vmatprep.mubr.f32.mxu0 %v63_v17  ;;  %1624 = vmatprep.subr.bf16.mxu1 %v1783_v22  ;;  %v1152_v17 = vld [vmem:[%s2340_s0 + $0x268] sm:$0xff] }
  0x33   :  { %410 = vmatprep.mubr.f32.mxu1 %v1089_v20  ;;  %v1155_v20 = vld [vmem:[%s2340_s0 + $0x280] sm:$0xff] }
  0x34   :  { %411 = vmatmul.mubr.f32.gmra.mrb[18].mxu1 %v1088_v23 }
  0x35   :  { %178 = vmatmul.mubr.f32.gmra.mrb[8].mxu0 %v62_v21  ;;  %1626 = vmatpush3.bf16.msra.mxu1 %v1802_v28 }
  0x36   :  { %182 = vmatprep.mubr.f32.mxu0 %v66_v24  ;;  %1628 = vmatprep.subr.bf16.mxu1 %v1806_v29 }
  0x37   :  { %415 = vmatprep.mubr.f32.mxu1 %v1092_v25 }
  0x38   :  { %416 = vmatmul.mubr.f32.gmra.mrb[20].mxu1 %v1091_v27 }
  0x39   :  { %183 = vmatmul.mubr.f32.gmra.mrb[10].mxu0 %v65_v26  ;;  %1630 = vmatpush3.bf16.msra.mxu1 %v1823_v34 }
  0x3a   :  { %187 = vmatprep.mubr.f32.mxu0 %v69_v30  ;;  %1632 = vmatprep.subr.bf16.mxu1 %v1830_v36 }
  0x3b   :  { %420 = vmatprep.mubr.f32.mxu1 %v1095_v31 }
  0x3c   :  { %421 = vmatmul.mubr.f32.gmra.mrb[22].mxu1 %v1094_v33 }
  0x3d   :  { %188 = vmatmul.mubr.f32.gmra.mrb[12].mxu0 %v68_v32  ;;  %1634 = vmatpush3.bf16.msra.mxu1 %v1852_v42 }
  0x3e   :  { %1460 = vmatprep.mubr.msk.f32.mxu0 %vm1699_vm0, %v1700_v4  ;;  %1636 = vmatprep.subr.bf16.mxu1 %v1859_v44 }
  0x3f   :  { %425 = vmatprep.mubr.f32.mxu1 %v1098_v35 }
  0x40   :  { %426 = vmatmul.mubr.f32.gmra.mrb[24].mxu1 %v1097_v38 }
  0x41   :  { %1461 = vmatmul.mubr.msk.f32.vlgmr.msra.gmra.mrb[14].mxu0 %vm71_vm1, %v1084_v37  ;;  %1638 = vmatpush3.bf16.msra.mxu1 %v1878_v49 }
  0x42   :  { %1649 = vmatpush3.bf16.msra.mxu0 %v1744_v9  ;;  %1463 = vmatprep.mubr.msk.f32.mxu0 %vm1699_vm0, %v1700_v4 }
  0x43   :  { %1640 = vmatprep.subr.bf16.mxu1 %v1885_v51  ;;  %430 = vmatprep.mubr.f32.mxu1 %v1101_v39 }
  0x44   :  { %1650 = vmatprep.subr.bf16.mxu0 %v1698_v0  ;;  %431 = vmatmul.mubr.f32.gmra.mrb[26].mxu1 %v1100_v41 }
  0x45   :  { %1464 = vmatmul.mubr.msk.f32.gmra.mrb[16].mxu0 %vm71_vm1, %v1087_v40  ;;  %1642 = vmatpush3.bf16.msra.mxu1 %v1904_v56 }
  0x46   :  { %1466 = vmatprep.mubr.msk.f32.mxu0 %vm1699_vm0, %v1700_v4  ;;  %1644 = vmatprep.subr.bf16.mxu1 %v1911_v58 }
  0x47   :  { %650 = vmatprep.mubr.f32.mxu1 %v1111_v43  ;;  %1652 = vmatpush3.bf16.msra.mxu0 %v1771_v18 }
  0x48   :  { %1685 = vmatprep.subr.bf16.mxu0 %v1698_v0 }
  0x49   :  { %1467 = vmatmul.mubr.msk.f32.gmra.mrb[18].mxu0 %vm71_vm1, %v1090_v45  ;;  %1646 = vmatpush3.bf16.msra.mxu1 %v1924_v61 }
  0x4a   :  { %1469 = vmatprep.mubr.msk.f32.mxu0 %vm1699_vm0, %v1700_v4  ;;  %1654 = vmatprep.subr.bf16.mxu1 %v1733_v5  ;;  %v1113_v5 = vld [vmem:[%s2340_s0 + $0x168] sm:$0xff] }
  0x4c   :  { %651 = vmatmul.mubr.f32.vlgmr.msra.gmra.mrb[28].mxu1 %v1110_v47 }
  0x4d   :  { %1470 = vmatmul.mubr.msk.f32.gmra.mrb[20].mxu0 %vm71_vm1, %v1093_v46  ;;  %1656 = vmatpush3.bf16.msra.mxu1 %v1746_v10  ;;  %v1099_v10 = vld [vmem:[%s2340_s0 + $0x130] sm:$0xff] }
  0x4e   :  { %1472 = vmatprep.mubr.msk.f32.mxu0 %vm1699_vm0, %v1700_v4  ;;  %1658 = vmatprep.subr.bf16.mxu1 %v1758_v14  ;;  %v1116_v14 = vld [vmem:[%s2340_s0 + $0x180] sm:$0xff] }
  0x4f   :  { %655 = vmatprep.mubr.f32.mxu1 %v1114_v48 }
  0x50   :  { %656 = vmatmul.mubr.f32.gmra.mrb[30].mxu1 %v1113_v5 }
  0x51   :  { %1473 = vmatmul.mubr.msk.f32.gmra.mrb[22].mxu0 %vm71_vm1, %v1096_v50  ;;  %1660 = vmatpush3.bf16.msra.mxu1 %v1773_v19  ;;  %v1102_v19 = vld [vmem:[%s2340_s0 + $0x148] sm:$0xff] }
  0x52   :  { %1475 = vmatprep.mubr.msk.f32.mxu0 %vm1699_vm0, %v1700_v4  ;;  %1662 = vmatprep.subr.bf16.mxu1 %v1783_v22  ;;  %v1119_v22 = vld [vmem:[%s2340_s0 + $0x198] sm:$0xff] }
  0x53   :  { %660 = vmatprep.mubr.f32.mxu1 %v1117_v52 }
  0x54   :  { %661 = vmatmul.mubr.f32.gmra.mrb[32].mxu1 %v1116_v14 }
  0x55   :  { %1476 = vmatmul.mubr.msk.f32.gmra.mrb[24].mxu0 %vm71_vm1, %v1099_v10  ;;  %1664 = vmatpush3.bf16.msra.mxu1 %v1802_v28  ;;  %v1112_v28 = vld [vmem:[%s2340_s0 + $0x160] sm:$0xff] }
  0x56   :  { %1478 = vmatprep.mubr.msk.f32.mxu0 %vm1699_vm0, %v1700_v4  ;;  %1666 = vmatprep.subr.bf16.mxu1 %v1806_v29  ;;  %v1122_v29 = vld [vmem:[%s2340_s0 + $0x1b0] sm:$0xff] }
  0x57   :  { %665 = vmatprep.mubr.f32.mxu1 %v1120_v53 }
  0x58   :  { %666 = vmatmul.mubr.f32.gmra.mrb[34].mxu1 %v1119_v22 }
  0x59   :  { %1479 = vmatmul.mubr.msk.f32.gmra.mrb[26].mxu0 %vm71_vm1, %v1102_v19  ;;  %1668 = vmatpush3.bf16.msra.mxu1 %v1823_v34  ;;  %v1126_v34 = vld [vmem:[%s2340_s0 + $0x1d0] sm:$0xff] }
  0x5a   :  { %1489 = vmatprep.mubr.msk.f32.mxu0 %vm1699_vm0, %v1700_v4  ;;  %1670 = vmatprep.subr.bf16.mxu1 %v1830_v36  ;;  %v1125_v36 = vld [vmem:[%s2340_s0 + $0x1c8] sm:$0xff] }
  0x5b   :  { %670 = vmatprep.mubr.f32.mxu1 %v1123_v54 }
  0x5c   :  { %671 = vmatmul.mubr.f32.gmra.mrb[36].mxu1 %v1122_v29 }
  0x5d   :  { %1490 = vmatmul.mubr.msk.f32.vlgmr.msra.gmra.mrb[28].mxu0 %vm71_vm1, %v1112_v28  ;;  %1672 = vmatpush3.bf16.msra.mxu1 %v1852_v42  ;;  %v1129_v42 = vld [vmem:[%s2340_s0 + $0x1e8] sm:$0xff] }
  0x5e   :  { %1687 = vmatpush3.bf16.msra.mxu0 %v1744_v9  ;;  %1492 = vmatprep.mubr.msk.f32.mxu0 %vm1699_vm0, %v1700_v4 }
  0x5f   :  { %1674 = vmatprep.subr.bf16.mxu1 %v1859_v44  ;;  %675 = vmatprep.mubr.f32.mxu1 %v1126_v34  ;;  %v1128_v44 = vld [vmem:[%s2340_s0 + $0x1e0] sm:$0xff] }
  0x60   :  { %1688 = vmatprep.subr.bf16.mxu0 %v1698_v0  ;;  %676 = vmatmul.mubr.f32.gmra.mrb[38].mxu1 %v1125_v36 }
  0x61   :  { %1493 = vmatmul.mubr.msk.f32.gmra.mrb[30].mxu0 %vm71_vm1, %v1115_v55  ;;  %1676 = vmatpush3.bf16.msra.mxu1 %v1878_v49  ;;  %v1121_v49 = vld [vmem:[%s2340_s0 + $0x1a8] sm:$0xff] }
  0x62   :  { %1495 = vmatprep.mubr.msk.f32.mxu0 %vm1699_vm0, %v1700_v4  ;;  %1678 = vmatprep.subr.bf16.mxu1 %v1885_v51  ;;  %v1138_v51 = vld [vmem:[%s2340_s0 + $0x1f8] sm:$0xff] }
  0x63   :  { %680 = vmatprep.mubr.f32.mxu1 %v1129_v42  ;;  %1690 = vmatpush3.bf16.msra.mxu0 %v1771_v18 }
  0x64   :  { %681 = vmatmul.mubr.f32.gmra.mrb[40].mxu1 %v1128_v44 }
  0x65   :  { %1496 = vmatmul.mubr.msk.f32.gmra.mrb[32].mxu0 %vm71_vm1, %v1118_v57  ;;  %1680 = vmatpush3.bf16.msra.mxu1 %v1904_v56  ;;  %v1124_v56 = vld [vmem:[%s2340_s0 + $0x1c0] sm:$0xff] }
  0x66   :  { %1498 = vmatprep.mubr.msk.f32.mxu0 %vm1699_vm0, %v1700_v4  ;;  %1682 = vmatprep.subr.bf16.mxu1 %v1911_v58  ;;  %v1142_v58 = vld [vmem:[%s2340_s0 + $0x218] sm:$0xff] }
  0x67   :  { %900 = vmatprep.mubr.f32.mxu1 %v1139_v59 }
  0x69   :  { %1499 = vmatmul.mubr.msk.f32.gmra.mrb[34].mxu0 %vm71_vm1, %v1121_v49  ;;  %1684 = vmatpush3.bf16.msra.mxu1 %v1924_v61  ;;  %v1127_v61 = vld [vmem:[%s2340_s0 + $0x1d8] sm:$0xff] }
  0x6a   :  { %1501 = vmatprep.mubr.msk.f32.mxu0 %vm1699_vm0, %v1700_v4  ;;  %1691 = vmatprep.subr.bf16.mxu1 %v1698_v0 }
  0x6c   :  { %901 = vmatmul.mubr.f32.vlgmr.msra.gmra.mrb[42].mxu1 %v1138_v51 }
  0x6d   :  { %1502 = vmatmul.mubr.msk.f32.gmra.mrb[36].mxu0 %vm71_vm1, %v1124_v56  ;;  %905 = vmatprep.mubr.f32.mxu1 %v1142_v58 }
  0x6e   :  { %1504 = vmatprep.mubr.msk.f32.mxu0 %vm1699_vm0, %v1700_v4  ;;  %1693 = vmatpush3.bf16.msra.mxu1 %v1744_v9  ;;  %v1130_v9 = vld [vmem:[%s2340_s0 + $0x1f0] sm:$0xff] }
  0x6f   :  { %1692 = vmatprep.subr.bf16.mxu1 %v1698_v0  ;;  %v1147_v0 = vld [vmem:[%s2340_s0 + $0x240] sm:$0xff] }
  0x70   :  { %906 = vmatmul.mubr.f32.gmra.mrb[44].mxu1 %v1141_v60 }
  0x71   :  { %1505 = vmatmul.mubr.msk.f32.gmra.mrb[38].mxu0 %vm71_vm1, %v1127_v61  ;;  %910 = vmatprep.mubr.f32.mxu1 %v1145_v62 }
  0x72   :  { %1507 = vmatprep.mubr.msk.f32.mxu0 %vm1699_vm0, %v1700_v4  ;;  %1694 = vmatpush3.bf16.msra.mxu1 %v1771_v18  ;;  %v1150_v18 = vld [vmem:[%s2340_s0 + $0x258] sm:$0xff] }
  0x74   :  { %911 = vmatmul.mubr.f32.gmra.mrb[46].mxu1 %v1144_v63 }
  0x75   :  { %1508 = vmatmul.mubr.msk.f32.gmra.mrb[40].mxu0 %vm71_vm1, %v1130_v9  ;;  %915 = vmatprep.mubr.f32.mxu1 %v1148_v1 }
  0x76   :  { %1518 = vmatprep.mubr.msk.f32.mxu0 %vm1699_vm0, %v1700_v4 }
  0x78   :  { %916 = vmatmul.mubr.f32.gmra.mrb[48].mxu1 %v1147_v0 }
  0x79   :  { %1519 = vmatmul.mubr.msk.f32.vlgmr.msra.gmra.mrb[42].mxu0 %vm71_vm1, %v1140_v2  ;;  %920 = vmatprep.mubr.f32.mxu1 %v1151_v3 }
  0x7a   :  { %1521 = vmatprep.mubr.msk.f32.mxu0 %vm1699_vm0, %v1700_v4 }
  0x7c   :  { %921 = vmatmul.mubr.f32.gmra.mrb[50].mxu1 %v1150_v18 }
  0x7d   :  { %1522 = vmatmul.mubr.msk.f32.gmra.mrb[44].mxu0 %vm71_vm1, %v1143_v6  ;;  %925 = vmatprep.mubr.f32.mxu1 %v1154_v7 }
  0x7e   :  { %1524 = vmatprep.mubr.msk.f32.mxu0 %vm1699_vm0, %v1700_v4 }
  0x80   :  { %926 = vmatmul.mubr.f32.gmra.mrb[52].mxu1 %v1153_v8 }
  0x81   :  { %1525 = vmatmul.mubr.msk.f32.gmra.mrb[46].mxu0 %vm71_vm1, %v1146_v11  ;;  %930 = vmatprep.mubr.f32.mxu1 %v1157_v12 }
  0x82   :  { %1527 = vmatprep.mubr.msk.f32.mxu0 %vm1699_vm0, %v1700_v4 }
  0x84   :  { %931 = vmatmul.mubr.f32.gmra.mrb[54].mxu1 %v1156_v13 }
  0x85   :  { %1528 = vmatmul.mubr.msk.f32.gmra.mrb[48].mxu0 %vm71_vm1, %v1149_v15  ;;  %1536 = vmatprep.mubr.msk.f32.mxu1 %vm1699_vm0, %v1700_v4 }
  0x86   :  { %1530 = vmatprep.mubr.msk.f32.mxu0 %vm1699_vm0, %v1700_v4 }
  0x88   :  { %1537 = vmatmul.mubr.msk.f32.vlgmr.msra.gmra.mrb[56].mxu1 %vm71_vm1, %v1158_v16 }
  0x89   :  { %1531 = vmatmul.mubr.msk.f32.gmra.mrb[50].mxu0 %vm71_vm1, %v1152_v17 }
  0x8a   :  { %1533 = vmatprep.mubr.msk.f32.mxu0 %vm1699_vm0, %v1700_v4 }
  0x8d   :  { %1534 = vmatmul.mubr.msk.f32.gmra.mrb[52].mxu0 %vm71_vm1, %v1155_v20 }
  0xdf   :  { %v259_v21 = vpop.f32.mrb[0].mxu1 }
  0xe0   :  { %v1433_v23 = vpop.f32.mrb[1].mxu1 }
  0xe3   :  { %v264_v24 = vpop.f32.mrb[2].mxu1 }
  0xe4   :  { %v1436_v25 = vpop.f32.mrb[3].mxu1 }
  0xe7   :  { %v269_v26 = vpop.f32.mrb[4].mxu1 }
  0xe8   :  { %v1439_v27 = vpop.f32.mrb[5].mxu1 }
  0xeb   :  { %v274_v30 = vpop.f32.mrb[6].mxu1 }
  0xec   :  { %v1442_v31 = vpop.f32.mrb[7].mxu1 }
  0xef   :  { %v279_v32 = vpop.f32.mrb[8].mxu1 }
  0xf0   :  { %v1445_v33 = vpop.f32.mrb[9].mxu1 }
  0xf3   :  { %v284_v35 = vpop.f32.mrb[10].mxu1 }
  0xf4   :  { %v1448_v37 = vpop.f32.mrb[11].mxu1 }
  0xf7   :  { %v289_v4 = vpop.f32.mrb[12].mxu1 }
  0xf8   :  { %v1199_v38 = vpop.f32.mrb[0].mxu0  ;;  %v1451_v40 = vpop.f32.mrb[13].mxu1 }
  0xf9   :  { %v1200_v39 = vpop.f32.mrb[1].mxu0 }
  0xfa   :  { %v1201_v41 = vadd.f32 %v1200_v39, %v1199_v38 }
  0xfc   :  { %v2285_v43 = vadd.f32 %v1201_v41, %v259_v21  ;;  %v1202_v45 = vpop.f32.mrb[2].mxu0 }
  0xfd   :  { %v1203_v46 = vpop.f32.mrb[3].mxu0 }
  0xfe   :  { %v1204_v47 = vadd.f32 %v1203_v46, %v1202_v45 }
  0xff   :  { %v1263_v5 = vpop.f32.mrb[14].mxu1 }
 0x100   :  { %v2287_v48 = vadd.f32 %v1204_v47, %v264_v24  ;;  %v1205_v50 = vpop.f32.mrb[4].mxu0  ;;  %v1264_v10 = vpop.f32.mrb[15].mxu1 }
 0x101   :  { %v1206_v52 = vpop.f32.mrb[5].mxu0  ;;  %v1265_v53 = vadd.f32 %v1264_v10, %v1263_v5 }
 0x102   :  { %v1207_v14 = vadd.f32 %v1206_v52, %v1205_v50 }
 0x103   :  { %v1266_v54 = vpop.f32.mrb[16].mxu1 }
 0x104   :  { %v2289_v19 = vadd.f32 %v1207_v14, %v269_v26  ;;  %v1208_v22 = vpop.f32.mrb[6].mxu0  ;;  %v1267_v29 = vpop.f32.mrb[17].mxu1 }
 0x105   :  { %v1209_v28 = vpop.f32.mrb[7].mxu0  ;;  %v1268_v55 = vadd.f32 %v1267_v29, %v1266_v54 }
 0x106   :  { %v1210_v34 = vadd.f32 %v1209_v28, %v1208_v22 }
 0x107   :  { %v1269_v57 = vpop.f32.mrb[18].mxu1 }
 0x108   :  { %v2291_v36 = vadd.f32 %v1210_v34, %v274_v30  ;;  %v1211_v42 = vpop.f32.mrb[8].mxu0  ;;  %v1270_v59 = vpop.f32.mrb[19].mxu1 }
 0x109   :  { %v1212_v44 = vpop.f32.mrb[9].mxu0  ;;  %v1271_v51 = vadd.f32 %v1270_v59, %v1269_v57 }
 0x10a   :  { %v1213_v49 = vadd.f32 %v1212_v44, %v1211_v42 }
 0x10b   :  { %v1272_v60 = vpop.f32.mrb[20].mxu1 }
 0x10c   :  { %v2293_v56 = vadd.f32 %v1213_v49, %v279_v32  ;;  %v1214_v58 = vpop.f32.mrb[10].mxu0  ;;  %v1273_v62 = vpop.f32.mrb[21].mxu1 }
 0x10d   :  { %v1215_v61 = vpop.f32.mrb[11].mxu0  ;;  %v1274_v9 = vadd.f32 %v1273_v62, %v1272_v60 }
 0x10e   :  { %v1216_v63 = vadd.f32 %v1215_v61, %v1214_v58 }
 0x10f   :  { %v1275_v2 = vpop.f32.mrb[22].mxu1 }
 0x110   :  { %v2295_v1 = vadd.f32 %v1216_v63, %v284_v35  ;;  %v1217_v0 = vpop.f32.mrb[12].mxu0  ;;  %v1276_v18 = vpop.f32.mrb[23].mxu1 }
 0x111   :  { %v1218_v3 = vpop.f32.mrb[13].mxu0  ;;  %v1277_v7 = vadd.f32 %v1276_v18, %v1275_v2 }
 0x112   :  { %v1219_v6 = vadd.f32 %v1218_v3, %v1217_v0 }
 0x113   :  { %v1278_v12 = vpop.f32.mrb[24].mxu1 }
 0x114   :  { %v2297_v8 = vadd.f32 %v1219_v6, %v289_v4  ;;  %v502_v11 = vpop.f32.mrb[14].mxu0  ;;  %v1279_v16 = vpop.f32.mrb[25].mxu1 }
 0x115   :  { %v503_v13 = vadd.f32 %v1265_v53, %v502_v11  ;;  %v1462_v15 = vpop.f32.mrb[15].mxu0  ;;  %v1280_v17 = vadd.f32 %v1279_v16, %v1278_v12 }
 0x117   :  { %v536_v20 = vmax.f32 %v2285_v43, %v503_v13  ;;  %v1281_v23 = vpop.f32.mrb[26].mxu1 }
 0x118   :  { %v507_v21 = vpop.f32.mrb[16].mxu0  ;;  %v1282_v26 = vpop.f32.mrb[27].mxu1 }
 0x119   :  { %v508_v24 = vadd.f32 %v1268_v55, %v507_v21  ;;  %v1465_v25 = vpop.f32.mrb[17].mxu0  ;;  %v1283_v27 = vadd.f32 %v1282_v26, %v1281_v23 }
 0x11b   :  { %v537_v30 = vmax.f32 %v2287_v48, %v508_v24 }
 0x11c   :  { %v512_v31 = vpop.f32.mrb[18].mxu0 }
 0x11d   :  { %v513_v32 = vadd.f32 %v1271_v51, %v512_v31  ;;  %v1468_v33 = vpop.f32.mrb[19].mxu0 }
 0x11f   :  { %v538_v35 = vmax.f32 %v2289_v19, %v513_v32  ;;  %v1327_v38 = vpop.f32.mrb[28].mxu1 }
 0x120   :  { %v517_v37 = vpop.f32.mrb[20].mxu0  ;;  %v1328_v40 = vpop.f32.mrb[29].mxu1 }
 0x121   :  { %v518_v4 = vadd.f32 %v1274_v9, %v517_v37  ;;  %v1471_v39 = vpop.f32.mrb[21].mxu0  ;;  %v1329_v41 = vadd.f32 %v1328_v40, %v1327_v38 }
 0x123   :  { %v539_v43 = vmax.f32 %v2291_v36, %v518_v4  ;;  %v1330_v46 = vpop.f32.mrb[30].mxu1 }
 0x124   :  { %v522_v45 = vpop.f32.mrb[22].mxu0  ;;  %v1331_v5 = vpop.f32.mrb[31].mxu1 }
 0x125   :  { %v523_v47 = vadd.f32 %v1277_v7, %v522_v45  ;;  %v1474_v50 = vpop.f32.mrb[23].mxu0  ;;  %v1332_v52 = vadd.f32 %v1331_v5, %v1330_v46 }
 0x127   :  { %v540_v48 = vmax.f32 %v2293_v56, %v523_v47  ;;  %v1333_v14 = vpop.f32.mrb[32].mxu1 }
 0x128   :  { %v527_v10 = vpop.f32.mrb[24].mxu0  ;;  %v1334_v22 = vpop.f32.mrb[33].mxu1 }
 0x129   :  { %v528_v53 = vadd.f32 %v1280_v17, %v527_v10  ;;  %v1477_v19 = vpop.f32.mrb[25].mxu0  ;;  %v1335_v54 = vadd.f32 %v1334_v22, %v1333_v14  ;;  %v1166_v14 = vld [vmem:[%s2341_s2] ss:$0 sm:$0xff] }
 0x12b   :  { %v541_v28 = vmax.f32 %v2295_v1, %v528_v53  ;;  %v1336_v34 = vpop.f32.mrb[34].mxu1 }
 0x12c   :  { %v532_v29 = vpop.f32.mrb[26].mxu0  ;;  %v1337_v42 = vpop.f32.mrb[35].mxu1 }
 0x12d   :  { %v533_v55 = vadd.f32 %v1283_v27, %v532_v29  ;;  %v1480_v36 = vpop.f32.mrb[27].mxu0  ;;  %v1338_v57 = vadd.f32 %v1337_v42, %v1336_v34 }
 0x12f   :  { %v542_v44 = vmax.f32 %v2297_v8, %v533_v55  ;;  %v1339_v49 = vpop.f32.mrb[36].mxu1 }
 0x130   :  { %v752_v59 = vpop.f32.mrb[28].mxu0  ;;  %v1340_v58 = vpop.f32.mrb[37].mxu1 }
 0x131   :  { %v753_v51 = vadd.f32 %v1329_v41, %v752_v59  ;;  %v1491_v56 = vpop.f32.mrb[29].mxu0  ;;  %v1341_v60 = vadd.f32 %v1340_v58, %v1339_v49 }
 0x133   :  { %v786_v61 = vmax.f32 %v536_v20, %v753_v51  ;;  %v1342_v63 = vpop.f32.mrb[38].mxu1 }
 0x134   :  { %v757_v62 = vpop.f32.mrb[30].mxu0  ;;  %v1343_v1 = vpop.f32.mrb[39].mxu1 }
 0x135   :  { %v758_v9 = vadd.f32 %v1332_v52, %v757_v62  ;;  %v1494_v0 = vpop.f32.mrb[31].mxu0  ;;  %v1344_v2 = vadd.f32 %v1343_v1, %v1342_v63 }
 0x137   :  { %v787_v3 = vmax.f32 %v537_v30, %v758_v9  ;;  %v1345_v6 = vpop.f32.mrb[40].mxu1 }
 0x138   :  { %v762_v18 = vpop.f32.mrb[32].mxu0  ;;  %v1346_v12 = vpop.f32.mrb[41].mxu1 }
 0x139   :  { %v763_v7 = vadd.f32 %v1335_v54, %v762_v18  ;;  %v1497_v11 = vpop.f32.mrb[33].mxu0  ;;  %v1347_v8 = vadd.f32 %v1346_v12, %v1345_v6 }
 0x13b   :  { %v788_v13 = vmax.f32 %v538_v35, %v763_v7 }
 0x13c   :  { %v767_v15 = vpop.f32.mrb[34].mxu0 }
 0x13d   :  { %v768_v16 = vadd.f32 %v1338_v57, %v767_v15  ;;  %v1500_v17 = vpop.f32.mrb[35].mxu0 }
 0x13f   :  { %v2306_v21 = vmax.f32 %v539_v43, %v768_v16  ;;  %v1391_v23 = vpop.f32.mrb[42].mxu1 }
 0x140   :  { %v772_v20 = vpop.f32.mrb[36].mxu0  ;;  %v1392_v26 = vpop.f32.mrb[43].mxu1 }
 0x141   :  { %v773_v24 = vadd.f32 %v1341_v60, %v772_v20  ;;  %v1503_v25 = vpop.f32.mrb[37].mxu0  ;;  %v1393_v27 = vadd.f32 %v1392_v26, %v1391_v23 }
 0x143   :  { %v2308_v31 = vmax.f32 %v540_v48, %v773_v24  ;;  %v1394_v32 = vpop.f32.mrb[44].mxu1 }
 0x144   :  { %v777_v30 = vpop.f32.mrb[38].mxu0  ;;  %v1395_v38 = vpop.f32.mrb[45].mxu1 }
 0x145   :  { %v778_v33 = vadd.f32 %v1344_v2, %v777_v30  ;;  %v1506_v37 = vpop.f32.mrb[39].mxu0  ;;  %v1396_v4 = vadd.f32 %v1395_v38, %v1394_v32 }
 0x147   :  { %v2310_v35 = vmax.f32 %v541_v28, %v778_v33  ;;  %v1397_v40 = vpop.f32.mrb[46].mxu1 }
 0x148   :  { %v782_v39 = vpop.f32.mrb[40].mxu0  ;;  %v1398_v45 = vpop.f32.mrb[47].mxu1 }
 0x149   :  { %v783_v41 = vadd.f32 %v1347_v8, %v782_v39  ;;  %v1509_v43 = vpop.f32.mrb[41].mxu0  ;;  %v1399_v46 = vadd.f32 %v1398_v45, %v1397_v40 }
 0x14b   :  { %v792_v47 = vmax.f32 %v542_v44, %v783_v41  ;;  %v1400_v5 = vpop.f32.mrb[48].mxu1 }
 0x14c   :  { %v1002_v50 = vpop.f32.mrb[42].mxu0  ;;  %v1401_v10 = vpop.f32.mrb[49].mxu1 }
 0x14d   :  { %v1003_v52 = vadd.f32 %v1393_v27, %v1002_v50  ;;  %v1520_v48 = vpop.f32.mrb[43].mxu0  ;;  %v1402_v53 = vadd.f32 %v1401_v10, %v1400_v5 }
 0x14f   :  { %v1036_v19 = vmax.f32 %v786_v61, %v1003_v52  ;;  %v1403_v54 = vpop.f32.mrb[50].mxu1 }
 0x150   :  { %v1007_v22 = vpop.f32.mrb[44].mxu0  ;;  %v1404_v55 = vpop.f32.mrb[51].mxu1 }
 0x151   :  { %v1050_v28 = vadd.f32 %v1166_v14, %v1036_v19  ;;  %v1008_v29 = vadd.f32 %v1396_v4, %v1007_v22  ;;  %v1523_v34 = vpop.f32.mrb[45].mxu0  ;;  %v1405_v36 = vadd.f32 %v1404_v55, %v1403_v54 }
 0x153   :  { %v1057_v42 = vmax.f32 %v1050_v28, 0.0  ;;  %v1037_v57 = vmax.f32 %v787_v3, %v1008_v29  ;;  %v1406_v59 = vpop.f32.mrb[52].mxu1 }
 0x154   :  { %v1012_v44 = vpop.f32.mrb[46].mxu0  ;;  %v1407_v58 = vpop.f32.mrb[53].mxu1 }
 0x155   :  { %1064 = vst [vmem:[%s2342_s3] sm:$0xff] %v1057_v42  ;;  %v1051_v49 = vadd.f32 %v1166_v14, %v1037_v57  ;;  %v1013_v51 = vadd.f32 %v1399_v46, %v1012_v44  ;;  %v1526_v56 = vpop.f32.mrb[47].mxu0  ;;  %v1408_v60 = vadd.f32 %v1407_v58, %v1406_v59 }
 0x157   :  { %v1058_v61 = vmax.f32 %v1051_v49, 0.0  ;;  %v1038_v62 = vmax.f32 %v788_v13, %v1013_v51  ;;  %v1409_v63 = vpop.f32.mrb[54].mxu1 }
 0x158   :  { %v1017_v9 = vpop.f32.mrb[48].mxu0  ;;  %v1410_v2 = vpop.f32.mrb[55].mxu1 }
 0x159   :  { %1065 = vst [vmem:[%s2342_s3 + $0x8] sm:$0xff] %v1058_v61  ;;  %v1052_v0 = vadd.f32 %v1166_v14, %v1038_v62  ;;  %v1018_v1 = vadd.f32 %v1402_v53, %v1017_v9  ;;  %v1529_v3 = vpop.f32.mrb[49].mxu0  ;;  %v1411_v18 = vadd.f32 %v1410_v2, %v1409_v63 }
 0x15b   :  { %v1059_v6 = vmax.f32 %v1052_v0, 0.0  ;;  %v1039_v7 = vmax.f32 %v2306_v21, %v1018_v1  ;;  %v1032_v11 = vpop.f32.mrb[56].mxu1 }
 0x15c   :  { %v1022_v12 = vpop.f32.mrb[50].mxu0  ;;  %v1033_v13 = vadd.f32 %v1411_v18, %v1032_v11  ;;  %v1538_v17 = vpop.f32.mrb[57].mxu1 }
 0x15d   :  { %1066 = vst [vmem:[%s2342_s3 + $0x10] sm:$0xff] %v1059_v6  ;;  %v1053_v8 = vadd.f32 %v1166_v14, %v1039_v7  ;;  %v1023_v15 = vadd.f32 %v1405_v36, %v1022_v12  ;;  %v1532_v16 = vpop.f32.mrb[51].mxu0 }
 0x15e   :  { %v1042_v23 = vmax.f32 %v792_v47, %v1033_v13 }
 0x15f   :  { %v1060_v20 = vmax.f32 %v1053_v8, 0.0  ;;  %v1040_v24 = vmax.f32 %v2308_v31, %v1023_v15 }
 0x160   :  { %v1027_v25 = vpop.f32.mrb[52].mxu0  ;;  %v1056_v21 = vadd.f32 %v1166_v14, %v1042_v23 }
 0x161   :  { %1067 = vst [vmem:[%s2342_s3 + $0x18] sm:$0xff] %v1060_v20  ;;  %v1054_v26 = vadd.f32 %v1166_v14, %v1040_v24  ;;  %v1028_v27 = vadd.f32 %v1408_v60, %v1027_v25  ;;  %v1535_v30 = vpop.f32.mrb[53].mxu0 }
 0x162   :  { %v1063_v32 = vmax.f32 %v1056_v21, 0.0 }
 0x163   :  { %v1061_v33 = vmax.f32 %v1054_v26, 0.0  ;;  %v1041_v37 = vmax.f32 %v2310_v35, %v1028_v27 }
 0x164   :  { %1070 = vst [vmem:[%s2342_s3 + $0x30] sm:$0xff] %v1063_v32 }
 0x165   :  { %1068 = vst [vmem:[%s2342_s3 + $0x20] sm:$0xff] %v1061_v33  ;;  %v1055_v31 = vadd.f32 %v1166_v14, %v1041_v37 }
 0x167   :  { %v1062_v38 = vmax.f32 %v1055_v31, 0.0 }
 0x169   :  { %1069 = vst [vmem:[%s2342_s3 + $0x28] sm:$0xff] %v1062_v38 }

// kernel: cnn_forward.5
= control target key start
LH: loop header
LB: loop body
LE: loop exit
PB: predicated region body
PF: predicated region fallthrough
CT: control target
= control target key end

     0   :  { %vm1358_vm0 = vmmov 0   ;;  %vm240_vm1 = vcmask 523264   ;;  %s2098_s1 = inlined_call_operand.vmem [shape: f32[1600,128], index: 1, kind: input, shape index: {}]   ;;  %s2099_s0 = inlined_call_operand.vmem [shape: f32[8,1600], index: 0, kind: input, shape index: {}]   ;;  %s2100_s3 = inlined_call_operand.vmem [shape: f32[128,128], index: 3, kind: input, shape index: {}]   ;;  %s2101_s2 = inlined_call_operand.vmem [shape: f32[1,128], index: 2, kind: input, shape index: {}]   ;;  %s2102_s4 = inlined_call_operand.vmem [shape: f32[1,128], index: 4, kind: input, shape index: {}]   ;;  %s2103_s5 = inlined_call_operand.vmem [shape: f32[8,128], index: 5, kind: output, shape index: {}]  }
   0x1   :  { %v49_v0 = vld [vmem:[%s2098_s1 + $0x80] sm:$0xff]  ;;  %v50_v1 = vld [vmem:[%s2098_s1 + $0x88] sm:$0xff]  ;;  %v51_v11 = vld [vmem:[%s2098_s1 + $0x90] sm:$0xff] }
   0x2   :  { %v33_v2 = vld [vmem:[%s2098_s1] sm:$0xff]  ;;  %v1126_v3 = vpack.c.bf16 %v50_v1, %v49_v0  ;;  %v34_v4 = vld [vmem:[%s2098_s1 + $0x8] sm:$0xff]  ;;  %v52_v13 = vld [vmem:[%s2098_s1 + $0x98] sm:$0xff] }
   0x3   :  { %v81_v5 = vld [vmem:[%s2098_s1 + $0x180] sm:$0xff]  ;;  %v82_v6 = vld [vmem:[%s2098_s1 + $0x188] sm:$0xff]  ;;  %v1128_v7 = vpack.c.bf16 %v34_v4, %v33_v2  ;;  %v35_v14 = vld [vmem:[%s2098_s1 + $0x10] sm:$0xff]  ;;  %v1130_v16 = vpack.c.bf16 %v52_v13, %v51_v11 }
   0x4   :  { %v1158_v8 = vpack.c.bf16 %v82_v6, %v81_v5  ;;  %v65_v9 = vld [vmem:[%s2098_s1 + $0x100] sm:$0xff]  ;;  %v66_v10 = vld [vmem:[%s2098_s1 + $0x108] sm:$0xff]  ;;  %1127 = vmatprep.subr.bf16.mxu0 %v1126_v3  ;;  %v36_v15 = vld [vmem:[%s2098_s1 + $0x18] sm:$0xff] }
   0x5   :  { %v1160_v12 = vpack.c.bf16 %v66_v10, %v65_v9  ;;  %1129 = vmatpush3.bf16.msra.mxu0 %v1128_v7  ;;  %v1132_v17 = vpack.c.bf16 %v36_v15, %v35_v14  ;;  %v83_v18 = vld [vmem:[%s2098_s1 + $0x190] sm:$0xff]  ;;  %v84_v19 = vld [vmem:[%s2098_s1 + $0x198] sm:$0xff]  ;;  %v53_v23 = vld [vmem:[%s2098_s1 + $0xa0] sm:$0xff] }
   0x6   :  { %1159 = vmatprep.subr.bf16.mxu1 %v1158_v8  ;;  %v67_v20 = vld [vmem:[%s2098_s1 + $0x110] sm:$0xff]  ;;  %v1162_v21 = vpack.c.bf16 %v84_v19, %v83_v18  ;;  %v68_v22 = vld [vmem:[%s2098_s1 + $0x118] sm:$0xff]  ;;  %v54_v24 = vld [vmem:[%s2098_s1 + $0xa8] sm:$0xff]  ;;  %1131 = vmatprep.subr.bf16.mxu0 %v1130_v16 }
   0x7   :  { %1161 = vmatpush3.bf16.msra.mxu1 %v1160_v12  ;;  %v1164_v25 = vpack.c.bf16 %v68_v22, %v67_v20  ;;  %v1134_v26 = vpack.c.bf16 %v54_v24, %v53_v23  ;;  %v37_v27 = vld [vmem:[%s2098_s1 + $0x20] sm:$0xff]  ;;  %v38_v28 = vld [vmem:[%s2098_s1 + $0x28] sm:$0xff]  ;;  %v55_v35 = vld [vmem:[%s2098_s1 + $0xb0] sm:$0xff] }
   0x8   :  { %v85_v29 = vld [vmem:[%s2098_s1 + $0x1a0] sm:$0xff]  ;;  %1163 = vmatprep.subr.bf16.mxu1 %v1162_v21  ;;  %v86_v30 = vld [vmem:[%s2098_s1 + $0x1a8] sm:$0xff]  ;;  %v1136_v33 = vpack.c.bf16 %v38_v28, %v37_v27  ;;  %v56_v36 = vld [vmem:[%s2098_s1 + $0xb8] sm:$0xff] }
   0x9   :  { %v69_v31 = vld [vmem:[%s2098_s1 + $0x120] sm:$0xff]  ;;  %v70_v32 = vld [vmem:[%s2098_s1 + $0x128] sm:$0xff]  ;;  %1133 = vmatpush3.bf16.msra.mxu0 %v1132_v17  ;;  %v1166_v34 = vpack.c.bf16 %v86_v30, %v85_v29  ;;  %v39_v37 = vld [vmem:[%s2098_s1 + $0x30] sm:$0xff]  ;;  %v1138_v39 = vpack.c.bf16 %v56_v36, %v55_v35 }
   0xa   :  { %1135 = vmatprep.subr.bf16.mxu0 %v1134_v26  ;;  %v1168_v38 = vpack.c.bf16 %v70_v32, %v69_v31  ;;  %v40_v40 = vld [vmem:[%s2098_s1 + $0x38] sm:$0xff]  ;;  %v87_v41 = vld [vmem:[%s2098_s1 + $0x1b0] sm:$0xff]  ;;  %v57_v46 = vld [vmem:[%s2098_s1 + $0xc0] sm:$0xff] }
   0xb   :  { %1165 = vmatpush3.bf16.msra.mxu1 %v1164_v25  ;;  %v88_v42 = vld [vmem:[%s2098_s1 + $0x1b8] sm:$0xff]  ;;  %v71_v44 = vld [vmem:[%s2098_s1 + $0x130] sm:$0xff]  ;;  %v58_v47 = vld [vmem:[%s2098_s1 + $0xc8] sm:$0xff]  ;;  %v1140_v48 = vpack.c.bf16 %v40_v40, %v39_v37 }
   0xc   :  { %1167 = vmatprep.subr.bf16.mxu1 %v1166_v34  ;;  %v1170_v43 = vpack.c.bf16 %v88_v42, %v87_v41  ;;  %v72_v45 = vld [vmem:[%s2098_s1 + $0x138] sm:$0xff]  ;;  %v89_v49 = vld [vmem:[%s2098_s1 + $0x1c0] sm:$0xff]  ;;  %v90_v50 = vld [vmem:[%s2098_s1 + $0x1c8] sm:$0xff]  ;;  %v1142_v52 = vpack.c.bf16 %v58_v47, %v57_v46 }
   0xd   :  { %1137 = vmatpush3.bf16.msra.mxu0 %v1136_v33  ;;  %v1172_v51 = vpack.c.bf16 %v72_v45, %v71_v44  ;;  %v41_v53 = vld [vmem:[%s2098_s1 + $0x40] sm:$0xff]  ;;  %v42_v54 = vld [vmem:[%s2098_s1 + $0x48] sm:$0xff]  ;;  %v1174_v56 = vpack.c.bf16 %v90_v50, %v89_v49  ;;  %v59_v58 = vld [vmem:[%s2098_s1 + $0xd0] sm:$0xff] }
   0xe   :  { %1139 = vmatprep.subr.bf16.mxu0 %v1138_v39  ;;  %v73_v55 = vld [vmem:[%s2098_s1 + $0x140] sm:$0xff]  ;;  %v74_v57 = vld [vmem:[%s2098_s1 + $0x148] sm:$0xff]  ;;  %v60_v59 = vld [vmem:[%s2098_s1 + $0xd8] sm:$0xff]  ;;  %v1144_v62 = vpack.c.bf16 %v42_v54, %v41_v53 }
   0xf   :  { %1169 = vmatpush3.bf16.msra.mxu1 %v1168_v38  ;;  %v91_v60 = vld [vmem:[%s2098_s1 + $0x1d0] sm:$0xff]  ;;  %v92_v61 = vld [vmem:[%s2098_s1 + $0x1d8] sm:$0xff]  ;;  %v1176_v63 = vpack.c.bf16 %v74_v57, %v73_v55  ;;  %v1146_v0 = vpack.c.bf16 %v60_v59, %v59_v58  ;;  %v61_v6 = vld [vmem:[%s2098_s1 + $0xe0] sm:$0xff] }
  0x10   :  { %1171 = vmatprep.subr.bf16.mxu1 %v1170_v43  ;;  %v43_v1 = vld [vmem:[%s2098_s1 + $0x50] sm:$0xff]  ;;  %v44_v2 = vld [vmem:[%s2098_s1 + $0x58] sm:$0xff]  ;;  %v1178_v4 = vpack.c.bf16 %v92_v61, %v91_v60  ;;  %v62_v7 = vld [vmem:[%s2098_s1 + $0xe8] sm:$0xff] }
  0x11   :  { %1141 = vmatpush3.bf16.msra.mxu0 %v1140_v48  ;;  %v75_v3 = vld [vmem:[%s2098_s1 + $0x150] sm:$0xff]  ;;  %v76_v5 = vld [vmem:[%s2098_s1 + $0x158] sm:$0xff]  ;;  %v93_v8 = vld [vmem:[%s2098_s1 + $0x1e0] sm:$0xff]  ;;  %v1148_v10 = vpack.c.bf16 %v44_v2, %v43_v1  ;;  %v1150_v14 = vpack.c.bf16 %v62_v7, %v61_v6 }
  0x12   :  { %1143 = vmatprep.subr.bf16.mxu0 %v1142_v52  ;;  %v94_v9 = vld [vmem:[%s2098_s1 + $0x1e8] sm:$0xff]  ;;  %v45_v11 = vld [vmem:[%s2098_s1 + $0x60] sm:$0xff]  ;;  %v1180_v13 = vpack.c.bf16 %v76_v5, %v75_v3  ;;  %v63_v19 = vld [vmem:[%s2098_s1 + $0xf0] sm:$0xff] }
  0x13   :  { %1173 = vmatpush3.bf16.msra.mxu1 %v1172_v51  ;;  %v21_v12 = vld [vmem:[%s2099_s0 + $0x8] sm:$0xff]  ;;  %v77_v16 = vld [vmem:[%s2098_s1 + $0x160] sm:$0xff]  ;;  %v1182_v18 = vpack.c.bf16 %v94_v9, %v93_v8  ;;  %v64_v20 = vld [vmem:[%s2098_s1 + $0xf8] sm:$0xff] }
  0x14   :  { %1175 = vmatprep.subr.bf16.mxu1 %v1174_v56  ;;  %v46_v15 = vld [vmem:[%s2098_s1 + $0x68] sm:$0xff]  ;;  %308 = vmatprep.mubr.f32.mxu0 %v21_v12  ;;  %v23_v21 = vld [vmem:[%s2099_s0 + $0x18] sm:$0xff]  ;;  %v95_v22 = vld [vmem:[%s2098_s1 + $0x1f0] sm:$0xff]  ;;  %v1154_v26 = vpack.c.bf16 %v64_v20, %v63_v19 }
  0x15   :  { %1145 = vmatpush3.bf16.msra.mxu0 %v1144_v62  ;;  %v78_v17 = vld [vmem:[%s2098_s1 + $0x168] sm:$0xff]  ;;  %v96_v23 = vld [vmem:[%s2098_s1 + $0x1f8] sm:$0xff]  ;;  %378 = vmatprep.mubr.f32.mxu1 %v23_v21  ;;  %v1152_v24 = vpack.c.bf16 %v46_v15, %v45_v11  ;;  %v47_v27 = vld [vmem:[%s2098_s1 + $0x70] sm:$0xff] }
  0x16   :  { %1147 = vmatprep.subr.bf16.mxu0 %v1146_v0  ;;  %v1184_v25 = vpack.c.bf16 %v78_v17, %v77_v16  ;;  %v48_v28 = vld [vmem:[%s2098_s1 + $0x78] sm:$0xff]  ;;  %v79_v29 = vld [vmem:[%s2098_s1 + $0x170] sm:$0xff]  ;;  %v1186_v30 = vpack.c.bf16 %v96_v23, %v95_v22  ;;  %v113_v32 = vld [vmem:[%s2098_s1 + $0x280] sm:$0xff] }
  0x17   :  { %1177 = vmatpush3.bf16.msra.mxu1 %v1176_v63  ;;  %v80_v31 = vld [vmem:[%s2098_s1 + $0x178] sm:$0xff]  ;;  %v114_v33 = vld [vmem:[%s2098_s1 + $0x288] sm:$0xff]  ;;  %v145_v34 = vld [vmem:[%s2098_s1 + $0x380] sm:$0xff]  ;;  %v1156_v36 = vpack.c.bf16 %v48_v28, %v47_v27 }
  0x18   :  { %1179 = vmatprep.subr.bf16.mxu1 %v1178_v4  ;;  %v146_v35 = vld [vmem:[%s2098_s1 + $0x388] sm:$0xff]  ;;  %v1188_v37 = vpack.c.bf16 %v80_v31, %v79_v29  ;;  %v1190_v38 = vpack.c.bf16 %v114_v33, %v113_v32  ;;  %v97_v39 = vld [vmem:[%s2098_s1 + $0x200] sm:$0xff]  ;;  %v115_v44 = vld [vmem:[%s2098_s1 + $0x290] sm:$0xff] }
  0x19   :  { %1149 = vmatpush3.bf16.msra.mxu0 %v1148_v10  ;;  %v98_v40 = vld [vmem:[%s2098_s1 + $0x208] sm:$0xff]  ;;  %v129_v41 = vld [vmem:[%s2098_s1 + $0x300] sm:$0xff]  ;;  %v1222_v42 = vpack.c.bf16 %v146_v35, %v145_v34  ;;  %v116_v45 = vld [vmem:[%s2098_s1 + $0x298] sm:$0xff] }
  0x1a   :  { %1151 = vmatprep.subr.bf16.mxu0 %v1150_v14  ;;  %v130_v43 = vld [vmem:[%s2098_s1 + $0x308] sm:$0xff]  ;;  %v147_v46 = vld [vmem:[%s2098_s1 + $0x390] sm:$0xff]  ;;  %v148_v47 = vld [vmem:[%s2098_s1 + $0x398] sm:$0xff]  ;;  %v1192_v49 = vpack.c.bf16 %v98_v40, %v97_v39  ;;  %v1194_v52 = vpack.c.bf16 %v116_v45, %v115_v44 }
  0x1b   :  { %1181 = vmatpush3.bf16.msra.mxu1 %v1180_v13  ;;  %v20_v48 = vld [vmem:[%s2099_s0] sm:$0xff]  ;;  %v22_v50 = vld [vmem:[%s2099_s0 + $0x10] sm:$0xff]  ;;  %v1224_v51 = vpack.c.bf16 %v130_v43, %v129_v41  ;;  %v100_v54 = vld [vmem:[%s2098_s1 + $0x218] sm:$0xff]  ;;  %v1226_v56 = vpack.c.bf16 %v148_v47, %v147_v46 }
  0x1c   :  { %1183 = vmatprep.subr.bf16.mxu1 %v1182_v18  ;;  %v99_v53 = vld [vmem:[%s2098_s1 + $0x210] sm:$0xff]  ;;  %v132_v57 = vld [vmem:[%s2098_s1 + $0x318] sm:$0xff]  ;;  %v117_v58 = vld [vmem:[%s2098_s1 + $0x2a0] sm:$0xff] }
  0x1d   :  { %1153 = vmatpush3.bf16.msra.mxu0 %v1152_v24  ;;  %v131_v55 = vld [vmem:[%s2098_s1 + $0x310] sm:$0xff]  ;;  %v118_v59 = vld [vmem:[%s2098_s1 + $0x2a8] sm:$0xff]  ;;  %v149_v60 = vld [vmem:[%s2098_s1 + $0x3a0] sm:$0xff]  ;;  %v1196_v62 = vpack.c.bf16 %v100_v54, %v99_v53 }
  0x1e   :  { %1155 = vmatprep.subr.bf16.mxu0 %v1154_v26  ;;  %v150_v61 = vld [vmem:[%s2098_s1 + $0x3a8] sm:$0xff]  ;;  %v1228_v63 = vpack.c.bf16 %v132_v57, %v131_v55  ;;  %v1198_v0 = vpack.c.bf16 %v118_v59, %v117_v58  ;;  %v101_v1 = vld [vmem:[%s2098_s1 + $0x220] sm:$0xff]  ;;  %v119_v6 = vld [vmem:[%s2098_s1 + $0x2b0] sm:$0xff] }
  0x1f   :  { %1185 = vmatpush3.bf16.msra.mxu1 %v1184_v25  ;;  %v102_v2 = vld [vmem:[%s2098_s1 + $0x228] sm:$0xff]  ;;  %v133_v3 = vld [vmem:[%s2098_s1 + $0x320] sm:$0xff]  ;;  %v1230_v4 = vpack.c.bf16 %v150_v61, %v149_v60  ;;  %v120_v7 = vld [vmem:[%s2098_s1 + $0x2b8] sm:$0xff] }
  0x20   :  { %1187 = vmatprep.subr.bf16.mxu1 %v1186_v30  ;;  %v134_v5 = vld [vmem:[%s2098_s1 + $0x328] sm:$0xff]  ;;  %v151_v8 = vld [vmem:[%s2098_s1 + $0x3b0] sm:$0xff]  ;;  %v152_v9 = vld [vmem:[%s2098_s1 + $0x3b8] sm:$0xff]  ;;  %v1200_v10 = vpack.c.bf16 %v102_v2, %v101_v1  ;;  %v1202_v12 = vpack.c.bf16 %v120_v7, %v119_v6 }
  0x21   :  { %1157 = vmatpush3.bf16.msra.mxu0 %v1156_v36  ;;  %v1232_v11 = vpack.c.bf16 %v134_v5, %v133_v3  ;;  %v103_v13 = vld [vmem:[%s2098_s1 + $0x230] sm:$0xff]  ;;  %v104_v14 = vld [vmem:[%s2098_s1 + $0x238] sm:$0xff]  ;;  %v1234_v16 = vpack.c.bf16 %v152_v9, %v151_v8  ;;  %v121_v18 = vld [vmem:[%s2098_s1 + $0x2c0] sm:$0xff] }
  0x22   :  { %1191 = vmatprep.subr.bf16.mxu0 %v1190_v38  ;;  %v135_v15 = vld [vmem:[%s2098_s1 + $0x330] sm:$0xff]  ;;  %v136_v17 = vld [vmem:[%s2098_s1 + $0x338] sm:$0xff]  ;;  %v122_v19 = vld [vmem:[%s2098_s1 + $0x2c8] sm:$0xff]  ;;  %v1204_v23 = vpack.c.bf16 %v104_v14, %v103_v13 }
  0x23   :  { %1189 = vmatpush3.bf16.msra.mxu1 %v1188_v37  ;;  %v153_v20 = vld [vmem:[%s2098_s1 + $0x3c0] sm:$0xff]  ;;  %v154_v21 = vld [vmem:[%s2098_s1 + $0x3c8] sm:$0xff]  ;;  %v1236_v25 = vpack.c.bf16 %v136_v17, %v135_v15  ;;  %v1206_v26 = vpack.c.bf16 %v122_v19, %v121_v18  ;;  %v27_v29 = vld [vmem:[%s2099_s0 + $0x38] sm:$0xff] }
  0x24   :  { %1223 = vmatprep.subr.bf16.mxu1 %v1222_v42  ;;  %309 = vmatmul.mubr.f32.vlgmr.msra.gmra.mrb[0].mxu0 %v20_v48  ;;  %v25_v22 = vld [vmem:[%s2099_s0 + $0x28] sm:$0xff]  ;;  %v105_v24 = vld [vmem:[%s2098_s1 + $0x240] sm:$0xff]  ;;  %v1238_v30 = vpack.c.bf16 %v154_v21, %v153_v20  ;;  %v123_v32 = vld [vmem:[%s2098_s1 + $0x2d0] sm:$0xff] }
  0x25   :  { %1193 = vmatpush3.bf16.msra.mxu0 %v1192_v49  ;;  %448 = vmatprep.mubr.f32.mxu0 %v25_v22  ;;  %v106_v27 = vld [vmem:[%s2098_s1 + $0x248] sm:$0xff]  ;;  %v137_v28 = vld [vmem:[%s2098_s1 + $0x340] sm:$0xff]  ;;  %v124_v33 = vld [vmem:[%s2098_s1 + $0x2d8] sm:$0xff] }
  0x26   :  { %379 = vmatmul.mubr.f32.vlgmr.msra.gmra.mrb[0].mxu1 %v22_v50  ;;  %1195 = vmatprep.subr.bf16.mxu0 %v1194_v52  ;;  %v138_v31 = vld [vmem:[%s2098_s1 + $0x348] sm:$0xff]  ;;  %v155_v34 = vld [vmem:[%s2098_s1 + $0x3d0] sm:$0xff]  ;;  %v156_v35 = vld [vmem:[%s2098_s1 + $0x3d8] sm:$0xff]  ;;  %v1208_v36 = vpack.c.bf16 %v106_v27, %v105_v24  ;;  %v1210_v38 = vpack.c.bf16 %v124_v33, %v123_v32 }
  0x27   :  { %1225 = vmatpush3.bf16.msra.mxu1 %v1224_v51  ;;  %518 = vmatprep.mubr.f32.mxu1 %v27_v29  ;;  %v1240_v37 = vpack.c.bf16 %v138_v31, %v137_v28  ;;  %v107_v39 = vld [vmem:[%s2098_s1 + $0x250] sm:$0xff]  ;;  %v108_v40 = vld [vmem:[%s2098_s1 + $0x258] sm:$0xff]  ;;  %v1242_v42 = vpack.c.bf16 %v156_v35, %v155_v34  ;;  %v125_v44 = vld [vmem:[%s2098_s1 + $0x2e0] sm:$0xff] }
  0x28   :  { %1227 = vmatprep.subr.bf16.mxu1 %v1226_v56  ;;  %v139_v41 = vld [vmem:[%s2098_s1 + $0x350] sm:$0xff]  ;;  %v140_v43 = vld [vmem:[%s2098_s1 + $0x358] sm:$0xff]  ;;  %v126_v45 = vld [vmem:[%s2098_s1 + $0x2e8] sm:$0xff]  ;;  %v1212_v48 = vpack.c.bf16 %v108_v40, %v107_v39 }
  0x29   :  { %1197 = vmatpush3.bf16.msra.mxu0 %v1196_v62  ;;  %v157_v46 = vld [vmem:[%s2098_s1 + $0x3e0] sm:$0xff]  ;;  %v158_v47 = vld [vmem:[%s2098_s1 + $0x3e8] sm:$0xff]  ;;  %v1244_v49 = vpack.c.bf16 %v140_v43, %v139_v41  ;;  %v1214_v50 = vpack.c.bf16 %v126_v45, %v125_v44  ;;  %v127_v56 = vld [vmem:[%s2098_s1 + $0x2f0] sm:$0xff] }
  0x2a   :  { %1199 = vmatprep.subr.bf16.mxu0 %v1198_v0  ;;  %v109_v51 = vld [vmem:[%s2098_s1 + $0x260] sm:$0xff]  ;;  %v110_v52 = vld [vmem:[%s2098_s1 + $0x268] sm:$0xff]  ;;  %v1246_v54 = vpack.c.bf16 %v158_v47, %v157_v46  ;;  %v128_v57 = vld [vmem:[%s2098_s1 + $0x2f8] sm:$0xff] }
  0x2b   :  { %1229 = vmatpush3.bf16.msra.mxu1 %v1228_v63  ;;  %v141_v53 = vld [vmem:[%s2098_s1 + $0x360] sm:$0xff]  ;;  %v142_v55 = vld [vmem:[%s2098_s1 + $0x368] sm:$0xff]  ;;  %v159_v58 = vld [vmem:[%s2098_s1 + $0x3f0] sm:$0xff]  ;;  %v1216_v60 = vpack.c.bf16 %v110_v52, %v109_v51  ;;  %v1218_v62 = vpack.c.bf16 %v128_v57, %v127_v56 }
  0x2c   :  { %1231 = vmatprep.subr.bf16.mxu1 %v1230_v4  ;;  %v160_v59 = vld [vmem:[%s2098_s1 + $0x3f8] sm:$0xff]  ;;  %v1248_v61 = vpack.c.bf16 %v142_v55, %v141_v53  ;;  %v111_v63 = vld [vmem:[%s2098_s1 + $0x270] sm:$0xff]  ;;  %v177_v4 = vld [vmem:[%s2098_s1 + $0x480] sm:$0xff] }
  0x2d   :  { %1201 = vmatpush3.bf16.msra.mxu0 %v1200_v10  ;;  %v112_v0 = vld [vmem:[%s2098_s1 + $0x278] sm:$0xff]  ;;  %v143_v1 = vld [vmem:[%s2098_s1 + $0x370] sm:$0xff]  ;;  %v1250_v2 = vpack.c.bf16 %v160_v59, %v159_v58  ;;  %v178_v5 = vld [vmem:[%s2098_s1 + $0x488] sm:$0xff] }
  0x2e   :  { %1203 = vmatprep.subr.bf16.mxu0 %v1202_v12  ;;  %v144_v3 = vld [vmem:[%s2098_s1 + $0x378] sm:$0xff]  ;;  %v209_v6 = vld [vmem:[%s2098_s1 + $0x580] sm:$0xff]  ;;  %v210_v7 = vld [vmem:[%s2098_s1 + $0x588] sm:$0xff]  ;;  %v1220_v8 = vpack.c.bf16 %v112_v0, %v111_v63  ;;  %v1254_v10 = vpack.c.bf16 %v178_v5, %v177_v4 }
  0x2f   :  { %1233 = vmatpush3.bf16.msra.mxu1 %v1232_v11  ;;  %v1252_v9 = vpack.c.bf16 %v144_v3, %v143_v1  ;;  %v161_v11 = vld [vmem:[%s2098_s1 + $0x400] sm:$0xff]  ;;  %v162_v12 = vld [vmem:[%s2098_s1 + $0x408] sm:$0xff]  ;;  %v1286_v14 = vpack.c.bf16 %v210_v7, %v209_v6  ;;  %v180_v17 = vld [vmem:[%s2098_s1 + $0x498] sm:$0xff] }
  0x30   :  { %1235 = vmatprep.subr.bf16.mxu1 %v1234_v16  ;;  %v193_v13 = vld [vmem:[%s2098_s1 + $0x500] sm:$0xff]  ;;  %v194_v15 = vld [vmem:[%s2098_s1 + $0x508] sm:$0xff]  ;;  %v179_v16 = vld [vmem:[%s2098_s1 + $0x490] sm:$0xff]  ;;  %v1256_v21 = vpack.c.bf16 %v162_v12, %v161_v11 }
  0x31   :  { %1205 = vmatpush3.bf16.msra.mxu0 %v1204_v23  ;;  %v211_v18 = vld [vmem:[%s2098_s1 + $0x590] sm:$0xff]  ;;  %v212_v19 = vld [vmem:[%s2098_s1 + $0x598] sm:$0xff]  ;;  %v24_v20 = vld [vmem:[%s2099_s0 + $0x20] sm:$0xff]  ;;  %v1288_v23 = vpack.c.bf16 %v194_v15, %v193_v13  ;;  %v1258_v24 = vpack.c.bf16 %v180_v17, %v179_v16 }
  0x32   :  { %1207 = vmatprep.subr.bf16.mxu0 %v1206_v26  ;;  %v26_v22 = vld [vmem:[%s2099_s0 + $0x30] sm:$0xff]  ;;  %v164_v26 = vld [vmem:[%s2098_s1 + $0x418] sm:$0xff]  ;;  %v1290_v28 = vpack.c.bf16 %v212_v19, %v211_v18  ;;  %v182_v31 = vld [vmem:[%s2098_s1 + $0x4a8] sm:$0xff] }
  0x33   :  { %1237 = vmatpush3.bf16.msra.mxu1 %v1236_v25  ;;  %v163_v25 = vld [vmem:[%s2098_s1 + $0x410] sm:$0xff]  ;;  %v196_v29 = vld [vmem:[%s2098_s1 + $0x518] sm:$0xff]  ;;  %v213_v32 = vld [vmem:[%s2098_s1 + $0x5a0] sm:$0xff] }
  0x34   :  { %1239 = vmatprep.subr.bf16.mxu1 %v1238_v30  ;;  %v195_v27 = vld [vmem:[%s2098_s1 + $0x510] sm:$0xff]  ;;  %v181_v30 = vld [vmem:[%s2098_s1 + $0x4a0] sm:$0xff]  ;;  %v214_v33 = vld [vmem:[%s2098_s1 + $0x5a8] sm:$0xff]  ;;  %v1260_v35 = vpack.c.bf16 %v164_v26, %v163_v25 }
  0x35   :  { %1209 = vmatpush3.bf16.msra.mxu0 %v1208_v36  ;;  %v29_v34 = vld [vmem:[%s2099_s0 + $0x48] sm:$0xff]  ;;  %v31_v36 = vld [vmem:[%s2099_s0 + $0x58] sm:$0xff]  ;;  %v165_v39 = vld [vmem:[%s2098_s1 + $0x420] sm:$0xff] }
  0x36   :  { %1211 = vmatprep.subr.bf16.mxu0 %v1210_v38  ;;  %v1262_v38 = vpack.c.bf16 %v182_v31, %v181_v30  ;;  %v166_v40 = vld [vmem:[%s2098_s1 + $0x428] sm:$0xff]  ;;  %v197_v41 = vld [vmem:[%s2098_s1 + $0x520] sm:$0xff]  ;;  %v183_v44 = vld [vmem:[%s2098_s1 + $0x4b0] sm:$0xff] }
  0x37   :  { %1241 = vmatpush3.bf16.msra.mxu1 %v1240_v37  ;;  %v1292_v37 = vpack.c.bf16 %v196_v29, %v195_v27  ;;  %v198_v43 = vld [vmem:[%s2098_s1 + $0x528] sm:$0xff]  ;;  %v184_v45 = vld [vmem:[%s2098_s1 + $0x4b8] sm:$0xff]  ;;  %v215_v46 = vld [vmem:[%s2098_s1 + $0x5b0] sm:$0xff] }
  0x38   :  { %1243 = vmatprep.subr.bf16.mxu1 %v1242_v42  ;;  %v1294_v42 = vpack.c.bf16 %v214_v33, %v213_v32  ;;  %v216_v47 = vld [vmem:[%s2098_s1 + $0x5b8] sm:$0xff]  ;;  %v167_v51 = vld [vmem:[%s2098_s1 + $0x430] sm:$0xff]  ;;  %v185_v56 = vld [vmem:[%s2098_s1 + $0x4c0] sm:$0xff] }
  0x39   :  { %1213 = vmatpush3.bf16.msra.mxu0 %v1212_v48  ;;  %v1264_v48 = vpack.c.bf16 %v166_v40, %v165_v39  ;;  %v168_v52 = vld [vmem:[%s2098_s1 + $0x438] sm:$0xff]  ;;  %v199_v53 = vld [vmem:[%s2098_s1 + $0x530] sm:$0xff]  ;;  %v186_v57 = vld [vmem:[%s2098_s1 + $0x4c8] sm:$0xff] }
  0x3a   :  { %1215 = vmatprep.subr.bf16.mxu0 %v1214_v50  ;;  %v1266_v50 = vpack.c.bf16 %v184_v45, %v183_v44  ;;  %v200_v55 = vld [vmem:[%s2098_s1 + $0x538] sm:$0xff]  ;;  %v217_v58 = vld [vmem:[%s2098_s1 + $0x5c0] sm:$0xff]  ;;  %v218_v59 = vld [vmem:[%s2098_s1 + $0x5c8] sm:$0xff] }
  0x3b   :  { %1245 = vmatpush3.bf16.msra.mxu1 %v1244_v49  ;;  %v1296_v49 = vpack.c.bf16 %v198_v43, %v197_v41  ;;  %v169_v63 = vld [vmem:[%s2098_s1 + $0x440] sm:$0xff]  ;;  %v170_v0 = vld [vmem:[%s2098_s1 + $0x448] sm:$0xff]  ;;  %v187_v4 = vld [vmem:[%s2098_s1 + $0x4d0] sm:$0xff] }
  0x3c   :  { %1247 = vmatprep.subr.bf16.mxu1 %v1246_v54  ;;  %v1298_v54 = vpack.c.bf16 %v216_v47, %v215_v46  ;;  %v201_v1 = vld [vmem:[%s2098_s1 + $0x540] sm:$0xff]  ;;  %v202_v3 = vld [vmem:[%s2098_s1 + $0x548] sm:$0xff]  ;;  %v188_v5 = vld [vmem:[%s2098_s1 + $0x4d8] sm:$0xff]  ;;  %v1357_v46 = vmov 0.0|0.0  }
  0x3d   :  { %1217 = vmatpush3.bf16.msra.mxu0 %v1216_v60  ;;  %v1268_v60 = vpack.c.bf16 %v168_v52, %v167_v51  ;;  %v219_v6 = vld [vmem:[%s2098_s1 + $0x5d0] sm:$0xff]  ;;  %v220_v7 = vld [vmem:[%s2098_s1 + $0x5d8] sm:$0xff]  ;;  %v189_v16 = vld [vmem:[%s2098_s1 + $0x4e0] sm:$0xff] }
  0x3e   :  { %1219 = vmatprep.subr.bf16.mxu0 %v1218_v62  ;;  %v1270_v62 = vpack.c.bf16 %v186_v57, %v185_v56  ;;  %v171_v11 = vld [vmem:[%s2098_s1 + $0x450] sm:$0xff]  ;;  %v172_v12 = vld [vmem:[%s2098_s1 + $0x458] sm:$0xff]  ;;  %v190_v17 = vld [vmem:[%s2098_s1 + $0x4e8] sm:$0xff] }
  0x3f   :  { %1249 = vmatpush3.bf16.msra.mxu1 %v1248_v61  ;;  %v1300_v61 = vpack.c.bf16 %v200_v55, %v199_v53  ;;  %v203_v13 = vld [vmem:[%s2098_s1 + $0x550] sm:$0xff]  ;;  %v204_v15 = vld [vmem:[%s2098_s1 + $0x558] sm:$0xff]  ;;  %v221_v18 = vld [vmem:[%s2098_s1 + $0x5e0] sm:$0xff]  ;;  %v1359_v53 = vmov 0.0  }
  0x40   :  { %1251 = vmatprep.subr.bf16.mxu1 %v1250_v2  ;;  %v1302_v2 = vpack.c.bf16 %v218_v59, %v217_v58  ;;  %v222_v19 = vld [vmem:[%s2098_s1 + $0x5e8] sm:$0xff]  ;;  %v205_v25 = vld [vmem:[%s2098_s1 + $0x560] sm:$0xff]  ;;  %v192_v29 = vld [vmem:[%s2098_s1 + $0x4f8] sm:$0xff] }
  0x41   :  { %1221 = vmatpush3.bf16.msra.mxu0 %v1220_v8  ;;  %v1272_v8 = vpack.c.bf16 %v170_v0, %v169_v63  ;;  %v1310_v26 = vpack.c.bf16 %v222_v19, %v221_v18  ;;  %v206_v27 = vld [vmem:[%s2098_s1 + $0x568] sm:$0xff]  ;;  %v223_v30 = vld [vmem:[%s2098_s1 + $0x5f0] sm:$0xff]  ;;  %v224_v31 = vld [vmem:[%s2098_s1 + $0x5f8] sm:$0xff] }
  0x42   :  { %1255 = vmatprep.subr.bf16.mxu0 %v1254_v10  ;;  %v1274_v10 = vpack.c.bf16 %v188_v5, %v187_v4  ;;  %v1312_v33 = vpack.c.bf16 %v206_v27, %v205_v25  ;;  %v208_v39 = vld [vmem:[%s2098_s1 + $0x578] sm:$0xff]  ;;  %v226_v43 = vld [vmem:[%s2098_s1 + $0x608] sm:$0xff]  ;;  %v28_v44 = vld [vmem:[%s2099_s0 + $0x40] sm:$0xff] }
  0x43   :  { %1253 = vmatpush3.bf16.msra.mxu1 %v1252_v9  ;;  %v1304_v9 = vpack.c.bf16 %v202_v3, %v201_v1  ;;  %v30_v47 = vld [vmem:[%s2099_s0 + $0x50] sm:$0xff]  ;;  %v229_v51 = vld [vmem:[%s2098_s1 + $0x620] sm:$0xff]  ;;  %v230_v52 = vld [vmem:[%s2098_s1 + $0x628] sm:$0xff] }
  0x44   :  { %1287 = vmatprep.subr.bf16.mxu1 %v1286_v14  ;;  %449 = vmatmul.mubr.f32.vlgmr.msra.gmra.mrb[2].mxu0 %v24_v20  ;;  %v1306_v14 = vpack.c.bf16 %v220_v7, %v219_v6  ;;  %v1276_v20 = vpack.c.bf16 %v172_v12, %v171_v11  ;;  %v231_v55 = vld [vmem:[%s2098_s1 + $0x630] sm:$0xff]  ;;  %v232_v56 = vld [vmem:[%s2098_s1 + $0x638] sm:$0xff]  ;;  %v32_v58 = vld [vmem:[%s2099_s0 + $0x60] sm:$0xff] }
  0x45   :  { %1257 = vmatpush3.bf16.msra.mxu0 %v1256_v21  ;;  %588 = vmatprep.mubr.f32.mxu0 %v29_v34  ;;  %v1308_v21 = vpack.c.bf16 %v204_v15, %v203_v13  ;;  %v1328_v57 = vpack.c.bf16 %v232_v56, %v231_v55  ;;  %v735_v59 = vld [vmem:[%s2100_s3] sm:$0xff]  ;;  %v738_v63 = vld [vmem:[%s2100_s3 + $0x18] sm:$0xff]  ;;  %v741_v4 = vld [vmem:[%s2100_s3 + $0x30] sm:$0xff] }
  0x46   :  { %519 = vmatmul.mubr.f32.vlgmr.msra.gmra.mrb[2].mxu1 %v26_v22  ;;  %1259 = vmatprep.subr.bf16.mxu0 %v1258_v24  ;;  %v1278_v22 = vpack.c.bf16 %v190_v17, %v189_v16  ;;  %v174_v24 = vld [vmem:[%s2098_s1 + $0x468] sm:$0xff]  ;;  %v739_v1 = vld [vmem:[%s2100_s3 + $0x20] sm:$0xff]  ;;  %v742_v5 = vld [vmem:[%s2100_s3 + $0x38] sm:$0xff] }
  0x47   :  { %1289 = vmatpush3.bf16.msra.mxu1 %v1288_v23  ;;  %658 = vmatprep.mubr.f32.mxu1 %v31_v36  ;;  %v173_v23 = vld [vmem:[%s2098_s1 + $0x460] sm:$0xff]  ;;  %v176_v36 = vld [vmem:[%s2098_s1 + $0x478] sm:$0xff]  ;;  %v1340_v6 = vpack.c.bf16 %v742_v5, %v741_v4  ;;  %v749_v16 = vld [vmem:[%s2100_s3 + $0x70] sm:$0xff] }
  0x48   :  { %1291 = vmatprep.subr.bf16.mxu1 %v1290_v28  ;;  %v191_v28 = vld [vmem:[%s2098_s1 + $0x4f0] sm:$0xff]  ;;  %v1280_v32 = vpack.c.bf16 %v174_v24, %v173_v23  ;;  %v743_v7 = vld [vmem:[%s2100_s3 + $0x40] sm:$0xff]  ;;  %v746_v11 = vld [vmem:[%s2100_s3 + $0x58] sm:$0xff] }
  0x49   :  { %1261 = vmatpush3.bf16.msra.mxu0 %v1260_v35  ;;  %v1282_v34 = vpack.c.bf16 %v192_v29, %v191_v28  ;;  %v175_v35 = vld [vmem:[%s2098_s1 + $0x470] sm:$0xff]  ;;  %v747_v13 = vld [vmem:[%s2100_s3 + $0x60] sm:$0xff]  ;;  %v750_v17 = vld [vmem:[%s2100_s3 + $0x78] sm:$0xff] }
  0x4a   :  { %1263 = vmatprep.subr.bf16.mxu0 %v1262_v38  ;;  %v207_v38 = vld [vmem:[%s2098_s1 + $0x570] sm:$0xff]  ;;  %v1284_v40 = vpack.c.bf16 %v176_v36, %v175_v35  ;;  %v1352_v18 = vpack.c.bf16 %v750_v17, %v749_v16 }
  0x4b   :  { %1293 = vmatpush3.bf16.msra.mxu1 %v1292_v37  ;;  %v1314_v37 = vpack.c.bf16 %v224_v31, %v223_v30  ;;  %v1316_v41 = vpack.c.bf16 %v208_v39, %v207_v38 }
  0x4c   :  { %1295 = vmatprep.subr.bf16.mxu1 %v1294_v42  ;;  %v225_v42 = vld [vmem:[%s2098_s1 + $0x600] sm:$0xff] }
  0x4d   :  { %1265 = vmatpush3.bf16.msra.mxu0 %v1264_v48  ;;  %v1319_v45 = vpack.c.bf16 %v226_v43, %v225_v42  ;;  %v227_v48 = vld [vmem:[%s2098_s1 + $0x610] sm:$0xff] }
  0x4e   :  { %1267 = vmatprep.subr.bf16.mxu0 %v1266_v50 }
  0x4f   :  { %1297 = vmatpush3.bf16.msra.mxu1 %v1296_v49  ;;  %v228_v49 = vld [vmem:[%s2098_s1 + $0x618] sm:$0xff] }
  0x50   :  { %1299 = vmatprep.subr.bf16.mxu1 %v1298_v54  ;;  %v1322_v50 = vpack.c.bf16 %v228_v49, %v227_v48  ;;  %v1325_v54 = vpack.c.bf16 %v230_v52, %v229_v51  ;;  %v835_v48 = vld [vmem:[%s2102_s4] ss:$0 sm:$0xff] }
  0x51   :  { %1269 = vmatpush3.bf16.msra.mxu0 %v1268_v60  ;;  %v736_v60 = vld [vmem:[%s2100_s3 + $0x8] sm:$0xff] }
  0x52   :  { %1271 = vmatprep.subr.bf16.mxu0 %v1270_v62  ;;  %v1331_v62 = vpack.c.bf16 %v736_v60, %v735_v59 }
  0x53   :  { %1301 = vmatpush3.bf16.msra.mxu1 %v1300_v61  ;;  %v737_v61 = vld [vmem:[%s2100_s3 + $0x10] sm:$0xff] }
  0x54   :  { %1303 = vmatprep.subr.bf16.mxu1 %v1302_v2  ;;  %v1334_v0 = vpack.c.bf16 %v738_v63, %v737_v61  ;;  %v740_v2 = vld [vmem:[%s2100_s3 + $0x28] sm:$0xff] }
  0x55   :  { %1273 = vmatpush3.bf16.msra.mxu0 %v1272_v8  ;;  %v1337_v3 = vpack.c.bf16 %v740_v2, %v739_v1  ;;  %v744_v8 = vld [vmem:[%s2100_s3 + $0x48] sm:$0xff] }
  0x56   :  { %1275 = vmatprep.subr.bf16.mxu0 %v1274_v10  ;;  %v745_v10 = vld [vmem:[%s2100_s3 + $0x50] sm:$0xff] }
  0x57   :  { %1305 = vmatpush3.bf16.msra.mxu1 %v1304_v9  ;;  %v1343_v9 = vpack.c.bf16 %v744_v8, %v743_v7  ;;  %v1346_v12 = vpack.c.bf16 %v746_v11, %v745_v10 }
  0x58   :  { %1307 = vmatprep.subr.bf16.mxu1 %v1306_v14  ;;  %v748_v14 = vld [vmem:[%s2100_s3 + $0x68] sm:$0xff] }
  0x59   :  { %1277 = vmatpush3.bf16.msra.mxu0 %v1276_v20  ;;  %v1349_v15 = vpack.c.bf16 %v748_v14, %v747_v13  ;;  %v833_v20 = vld [vmem:[%s2101_s2] ss:$0 sm:$0xff] }
  0x5a   :  { %1279 = vmatprep.subr.bf16.mxu0 %v1278_v22 }
  0x5b   :  { %1309 = vmatpush3.bf16.msra.mxu1 %v1308_v21 }
  0x5c   :  { %1311 = vmatprep.subr.bf16.mxu1 %v1310_v26 }
  0x5d   :  { %1281 = vmatpush3.bf16.msra.mxu0 %v1280_v32 }
  0x5e   :  { %1283 = vmatprep.subr.bf16.mxu0 %v1282_v34 }
  0x5f   :  { %1313 = vmatpush3.bf16.msra.mxu1 %v1312_v33 }
  0x60   :  { %1315 = vmatprep.subr.bf16.mxu1 %v1314_v37 }
  0x61   :  { %1285 = vmatpush3.bf16.msra.mxu0 %v1284_v40 }
  0x62   :  { %1318 = vmatprep.subr.bf16.mxu0 %v1357_v46 }
  0x63   :  { %1317 = vmatpush3.bf16.msra.mxu1 %v1316_v41 }
  0x64   :  { %1330 = vmatprep.subr.bf16.mxu1 %v1357_v46  ;;  %589 = vmatmul.mubr.f32.vlgmr.msra.gmra.mrb[4].mxu0 %v28_v44 }
  0x65   :  { %1320 = vmatpush3.bf16.msra.mxu0 %v1319_v45  ;;  %1088 = vmatprep.mubr.msk.f32.mxu0 %vm1358_vm0, %v1359_v53 }
  0x66   :  { %659 = vmatmul.mubr.f32.vlgmr.msra.gmra.mrb[4].mxu1 %v30_v47  ;;  %1321 = vmatprep.subr.bf16.mxu0 %v1357_v46 }
  0x67   :  { %1123 = vmatprep.mubr.msk.f32.mxu1 %vm1358_vm0, %v1359_v53  ;;  %1332 = vmatpush3.bf16.msra.mxu1 %v1331_v62 }
  0x68   :  { %1333 = vmatprep.subr.bf16.mxu1 %v1357_v46 }
  0x69   :  { %1323 = vmatpush3.bf16.msra.mxu0 %v1322_v50 }
  0x6a   :  { %1324 = vmatprep.subr.bf16.mxu0 %v1357_v46 }
  0x6b   :  { %1335 = vmatpush3.bf16.msra.mxu1 %v1334_v0 }
  0x6c   :  { %1336 = vmatprep.subr.bf16.mxu1 %v1357_v46 }
  0x6d   :  { %1326 = vmatpush3.bf16.msra.mxu0 %v1325_v54 }
  0x6e   :  { %1327 = vmatprep.subr.bf16.mxu0 %v1357_v46 }
  0x6f   :  { %1338 = vmatpush3.bf16.msra.mxu1 %v1337_v3 }
  0x70   :  { %1339 = vmatprep.subr.bf16.mxu1 %v1357_v46 }
  0x71   :  { %1329 = vmatpush3.bf16.msra.mxu0 %v1328_v57 }
  0x73   :  { %1341 = vmatpush3.bf16.msra.mxu1 %v1340_v6 }
  0x74   :  { %1089 = vmatmul.mubr.msk.f32.vlgmr.msra.gmra.mrb[6].mxu0 %vm240_vm1, %v32_v58  ;;  %1342 = vmatprep.subr.bf16.mxu1 %v1357_v46 }
  0x77   :  { %1344 = vmatpush3.bf16.msra.mxu1 %v1343_v9 }
  0x78   :  { %1345 = vmatprep.subr.bf16.mxu1 %v1357_v46 }
  0x7b   :  { %1347 = vmatpush3.bf16.msra.mxu1 %v1346_v12 }
  0x7c   :  { %1348 = vmatprep.subr.bf16.mxu1 %v1357_v46 }
  0x7f   :  { %1350 = vmatpush3.bf16.msra.mxu1 %v1349_v15 }
  0x80   :  { %1351 = vmatprep.subr.bf16.mxu1 %v1357_v46 }
  0x83   :  { %1353 = vmatpush3.bf16.msra.mxu1 %v1352_v18 }
  0xf7   :  { %v868_v19 = vpop.f32.mrb[0].mxu0 }
  0xf8   :  { %v869_v21 = vpop.f32.mrb[1].mxu0 }
  0xf9   :  { %v903_v22 = vpop.f32.mrb[0].mxu1  ;;  %v870_v23 = vadd.f32 %v869_v21, %v868_v19 }
  0xfa   :  { %v904_v24 = vpop.f32.mrb[1].mxu1 }
  0xfb   :  { %v905_v25 = vadd.f32 %v904_v24, %v903_v22  ;;  %v311_v26 = vadd.f32 %v870_v23, %v833_v20 }
  0xfd   :  { %v381_v27 = vadd.f32 %v905_v25, %v311_v26 }
 0x117   :  { %v938_v28 = vpop.f32.mrb[2].mxu0 }
 0x118   :  { %v939_v29 = vpop.f32.mrb[3].mxu0 }
 0x119   :  { %v973_v30 = vpop.f32.mrb[2].mxu1  ;;  %v940_v31 = vadd.f32 %v939_v29, %v938_v28 }
 0x11a   :  { %v974_v32 = vpop.f32.mrb[3].mxu1 }
 0x11b   :  { %v975_v33 = vadd.f32 %v974_v32, %v973_v30  ;;  %v451_v34 = vadd.f32 %v940_v31, %v381_v27 }
 0x11d   :  { %v521_v35 = vadd.f32 %v975_v33, %v451_v34 }
 0x137   :  { %v1008_v36 = vpop.f32.mrb[4].mxu0 }
 0x138   :  { %v1009_v37 = vpop.f32.mrb[5].mxu0 }
 0x139   :  { %v1043_v38 = vpop.f32.mrb[4].mxu1  ;;  %v1010_v39 = vadd.f32 %v1009_v37, %v1008_v36 }
 0x13a   :  { %v1044_v40 = vpop.f32.mrb[5].mxu1 }
 0x13b   :  { %v1045_v41 = vadd.f32 %v1044_v40, %v1043_v38  ;;  %v591_v42 = vadd.f32 %v1010_v39, %v521_v35 }
 0x13d   :  { %v661_v43 = vadd.f32 %v1045_v41, %v591_v42 }
 0x147   :  { %v730_v44 = vpop.f32.mrb[6].mxu0 }
 0x148   :  { %v731_v45 = vadd.f32 %v730_v44, %v661_v43  ;;  %v1090_v46 = vpop.f32.mrb[7].mxu0 }
 0x14a   :  { %v734_v47 = vmax.f32 %v731_v45, 0.0 }
 0x14c   :  { %1124 = vmatmul.mubr.f32.vlgmr.msra.gmra.mrb[6].mxu1 %v734_v47 }
 0x21f   :  { %v824_v49 = vpop.f32.mrb[6].mxu1 }
 0x220   :  { %v825_v50 = vadd.f32 %v835_v48, %v824_v49  ;;  %v1125_v51 = vpop.f32.mrb[7].mxu1 }
 0x222   :  { %828 = vst [vmem:[%s2103_s5] sm:$0xff] %v825_v50 }

</bundles_post_ra>
